<compile_context>
chip_gen: v7x
topology: tpu7x:2x2x1
jax: 0.10.0
libtpu: 0.0.40
codegen_flags: <defaults>
</compile_context>

<pallas_src>
import jax
import jax.numpy as jnp
import numpy as np
from jax import lax
from jax.experimental import pallas as pl
from jax.experimental.pallas import tpu as pltpu

# --- module constants (from the PyTorch script) ---
ACT_SIZE = 27                                     # conv output spatial size
KERNEL_SIZE = 6
N_KERNELS = 16
RNN_UNITS = 16
STRIDE = 1
IN_CHANNELS = 2
IMG_SIZE = ACT_SIZE + KERNEL_SIZE - 1             # 32
N_POS = ACT_SIZE * ACT_SIZE                       # 729
RNN_INPUT = N_POS * N_KERNELS                     # 11664
ADAPTATION_RATE = 0.4
RECOVERY_RATE = 0.1
N_OUT = 2

N_ROWS = IN_CHANNELS * KERNEL_SIZE                # 12 shifted row-slabs per image
S_WIDE = 896                                      # slab width (>= 27*32 + 5, = 7*128)
C_WIDE = ACT_SIZE * IMG_SIZE                      # 864 wide conv width (27 rows of 32)


def _round_up(x, m):
    return ((x + m - 1) // m) * m


# ----------------------------------------------------------------------------
# Kernel 1: fused conv (wide layout) + input projection
#   per image: 6 matmuls (16,12)@(12,896), shifted & summed -> conv (16,864)
#   per block: z[g,h] = b_ih[h] + sum_oc relu(conv[g,oc,:]) . Wp[oc,h,:]
# ----------------------------------------------------------------------------
def conv_proj_kernel(s_ref, wd_ref, bconv_ref, wp_ref, bih_ref, conv_ref, z_ref):
    # s_ref:    (G, 12, 896)  s[g, ic*6+kh, q] = img_flat_padded[g, ic, kh*32 + q]
    # wd_ref:   (6, 16, 12)   conv weight regrouped per kw: wd[kw, oc, ic*6+kh]
    # bconv_ref:(16, 1)
    # wp_ref:   (16, 16, 864) W_ih in (oc, h, wide-q) layout, zero on junk columns
    # bih_ref:  (1, 16)
    # conv_ref: (G, 16, 864)  wide conv output (junk at ow in [27,32))
    # z_ref:    (G, 16)       fused input projection  relu(conv_flat) @ W_ih^T + b_ih
    g_count = s_ref.shape[0]
    bconv = bconv_ref[...]                                     # (16, 1)

    def per_image(g, carry):
        s0 = s_ref[g]                                          # (12, 896)
        acc = jnp.zeros((N_KERNELS, C_WIDE), jnp.float32)
        for d in range(KERNEL_SIZE):                           # 6 kw taps (static)
            m_d = jnp.dot(wd_ref[d], s0,
                          preferred_element_type=jnp.float32)  # (16, 896)
            acc = acc + m_d[:, d:d + C_WIDE]                   # shift-left by d, crop
        conv_ref[g] = acc + bconv
        return carry

    lax.fori_loop(0, g_count, per_image, 0)

    # Fused input projection over the whole resident block (ReLU recomputed per plane).
    z = jnp.zeros((g_count, RNN_UNITS), jnp.float32) + bih_ref[...]
    for oc in range(N_KERNELS):                                # 16 planes (static)
        relu_oc = jnp.maximum(conv_ref[:, oc, :], 0.0)         # (G, 864)
        z = z + lax.dot_general(
            relu_oc, wp_ref[oc],
            dimension_numbers=(((1,), (1,)), ((), ())),
            preferred_element_type=jnp.float32)                # (G, 16)
    z_ref[...] = z


def conv_proj(s, wd, b_conv, w_proj, b_ih, *, imgs_per_block=16):
    # s: (N, 12, 896), wd: (6, 16, 12), b_conv: (16, 1), w_proj: (16, 16, 864), b_ih: (1, 16)
    n = s.shape[0]
    g = max(1, min(imgs_per_block, n))
    n_pad = _round_up(n, g)
    if n_pad != n:
        s = jnp.pad(s, ((0, n_pad - n), (0, 0), (0, 0)))

    conv_wide, z = pl.pallas_call(
        conv_proj_kernel,
        out_shape=(
            jax.ShapeDtypeStruct((n_pad, N_KERNELS, C_WIDE), jnp.float32),
            jax.ShapeDtypeStruct((n_pad, RNN_UNITS), jnp.float32),
        ),
        grid_spec=pltpu.PrefetchScalarGridSpec(
            num_scalar_prefetch=0,
            grid=(n_pad // g,),
            in_specs=[
                pl.BlockSpec((g, N_ROWS, S_WIDE), lambda i: (i, 0, 0)),
                pl.BlockSpec((KERNEL_SIZE, N_KERNELS, N_ROWS), lambda i: (0, 0, 0)),
                pl.BlockSpec((N_KERNELS, 1), lambda i: (0, 0)),
                pl.BlockSpec((N_KERNELS, RNN_UNITS, C_WIDE), lambda i: (0, 0, 0)),
                pl.BlockSpec((1, RNN_UNITS), lambda i: (0, 0)),
            ],
            out_specs=[
                pl.BlockSpec((g, N_KERNELS, C_WIDE), lambda i: (i, 0, 0)),
                pl.BlockSpec((g, RNN_UNITS), lambda i: (i, 0)),
            ],
        ),
        compiler_params=pltpu.CompilerParams(dimension_semantics=("parallel",)),
    )(s, wd, b_conv, w_proj, b_ih)
    return conv_wide[:n], z[:n]


# ----------------------------------------------------------------------------
# Kernel 2: SimpleRNN recurrence with adaptation + fused FC head,
#   time-tiled grid with hx/adaptation carried in VMEM scratch across grid steps.
# ----------------------------------------------------------------------------
def rnn_fc_kernel(z_ref, whh_ref, bhh_ref, wfc_ref, bfc_ref,
                  rnn_ref, fc_ref, hx_sc, ad_sc):
    # z_ref: (tc, B, H) precomputed x @ W_ih^T + b_ih ; rnn_ref: (tc, B, H) ; fc_ref: (tc, B, 2)
    @pl.when(pl.program_id(0) == 0)
    def _():
        hx_sc[...] = jnp.zeros_like(hx_sc)
        ad_sc[...] = jnp.zeros_like(ad_sc)

    whh = whh_ref[...]
    bhh = bhh_ref[...]
    wfc = wfc_ref[...]
    bfc = bfc_ref[...]

    def step(t, carry):
        hx = hx_sc[...]
        adapt = ad_sc[...]
        pre = z_ref[t] + jnp.dot(hx, whh, preferred_element_type=jnp.float32) + bhh
        adapted = jnp.maximum(pre - adapt, 0.0)
        adapt = adapt + ADAPTATION_RATE * adapted
        adapt = adapt - RECOVERY_RATE * adapt
        ad_sc[...] = adapt
        hx_sc[...] = adapted                       # relu(adapted) == adapted (>= 0)
        rnn_ref[t] = adapted
        fc_ref[t] = jnp.dot(adapted, wfc, preferred_element_type=jnp.float32) + bfc
        return carry

    lax.fori_loop(0, z_ref.shape[0], step, 0)


def rnn_fc(z_seq, w_hh_t, b_hh_row, w_fc_t, b_fc_row, *, t_block=128):
    # z_seq: (T, B, H) seq-first
    t, b, h = z_seq.shape
    tc = min(t_block, t)
    t_pad = _round_up(t, tc)
    if t_pad != t:
        z_seq = jnp.pad(z_seq, ((0, t_pad - t), (0, 0), (0, 0)))

    rnn_seq, fc_seq = pl.pallas_call(
        rnn_fc_kernel,
        out_shape=(
            jax.ShapeDtypeStruct((t_pad, b, h), jnp.float32),
            jax.ShapeDtypeStruct((t_pad, b, N_OUT), jnp.float32),
        ),
        grid_spec=pltpu.PrefetchScalarGridSpec(
            num_scalar_prefetch=0,
            grid=(t_pad // tc,),
            in_specs=[
                pl.BlockSpec((tc, b, h), lambda i: (i, 0, 0)),
                pl.BlockSpec((h, h), lambda i: (0, 0)),
                pl.BlockSpec((1, h), lambda i: (0, 0)),
                pl.BlockSpec((h, N_OUT), lambda i: (0, 0)),
                pl.BlockSpec((1, N_OUT), lambda i: (0, 0)),
            ],
            out_specs=[
                pl.BlockSpec((tc, b, h), lambda i: (i, 0, 0)),
                pl.BlockSpec((tc, b, N_OUT), lambda i: (i, 0, 0)),
            ],
            scratch_shapes=[
                pltpu.VMEM((b, h), jnp.float32),   # hx carry
                pltpu.VMEM((b, h), jnp.float32),   # adaptation carry
            ],
        ),
        compiler_params=pltpu.CompilerParams(dimension_semantics=("arbitrary",)),
    )(z_seq, w_hh_t, b_hh_row, w_fc_t, b_fc_row)
    return rnn_seq[:t], fc_seq[:t]


# ----------------------------------------------------------------------------
# Glue: parameter init and the full forward
# ----------------------------------------------------------------------------
def init_params(key):
    k_conv, k_ih, k_hh, k_bih, k_bhh, k_fc = jax.random.split(key, 6)
    stdv = 1.0 / np.sqrt(RNN_UNITS)
    return dict(
        conv_w=(jax.random.normal(k_conv, (N_KERNELS, IN_CHANNELS, KERNEL_SIZE, KERNEL_SIZE),
                                  jnp.float32) * 0.01),
        conv_b=jnp.full((N_KERNELS,), 0.01, jnp.float32),
        w_ih=jax.random.uniform(k_ih, (RNN_UNITS, RNN_INPUT), jnp.float32, -stdv, stdv),
        w_hh=jax.random.uniform(k_hh, (RNN_UNITS, RNN_UNITS), jnp.float32, -stdv, stdv),
        b_ih=jax.random.uniform(k_bih, (RNN_UNITS,), jnp.float32, -stdv, stdv),
        b_hh=jax.random.uniform(k_bhh, (RNN_UNITS,), jnp.float32, -stdv, stdv),
        fc_w=jax.random.normal(k_fc, (2, RNN_UNITS), jnp.float32) * 0.01,
        fc_b=jnp.full((2,), 0.01, jnp.float32),
    )


@jax.jit
def model_forward(x, params):
    # x: (B, T, 2, 32, 32) float32
    B, T = x.shape[0], x.shape[1]
    n_imgs = B * T
    x_imgs = x.reshape(n_imgs, IN_CHANNELS, IMG_SIZE, IMG_SIZE)

    # Shifted-row slabs instead of a full im2col: s[n, ic*6+kh, q] = img_flat[n, ic, kh*32+q]
    x_flat = x_imgs.reshape(n_imgs, IN_CHANNELS, IMG_SIZE * IMG_SIZE)
    x_flat = jnp.pad(x_flat, ((0, 0), (0, 0), (0, IMG_SIZE)))            # zero tail padding
    rows = [x_flat[:, ic, kh * IMG_SIZE: kh * IMG_SIZE + S_WIDE]
            for ic in range(IN_CHANNELS) for kh in range(KERNEL_SIZE)]
    s = jnp.stack(rows, axis=1)                                          # (N, 12, 896)

    # Conv weights regrouped per kw tap: wd[kw, oc, ic*6+kh]
    wd = jnp.transpose(params["conv_w"], (3, 0, 1, 2)).reshape(
        KERNEL_SIZE, N_KERNELS, IN_CHANNELS * KERNEL_SIZE)               # (6, 16, 12)
    b_conv = params["conv_b"].reshape(N_KERNELS, 1)

    # W_ih relaid to the wide conv layout (oc, h, oh*32+ow), zero on junk ow in [27,32)
    w3 = params["w_ih"].reshape(RNN_UNITS, N_KERNELS, ACT_SIZE, ACT_SIZE)
    w3 = jnp.pad(w3, ((0, 0), (0, 0), (0, 0), (0, IMG_SIZE - ACT_SIZE)))  # (h, oc, 27, 32)
    w_proj = jnp.transpose(w3, (1, 0, 2, 3)).reshape(N_KERNELS, RNN_UNITS, C_WIDE)
    b_ih = params["b_ih"].reshape(1, RNN_UNITS)

    conv_wide, z = conv_proj(s, wd, b_conv, w_proj, b_ih)               # (N,16,864), (N,16)

    # Crop the wide layout back to NCHW 27x27 (XLA glue).
    cw = conv_wide.reshape(n_imgs, N_KERNELS, ACT_SIZE, IMG_SIZE)
    out_conv = cw[:, :, :, :ACT_SIZE].reshape(B, T, N_KERNELS, ACT_SIZE, ACT_SIZE)
    out_flat = jnp.maximum(out_conv.reshape(B, T, RNN_INPUT), 0.0)

    # Recurrence (seq-first) with fused FC head.
    z_seq = jnp.transpose(z.reshape(B, T, RNN_UNITS), (1, 0, 2))         # (T, B, 16)
    rnn_seq, fc_seq = rnn_fc(z_seq,
                             params["w_hh"].T,
                             params["b_hh"].reshape(1, RNN_UNITS),
                             params["fc_w"].T,
                             params["fc_b"].reshape(1, N_OUT))
    out_rnn = jnp.transpose(rnn_seq, (1, 0, 2))                          # (B, T, 16)
    out_fc = jnp.transpose(fc_seq, (1, 0, 2))                            # (B, T, 2)
    return out_fc, out_conv, out_flat, out_rnn


# ----------------------------------------------------------------------------
# Pure-JAX reference (sanity check)
# ----------------------------------------------------------------------------
def reference_forward(x, params):
    B, T = x.shape[0], x.shape[1]
    x_imgs = x.reshape(B * T, IN_CHANNELS, IMG_SIZE, IMG_SIZE)
    conv = lax.conv_general_dilated(
        x_imgs, params["conv_w"], (STRIDE, STRIDE), "VALID",
        dimension_numbers=("NCHW", "OIHW", "NCHW")) + params["conv_b"][None, :, None, None]
    out_conv = conv.reshape(B, T, N_KERNELS, ACT_SIZE, ACT_SIZE)
    out_flat = jnp.maximum(out_conv.reshape(B, T, RNN_INPUT), 0.0)

    hx = jnp.zeros((B, RNN_UNITS), jnp.float32)
    adapt = jnp.zeros_like(hx)
    outs = []
    for t in range(T):
        x_t = out_flat[:, t]
        pre = x_t @ params["w_ih"].T + params["b_ih"] + hx @ params["w_hh"].T + params["b_hh"]
        adapted = jnp.maximum(jnp.zeros_like(pre), pre - adapt)
        adapt = adapt + ADAPTATION_RATE * adapted
        adapt = adapt - RECOVERY_RATE * adapt
        hx = jnp.maximum(adapted, 0.0)
        outs.append(hx)
    out_rnn = jnp.stack(outs, axis=1)                                    # (B, T, 16)
    out_fc = out_rnn @ params["fc_w"].T + params["fc_b"]
    return out_fc, out_conv, out_flat, out_rnn


if __name__ == "__main__":
    key = jax.random.PRNGKey(0)
    k_params, k_x = jax.random.split(key)
    params = init_params(k_params)

    # small shapes consistent with the module: conv needs 2x32x32 input -> 16x27x27 output
    B, T = 2, 4
    x = jax.random.normal(k_x, (B, T, IN_CHANNELS, IMG_SIZE, IMG_SIZE), jnp.float32)

    outs = model_forward(x, params)
    outs = jax.block_until_ready(outs)

    refs = reference_forward(x, params)
    for o, r in zip(outs, refs):
        np.testing.assert_allclose(np.asarray(o), np.asarray(r), rtol=1e-2, atol=1e-2)

    print("KERNEL_OK")
</pallas_src>

<mosaic_0001>
module attributes {stable_mosaic.version = 11 : i64} {
  func.func @conv_proj_kernel(%arg0: i32, %arg1: memref<8x12x896xf32, #tpu.memory_space<vmem>>, %arg2: memref<6x16x12xf32, #tpu.memory_space<vmem>>, %arg3: memref<16x1xf32, #tpu.memory_space<vmem>>, %arg4: memref<16x16x864xf32, #tpu.memory_space<vmem>>, %arg5: memref<1x16xf32, #tpu.memory_space<vmem>>, %arg6: memref<8x16x864xf32, #tpu.memory_space<vmem>>, %arg7: memref<8x16xf32, #tpu.memory_space<vmem>>) attributes {dimension_semantics = [#tpu.dimension_semantics<parallel>], iteration_bounds = array<i64: 1>, scalar_prefetch = 0 : i64, scratch_operands = 0 : i64, tpu.core_type = #tpu.core_type<tc>, window_params = [{transform_indices = @transform_0, window_bounds = array<i64: 8, 12, 896>}, {pipeline_mode = #tpu.pipeline_mode<synchronous>, transform_indices = @transform_1, window_bounds = array<i64: 6, 16, 12>}, {pipeline_mode = #tpu.pipeline_mode<synchronous>, transform_indices = @transform_2, window_bounds = array<i64: 16, 1>}, {pipeline_mode = #tpu.pipeline_mode<synchronous>, transform_indices = @transform_3, window_bounds = array<i64: 16, 16, 864>}, {pipeline_mode = #tpu.pipeline_mode<synchronous>, transform_indices = @transform_4, window_bounds = array<i64: 1, 16>}, {transform_indices = @transform_5, window_bounds = array<i64: 8, 16, 864>}, {transform_indices = @transform_6, window_bounds = array<i64: 8, 16>}]} {
    %c0 = arith.constant 0 : index
    %c0_0 = arith.constant 0 : index
    %0 = vector.load %arg3[%c0, %c0_0] : memref<16x1xf32, #tpu.memory_space<vmem>>, vector<16x1xf32>
    %c0_i32 = arith.constant 0 : i32
    %c8_i32 = arith.constant 8 : i32
    %1 = arith.addi %c0_i32, %c8_i32 : i32
    %c1_i32 = arith.constant 1 : i32
    scf.for %arg8 = %c0_i32 to %1 step %c1_i32  : i32 {
      %135 = arith.index_cast %arg8 : i32 to index
      %c0_119 = arith.constant 0 : index
      %c0_120 = arith.constant 0 : index
      %136 = vector.load %arg1[%135, %c0_119, %c0_120] : memref<8x12x896xf32, #tpu.memory_space<vmem>>, vector<1x12x896xf32>
      %137 = vector.shape_cast %136 : vector<1x12x896xf32> to vector<12x896xf32>
      %cst_121 = arith.constant 0.000000e+00 : f32
      %138 = vector.broadcast %cst_121 : f32 to vector<16x864xf32>
      %c0_122 = arith.constant 0 : index
      %c0_123 = arith.constant 0 : index
      %c0_124 = arith.constant 0 : index
      %139 = vector.load %arg2[%c0_122, %c0_123, %c0_124] : memref<6x16x12xf32, #tpu.memory_space<vmem>>, vector<1x16x12xf32>
      %140 = vector.shape_cast %139 : vector<1x16x12xf32> to vector<16x12xf32>
      %cst_125 = arith.constant dense<0.000000e+00> : vector<16x896xf32>
      %141 = tpu.matmul %140, %137, %cst_125 {dimension_numbers = #tpu.dot_dimension_numbers<[1], [0], [0], [1], [0, 0, 1, 1], [], []>} : vector<16x12xf32>, vector<12x896xf32>, vector<16x896xf32> -> vector<16x896xf32>
      %142 = vector.extract_strided_slice %141 {offsets = [0, 0], sizes = [16, 864], strides = [1, 1]} : vector<16x896xf32> to vector<16x864xf32>
      %143 = arith.addf %138, %142 : vector<16x864xf32>
      %c1_126 = arith.constant 1 : index
      %c0_127 = arith.constant 0 : index
      %c0_128 = arith.constant 0 : index
      %144 = vector.load %arg2[%c1_126, %c0_127, %c0_128] : memref<6x16x12xf32, #tpu.memory_space<vmem>>, vector<1x16x12xf32>
      %145 = vector.shape_cast %144 : vector<1x16x12xf32> to vector<16x12xf32>
      %cst_129 = arith.constant dense<0.000000e+00> : vector<16x896xf32>
      %146 = tpu.matmul %145, %137, %cst_129 {dimension_numbers = #tpu.dot_dimension_numbers<[1], [0], [0], [1], [0, 0, 1, 1], [], []>} : vector<16x12xf32>, vector<12x896xf32>, vector<16x896xf32> -> vector<16x896xf32>
      %147 = vector.extract_strided_slice %146 {offsets = [0, 1], sizes = [16, 864], strides = [1, 1]} : vector<16x896xf32> to vector<16x864xf32>
      %148 = arith.addf %143, %147 : vector<16x864xf32>
      %c2_130 = arith.constant 2 : index
      %c0_131 = arith.constant 0 : index
      %c0_132 = arith.constant 0 : index
      %149 = vector.load %arg2[%c2_130, %c0_131, %c0_132] : memref<6x16x12xf32, #tpu.memory_space<vmem>>, vector<1x16x12xf32>
      %150 = vector.shape_cast %149 : vector<1x16x12xf32> to vector<16x12xf32>
      %cst_133 = arith.constant dense<0.000000e+00> : vector<16x896xf32>
      %151 = tpu.matmul %150, %137, %cst_133 {dimension_numbers = #tpu.dot_dimension_numbers<[1], [0], [0], [1], [0, 0, 1, 1], [], []>} : vector<16x12xf32>, vector<12x896xf32>, vector<16x896xf32> -> vector<16x896xf32>
      %152 = vector.extract_strided_slice %151 {offsets = [0, 2], sizes = [16, 864], strides = [1, 1]} : vector<16x896xf32> to vector<16x864xf32>
      %153 = arith.addf %148, %152 : vector<16x864xf32>
      %c3_134 = arith.constant 3 : index
      %c0_135 = arith.constant 0 : index
      %c0_136 = arith.constant 0 : index
      %154 = vector.load %arg2[%c3_134, %c0_135, %c0_136] : memref<6x16x12xf32, #tpu.memory_space<vmem>>, vector<1x16x12xf32>
      %155 = vector.shape_cast %154 : vector<1x16x12xf32> to vector<16x12xf32>
      %cst_137 = arith.constant dense<0.000000e+00> : vector<16x896xf32>
      %156 = tpu.matmul %155, %137, %cst_137 {dimension_numbers = #tpu.dot_dimension_numbers<[1], [0], [0], [1], [0, 0, 1, 1], [], []>} : vector<16x12xf32>, vector<12x896xf32>, vector<16x896xf32> -> vector<16x896xf32>
      %157 = vector.extract_strided_slice %156 {offsets = [0, 3], sizes = [16, 864], strides = [1, 1]} : vector<16x896xf32> to vector<16x864xf32>
      %158 = arith.addf %153, %157 : vector<16x864xf32>
      %c4_138 = arith.constant 4 : index
      %c0_139 = arith.constant 0 : index
      %c0_140 = arith.constant 0 : index
      %159 = vector.load %arg2[%c4_138, %c0_139, %c0_140] : memref<6x16x12xf32, #tpu.memory_space<vmem>>, vector<1x16x12xf32>
      %160 = vector.shape_cast %159 : vector<1x16x12xf32> to vector<16x12xf32>
      %cst_141 = arith.constant dense<0.000000e+00> : vector<16x896xf32>
      %161 = tpu.matmul %160, %137, %cst_141 {dimension_numbers = #tpu.dot_dimension_numbers<[1], [0], [0], [1], [0, 0, 1, 1], [], []>} : vector<16x12xf32>, vector<12x896xf32>, vector<16x896xf32> -> vector<16x896xf32>
      %162 = vector.extract_strided_slice %161 {offsets = [0, 4], sizes = [16, 864], strides = [1, 1]} : vector<16x896xf32> to vector<16x864xf32>
      %163 = arith.addf %158, %162 : vector<16x864xf32>
      %c5_142 = arith.constant 5 : index
      %c0_143 = arith.constant 0 : index
      %c0_144 = arith.constant 0 : index
      %164 = vector.load %arg2[%c5_142, %c0_143, %c0_144] : memref<6x16x12xf32, #tpu.memory_space<vmem>>, vector<1x16x12xf32>
      %165 = vector.shape_cast %164 : vector<1x16x12xf32> to vector<16x12xf32>
      %cst_145 = arith.constant dense<0.000000e+00> : vector<16x896xf32>
      %166 = tpu.matmul %165, %137, %cst_145 {dimension_numbers = #tpu.dot_dimension_numbers<[1], [0], [0], [1], [0, 0, 1, 1], [], []>} : vector<16x12xf32>, vector<12x896xf32>, vector<16x896xf32> -> vector<16x896xf32>
      %167 = vector.extract_strided_slice %166 {offsets = [0, 5], sizes = [16, 864], strides = [1, 1]} : vector<16x896xf32> to vector<16x864xf32>
      %168 = arith.addf %163, %167 : vector<16x864xf32>
      %169 = vector.broadcast %0 : vector<16x1xf32> to vector<16x864xf32>
      %170 = arith.addf %168, %169 : vector<16x864xf32>
      %171 = arith.index_cast %arg8 : i32 to index
      %c0_146 = arith.constant 0 : index
      %c0_147 = arith.constant 0 : index
      %172 = vector.load %arg6[%171, %c0_146, %c0_147] : memref<8x16x864xf32, #tpu.memory_space<vmem>>, vector<1x16x864xf32>
      %173 = vector.shape_cast %172 : vector<1x16x864xf32> to vector<16x864xf32>
      %174 = vector.shape_cast %170 : vector<16x864xf32> to vector<1x16x864xf32>
      tpu.vector_store %arg6[%171, %c0_146, %c0_147], %174 {strides = array<i32>} : memref<8x16x864xf32, #tpu.memory_space<vmem>>, vector<1x16x864xf32>,
    }
    %c8_i32_1 = arith.constant 8 : i32
    %cst = arith.constant 0.000000e+00 : f32
    %2 = vector.broadcast %cst : f32 to vector<8x16xf32>
    %c0_2 = arith.constant 0 : index
    %c0_3 = arith.constant 0 : index
    %3 = vector.load %arg5[%c0_2, %c0_3] : memref<1x16xf32, #tpu.memory_space<vmem>>, vector<1x16xf32>
    %4 = vector.broadcast %3 : vector<1x16xf32> to vector<8x16xf32>
    %5 = arith.addf %2, %4 : vector<8x16xf32>
    %c0_4 = arith.constant 0 : index
    %c0_5 = arith.constant 0 : index
    %c0_6 = arith.constant 0 : index
    %6 = vector.load %arg6[%c0_4, %c0_5, %c0_6] : memref<8x16x864xf32, #tpu.memory_space<vmem>>, vector<8x1x864xf32>
    %7 = vector.shape_cast %6 : vector<8x1x864xf32> to vector<8x864xf32>
    %cst_7 = arith.constant 0.000000e+00 : f32
    %8 = vector.broadcast %cst_7 : f32 to vector<8x864xf32>
    %9 = arith.maximumf %7, %8 : vector<8x864xf32>
    %c0_8 = arith.constant 0 : index
    %c0_9 = arith.constant 0 : index
    %c0_10 = arith.constant 0 : index
    %10 = vector.load %arg4[%c0_8, %c0_9, %c0_10] : memref<16x16x864xf32, #tpu.memory_space<vmem>>, vector<1x16x864xf32>
    %11 = vector.shape_cast %10 : vector<1x16x864xf32> to vector<16x864xf32>
    %cst_11 = arith.constant dense<0.000000e+00> : vector<8x16xf32>
    %12 = tpu.matmul %9, %11, %cst_11 {dimension_numbers = #tpu.dot_dimension_numbers<[1], [1], [0], [0], [0, 0, 1, 0], [], []>} : vector<8x864xf32>, vector<16x864xf32>, vector<8x16xf32> -> vector<8x16xf32>
    %13 = arith.addf %5, %12 : vector<8x16xf32>
    %c0_12 = arith.constant 0 : index
    %c1 = arith.constant 1 : index
    %c0_13 = arith.constant 0 : index
    %14 = vector.load %arg6[%c0_12, %c1, %c0_13] : memref<8x16x864xf32, #tpu.memory_space<vmem>>, vector<8x1x864xf32>
    %15 = vector.shape_cast %14 : vector<8x1x864xf32> to vector<8x864xf32>
    %cst_14 = arith.constant 0.000000e+00 : f32
    %16 = vector.broadcast %cst_14 : f32 to vector<8x864xf32>
    %17 = arith.maximumf %15, %16 : vector<8x864xf32>
    %c1_15 = arith.constant 1 : index
    %c0_16 = arith.constant 0 : index
    %c0_17 = arith.constant 0 : index
    %18 = vector.load %arg4[%c1_15, %c0_16, %c0_17] : memref<16x16x864xf32, #tpu.memory_space<vmem>>, vector<1x16x864xf32>
    %19 = vector.shape_cast %18 : vector<1x16x864xf32> to vector<16x864xf32>
    %cst_18 = arith.constant dense<0.000000e+00> : vector<8x16xf32>
    %20 = tpu.matmul %17, %19, %cst_18 {dimension_numbers = #tpu.dot_dimension_numbers<[1], [1], [0], [0], [0, 0, 1, 0], [], []>} : vector<8x864xf32>, vector<16x864xf32>, vector<8x16xf32> -> vector<8x16xf32>
    %21 = arith.addf %13, %20 : vector<8x16xf32>
    %c0_19 = arith.constant 0 : index
    %c2 = arith.constant 2 : index
    %c0_20 = arith.constant 0 : index
    %22 = vector.load %arg6[%c0_19, %c2, %c0_20] : memref<8x16x864xf32, #tpu.memory_space<vmem>>, vector<8x1x864xf32>
    %23 = vector.shape_cast %22 : vector<8x1x864xf32> to vector<8x864xf32>
    %cst_21 = arith.constant 0.000000e+00 : f32
    %24 = vector.broadcast %cst_21 : f32 to vector<8x864xf32>
    %25 = arith.maximumf %23, %24 : vector<8x864xf32>
    %c2_22 = arith.constant 2 : index
    %c0_23 = arith.constant 0 : index
    %c0_24 = arith.constant 0 : index
    %26 = vector.load %arg4[%c2_22, %c0_23, %c0_24] : memref<16x16x864xf32, #tpu.memory_space<vmem>>, vector<1x16x864xf32>
    %27 = vector.shape_cast %26 : vector<1x16x864xf32> to vector<16x864xf32>
    %cst_25 = arith.constant dense<0.000000e+00> : vector<8x16xf32>
    %28 = tpu.matmul %25, %27, %cst_25 {dimension_numbers = #tpu.dot_dimension_numbers<[1], [1], [0], [0], [0, 0, 1, 0], [], []>} : vector<8x864xf32>, vector<16x864xf32>, vector<8x16xf32> -> vector<8x16xf32>
    %29 = arith.addf %21, %28 : vector<8x16xf32>
    %c0_26 = arith.constant 0 : index
    %c3 = arith.constant 3 : index
    %c0_27 = arith.constant 0 : index
    %30 = vector.load %arg6[%c0_26, %c3, %c0_27] : memref<8x16x864xf32, #tpu.memory_space<vmem>>, vector<8x1x864xf32>
    %31 = vector.shape_cast %30 : vector<8x1x864xf32> to vector<8x864xf32>
    %cst_28 = arith.constant 0.000000e+00 : f32
    %32 = vector.broadcast %cst_28 : f32 to vector<8x864xf32>
    %33 = arith.maximumf %31, %32 : vector<8x864xf32>
    %c3_29 = arith.constant 3 : index
    %c0_30 = arith.constant 0 : index
    %c0_31 = arith.constant 0 : index
    %34 = vector.load %arg4[%c3_29, %c0_30, %c0_31] : memref<16x16x864xf32, #tpu.memory_space<vmem>>, vector<1x16x864xf32>
    %35 = vector.shape_cast %34 : vector<1x16x864xf32> to vector<16x864xf32>
    %cst_32 = arith.constant dense<0.000000e+00> : vector<8x16xf32>
    %36 = tpu.matmul %33, %35, %cst_32 {dimension_numbers = #tpu.dot_dimension_numbers<[1], [1], [0], [0], [0, 0, 1, 0], [], []>} : vector<8x864xf32>, vector<16x864xf32>, vector<8x16xf32> -> vector<8x16xf32>
    %37 = arith.addf %29, %36 : vector<8x16xf32>
    %c0_33 = arith.constant 0 : index
    %c4 = arith.constant 4 : index
    %c0_34 = arith.constant 0 : index
    %38 = vector.load %arg6[%c0_33, %c4, %c0_34] : memref<8x16x864xf32, #tpu.memory_space<vmem>>, vector<8x1x864xf32>
    %39 = vector.shape_cast %38 : vector<8x1x864xf32> to vector<8x864xf32>
    %cst_35 = arith.constant 0.000000e+00 : f32
    %40 = vector.broadcast %cst_35 : f32 to vector<8x864xf32>
    %41 = arith.maximumf %39, %40 : vector<8x864xf32>
    %c4_36 = arith.constant 4 : index
    %c0_37 = arith.constant 0 : index
    %c0_38 = arith.constant 0 : index
    %42 = vector.load %arg4[%c4_36, %c0_37, %c0_38] : memref<16x16x864xf32, #tpu.memory_space<vmem>>, vector<1x16x864xf32>
    %43 = vector.shape_cast %42 : vector<1x16x864xf32> to vector<16x864xf32>
    %cst_39 = arith.constant dense<0.000000e+00> : vector<8x16xf32>
    %44 = tpu.matmul %41, %43, %cst_39 {dimension_numbers = #tpu.dot_dimension_numbers<[1], [1], [0], [0], [0, 0, 1, 0], [], []>} : vector<8x864xf32>, vector<16x864xf32>, vector<8x16xf32> -> vector<8x16xf32>
    %45 = arith.addf %37, %44 : vector<8x16xf32>
    %c0_40 = arith.constant 0 : index
    %c5 = arith.constant 5 : index
    %c0_41 = arith.constant 0 : index
    %46 = vector.load %arg6[%c0_40, %c5, %c0_41] : memref<8x16x864xf32, #tpu.memory_space<vmem>>, vector<8x1x864xf32>
    %47 = vector.shape_cast %46 : vector<8x1x864xf32> to vector<8x864xf32>
    %cst_42 = arith.constant 0.000000e+00 : f32
    %48 = vector.broadcast %cst_42 : f32 to vector<8x864xf32>
    %49 = arith.maximumf %47, %48 : vector<8x864xf32>
    %c5_43 = arith.constant 5 : index
    %c0_44 = arith.constant 0 : index
    %c0_45 = arith.constant 0 : index
    %50 = vector.load %arg4[%c5_43, %c0_44, %c0_45] : memref<16x16x864xf32, #tpu.memory_space<vmem>>, vector<1x16x864xf32>
    %51 = vector.shape_cast %50 : vector<1x16x864xf32> to vector<16x864xf32>
    %cst_46 = arith.constant dense<0.000000e+00> : vector<8x16xf32>
    %52 = tpu.matmul %49, %51, %cst_46 {dimension_numbers = #tpu.dot_dimension_numbers<[1], [1], [0], [0], [0, 0, 1, 0], [], []>} : vector<8x864xf32>, vector<16x864xf32>, vector<8x16xf32> -> vector<8x16xf32>
    %53 = arith.addf %45, %52 : vector<8x16xf32>
    %c0_47 = arith.constant 0 : index
    %c6 = arith.constant 6 : index
    %c0_48 = arith.constant 0 : index
    %54 = vector.load %arg6[%c0_47, %c6, %c0_48] : memref<8x16x864xf32, #tpu.memory_space<vmem>>, vector<8x1x864xf32>
    %55 = vector.shape_cast %54 : vector<8x1x864xf32> to vector<8x864xf32>
    %cst_49 = arith.constant 0.000000e+00 : f32
    %56 = vector.broadcast %cst_49 : f32 to vector<8x864xf32>
    %57 = arith.maximumf %55, %56 : vector<8x864xf32>
    %c6_50 = arith.constant 6 : index
    %c0_51 = arith.constant 0 : index
    %c0_52 = arith.constant 0 : index
    %58 = vector.load %arg4[%c6_50, %c0_51, %c0_52] : memref<16x16x864xf32, #tpu.memory_space<vmem>>, vector<1x16x864xf32>
    %59 = vector.shape_cast %58 : vector<1x16x864xf32> to vector<16x864xf32>
    %cst_53 = arith.constant dense<0.000000e+00> : vector<8x16xf32>
    %60 = tpu.matmul %57, %59, %cst_53 {dimension_numbers = #tpu.dot_dimension_numbers<[1], [1], [0], [0], [0, 0, 1, 0], [], []>} : vector<8x864xf32>, vector<16x864xf32>, vector<8x16xf32> -> vector<8x16xf32>
    %61 = arith.addf %53, %60 : vector<8x16xf32>
    %c0_54 = arith.constant 0 : index
    %c7 = arith.constant 7 : index
    %c0_55 = arith.constant 0 : index
    %62 = vector.load %arg6[%c0_54, %c7, %c0_55] : memref<8x16x864xf32, #tpu.memory_space<vmem>>, vector<8x1x864xf32>
    %63 = vector.shape_cast %62 : vector<8x1x864xf32> to vector<8x864xf32>
    %cst_56 = arith.constant 0.000000e+00 : f32
    %64 = vector.broadcast %cst_56 : f32 to vector<8x864xf32>
    %65 = arith.maximumf %63, %64 : vector<8x864xf32>
    %c7_57 = arith.constant 7 : index
    %c0_58 = arith.constant 0 : index
    %c0_59 = arith.constant 0 : index
    %66 = vector.load %arg4[%c7_57, %c0_58, %c0_59] : memref<16x16x864xf32, #tpu.memory_space<vmem>>, vector<1x16x864xf32>
    %67 = vector.shape_cast %66 : vector<1x16x864xf32> to vector<16x864xf32>
    %cst_60 = arith.constant dense<0.000000e+00> : vector<8x16xf32>
    %68 = tpu.matmul %65, %67, %cst_60 {dimension_numbers = #tpu.dot_dimension_numbers<[1], [1], [0], [0], [0, 0, 1, 0], [], []>} : vector<8x864xf32>, vector<16x864xf32>, vector<8x16xf32> -> vector<8x16xf32>
    %69 = arith.addf %61, %68 : vector<8x16xf32>
    %c0_61 = arith.constant 0 : index
    %c8 = arith.constant 8 : index
    %c0_62 = arith.constant 0 : index
    %70 = vector.load %arg6[%c0_61, %c8, %c0_62] : memref<8x16x864xf32, #tpu.memory_space<vmem>>, vector<8x1x864xf32>
    %71 = vector.shape_cast %70 : vector<8x1x864xf32> to vector<8x864xf32>
    %cst_63 = arith.constant 0.000000e+00 : f32
    %72 = vector.broadcast %cst_63 : f32 to vector<8x864xf32>
    %73 = arith.maximumf %71, %72 : vector<8x864xf32>
    %c8_64 = arith.constant 8 : index
    %c0_65 = arith.constant 0 : index
    %c0_66 = arith.constant 0 : index
    %74 = vector.load %arg4[%c8_64, %c0_65, %c0_66] : memref<16x16x864xf32, #tpu.memory_space<vmem>>, vector<1x16x864xf32>
    %75 = vector.shape_cast %74 : vector<1x16x864xf32> to vector<16x864xf32>
    %cst_67 = arith.constant dense<0.000000e+00> : vector<8x16xf32>
    %76 = tpu.matmul %73, %75, %cst_67 {dimension_numbers = #tpu.dot_dimension_numbers<[1], [1], [0], [0], [0, 0, 1, 0], [], []>} : vector<8x864xf32>, vector<16x864xf32>, vector<8x16xf32> -> vector<8x16xf32>
    %77 = arith.addf %69, %76 : vector<8x16xf32>
    %c0_68 = arith.constant 0 : index
    %c9 = arith.constant 9 : index
    %c0_69 = arith.constant 0 : index
    %78 = vector.load %arg6[%c0_68, %c9, %c0_69] : memref<8x16x864xf32, #tpu.memory_space<vmem>>, vector<8x1x864xf32>
    %79 = vector.shape_cast %78 : vector<8x1x864xf32> to vector<8x864xf32>
    %cst_70 = arith.constant 0.000000e+00 : f32
    %80 = vector.broadcast %cst_70 : f32 to vector<8x864xf32>
    %81 = arith.maximumf %79, %80 : vector<8x864xf32>
    %c9_71 = arith.constant 9 : index
    %c0_72 = arith.constant 0 : index
    %c0_73 = arith.constant 0 : index
    %82 = vector.load %arg4[%c9_71, %c0_72, %c0_73] : memref<16x16x864xf32, #tpu.memory_space<vmem>>, vector<1x16x864xf32>
    %83 = vector.shape_cast %82 : vector<1x16x864xf32> to vector<16x864xf32>
    %cst_74 = arith.constant dense<0.000000e+00> : vector<8x16xf32>
    %84 = tpu.matmul %81, %83, %cst_74 {dimension_numbers = #tpu.dot_dimension_numbers<[1], [1], [0], [0], [0, 0, 1, 0], [], []>} : vector<8x864xf32>, vector<16x864xf32>, vector<8x16xf32> -> vector<8x16xf32>
    %85 = arith.addf %77, %84 : vector<8x16xf32>
    %c0_75 = arith.constant 0 : index
    %c10 = arith.constant 10 : index
    %c0_76 = arith.constant 0 : index
    %86 = vector.load %arg6[%c0_75, %c10, %c0_76] : memref<8x16x864xf32, #tpu.memory_space<vmem>>, vector<8x1x864xf32>
    %87 = vector.shape_cast %86 : vector<8x1x864xf32> to vector<8x864xf32>
    %cst_77 = arith.constant 0.000000e+00 : f32
    %88 = vector.broadcast %cst_77 : f32 to vector<8x864xf32>
    %89 = arith.maximumf %87, %88 : vector<8x864xf32>
    %c10_78 = arith.constant 10 : index
    %c0_79 = arith.constant 0 : index
    %c0_80 = arith.constant 0 : index
    %90 = vector.load %arg4[%c10_78, %c0_79, %c0_80] : memref<16x16x864xf32, #tpu.memory_space<vmem>>, vector<1x16x864xf32>
    %91 = vector.shape_cast %90 : vector<1x16x864xf32> to vector<16x864xf32>
    %cst_81 = arith.constant dense<0.000000e+00> : vector<8x16xf32>
    %92 = tpu.matmul %89, %91, %cst_81 {dimension_numbers = #tpu.dot_dimension_numbers<[1], [1], [0], [0], [0, 0, 1, 0], [], []>} : vector<8x864xf32>, vector<16x864xf32>, vector<8x16xf32> -> vector<8x16xf32>
    %93 = arith.addf %85, %92 : vector<8x16xf32>
    %c0_82 = arith.constant 0 : index
    %c11 = arith.constant 11 : index
    %c0_83 = arith.constant 0 : index
    %94 = vector.load %arg6[%c0_82, %c11, %c0_83] : memref<8x16x864xf32, #tpu.memory_space<vmem>>, vector<8x1x864xf32>
    %95 = vector.shape_cast %94 : vector<8x1x864xf32> to vector<8x864xf32>
    %cst_84 = arith.constant 0.000000e+00 : f32
    %96 = vector.broadcast %cst_84 : f32 to vector<8x864xf32>
    %97 = arith.maximumf %95, %96 : vector<8x864xf32>
    %c11_85 = arith.constant 11 : index
    %c0_86 = arith.constant 0 : index
    %c0_87 = arith.constant 0 : index
    %98 = vector.load %arg4[%c11_85, %c0_86, %c0_87] : memref<16x16x864xf32, #tpu.memory_space<vmem>>, vector<1x16x864xf32>
    %99 = vector.shape_cast %98 : vector<1x16x864xf32> to vector<16x864xf32>
    %cst_88 = arith.constant dense<0.000000e+00> : vector<8x16xf32>
    %100 = tpu.matmul %97, %99, %cst_88 {dimension_numbers = #tpu.dot_dimension_numbers<[1], [1], [0], [0], [0, 0, 1, 0], [], []>} : vector<8x864xf32>, vector<16x864xf32>, vector<8x16xf32> -> vector<8x16xf32>
    %101 = arith.addf %93, %100 : vector<8x16xf32>
    %c0_89 = arith.constant 0 : index
    %c12 = arith.constant 12 : index
    %c0_90 = arith.constant 0 : index
    %102 = vector.load %arg6[%c0_89, %c12, %c0_90] : memref<8x16x864xf32, #tpu.memory_space<vmem>>, vector<8x1x864xf32>
    %103 = vector.shape_cast %102 : vector<8x1x864xf32> to vector<8x864xf32>
    %cst_91 = arith.constant 0.000000e+00 : f32
    %104 = vector.broadcast %cst_91 : f32 to vector<8x864xf32>
    %105 = arith.maximumf %103, %104 : vector<8x864xf32>
    %c12_92 = arith.constant 12 : index
    %c0_93 = arith.constant 0 : index
    %c0_94 = arith.constant 0 : index
    %106 = vector.load %arg4[%c12_92, %c0_93, %c0_94] : memref<16x16x864xf32, #tpu.memory_space<vmem>>, vector<1x16x864xf32>
    %107 = vector.shape_cast %106 : vector<1x16x864xf32> to vector<16x864xf32>
    %cst_95 = arith.constant dense<0.000000e+00> : vector<8x16xf32>
    %108 = tpu.matmul %105, %107, %cst_95 {dimension_numbers = #tpu.dot_dimension_numbers<[1], [1], [0], [0], [0, 0, 1, 0], [], []>} : vector<8x864xf32>, vector<16x864xf32>, vector<8x16xf32> -> vector<8x16xf32>
    %109 = arith.addf %101, %108 : vector<8x16xf32>
    %c0_96 = arith.constant 0 : index
    %c13 = arith.constant 13 : index
    %c0_97 = arith.constant 0 : index
    %110 = vector.load %arg6[%c0_96, %c13, %c0_97] : memref<8x16x864xf32, #tpu.memory_space<vmem>>, vector<8x1x864xf32>
    %111 = vector.shape_cast %110 : vector<8x1x864xf32> to vector<8x864xf32>
    %cst_98 = arith.constant 0.000000e+00 : f32
    %112 = vector.broadcast %cst_98 : f32 to vector<8x864xf32>
    %113 = arith.maximumf %111, %112 : vector<8x864xf32>
    %c13_99 = arith.constant 13 : index
    %c0_100 = arith.constant 0 : index
    %c0_101 = arith.constant 0 : index
    %114 = vector.load %arg4[%c13_99, %c0_100, %c0_101] : memref<16x16x864xf32, #tpu.memory_space<vmem>>, vector<1x16x864xf32>
    %115 = vector.shape_cast %114 : vector<1x16x864xf32> to vector<16x864xf32>
    %cst_102 = arith.constant dense<0.000000e+00> : vector<8x16xf32>
    %116 = tpu.matmul %113, %115, %cst_102 {dimension_numbers = #tpu.dot_dimension_numbers<[1], [1], [0], [0], [0, 0, 1, 0], [], []>} : vector<8x864xf32>, vector<16x864xf32>, vector<8x16xf32> -> vector<8x16xf32>
    %117 = arith.addf %109, %116 : vector<8x16xf32>
    %c0_103 = arith.constant 0 : index
    %c14 = arith.constant 14 : index
    %c0_104 = arith.constant 0 : index
    %118 = vector.load %arg6[%c0_103, %c14, %c0_104] : memref<8x16x864xf32, #tpu.memory_space<vmem>>, vector<8x1x864xf32>
    %119 = vector.shape_cast %118 : vector<8x1x864xf32> to vector<8x864xf32>
    %cst_105 = arith.constant 0.000000e+00 : f32
    %120 = vector.broadcast %cst_105 : f32 to vector<8x864xf32>
    %121 = arith.maximumf %119, %120 : vector<8x864xf32>
    %c14_106 = arith.constant 14 : index
    %c0_107 = arith.constant 0 : index
    %c0_108 = arith.constant 0 : index
    %122 = vector.load %arg4[%c14_106, %c0_107, %c0_108] : memref<16x16x864xf32, #tpu.memory_space<vmem>>, vector<1x16x864xf32>
    %123 = vector.shape_cast %122 : vector<1x16x864xf32> to vector<16x864xf32>
    %cst_109 = arith.constant dense<0.000000e+00> : vector<8x16xf32>
    %124 = tpu.matmul %121, %123, %cst_109 {dimension_numbers = #tpu.dot_dimension_numbers<[1], [1], [0], [0], [0, 0, 1, 0], [], []>} : vector<8x864xf32>, vector<16x864xf32>, vector<8x16xf32> -> vector<8x16xf32>
    %125 = arith.addf %117, %124 : vector<8x16xf32>
    %c0_110 = arith.constant 0 : index
    %c15 = arith.constant 15 : index
    %c0_111 = arith.constant 0 : index
    %126 = vector.load %arg6[%c0_110, %c15, %c0_111] : memref<8x16x864xf32, #tpu.memory_space<vmem>>, vector<8x1x864xf32>
    %127 = vector.shape_cast %126 : vector<8x1x864xf32> to vector<8x864xf32>
    %cst_112 = arith.constant 0.000000e+00 : f32
    %128 = vector.broadcast %cst_112 : f32 to vector<8x864xf32>
    %129 = arith.maximumf %127, %128 : vector<8x864xf32>
    %c15_113 = arith.constant 15 : index
    %c0_114 = arith.constant 0 : index
    %c0_115 = arith.constant 0 : index
    %130 = vector.load %arg4[%c15_113, %c0_114, %c0_115] : memref<16x16x864xf32, #tpu.memory_space<vmem>>, vector<1x16x864xf32>
    %131 = vector.shape_cast %130 : vector<1x16x864xf32> to vector<16x864xf32>
    %cst_116 = arith.constant dense<0.000000e+00> : vector<8x16xf32>
    %132 = tpu.matmul %129, %131, %cst_116 {dimension_numbers = #tpu.dot_dimension_numbers<[1], [1], [0], [0], [0, 0, 1, 0], [], []>} : vector<8x864xf32>, vector<16x864xf32>, vector<8x16xf32> -> vector<8x16xf32>
    %133 = arith.addf %125, %132 : vector<8x16xf32>
    %c0_117 = arith.constant 0 : index
    %c0_118 = arith.constant 0 : index
    %134 = vector.load %arg7[%c0_117, %c0_118] : memref<8x16xf32, #tpu.memory_space<vmem>>, vector<8x16xf32>
    tpu.vector_store %arg7[%c0_117, %c0_118], %133 {strides = array<i32>} : memref<8x16xf32, #tpu.memory_space<vmem>>, vector<8x16xf32>,
    return
  }
  func.func @transform_0(%arg0: i32) -> (i32, i32, i32) {
    %c0_i32 = arith.constant 0 : i32
    %c0_i32_0 = arith.constant 0 : i32
    %c0_i32_1 = arith.constant 0 : i32
    return %arg0, %c0_i32, %c0_i32_0 : i32, i32, i32
  }
  func.func @transform_1(%arg0: i32) -> (i32, i32, i32) {
    %c0_i32 = arith.constant 0 : i32
    %c0_i32_0 = arith.constant 0 : i32
    %c0_i32_1 = arith.constant 0 : i32
    %c0_i32_2 = arith.constant 0 : i32
    return %c0_i32, %c0_i32_0, %c0_i32_1 : i32, i32, i32
  }
  func.func @transform_2(%arg0: i32) -> (i32, i32) {
    %c0_i32 = arith.constant 0 : i32
    %c0_i32_0 = arith.constant 0 : i32
    %c0_i32_1 = arith.constant 0 : i32
    return %c0_i32, %c0_i32_0 : i32, i32
  }
  func.func @transform_3(%arg0: i32) -> (i32, i32, i32) {
    %c0_i32 = arith.constant 0 : i32
    %c0_i32_0 = arith.constant 0 : i32
    %c0_i32_1 = arith.constant 0 : i32
    %c0_i32_2 = arith.constant 0 : i32
    return %c0_i32, %c0_i32_0, %c0_i32_1 : i32, i32, i32
  }
  func.func @transform_4(%arg0: i32) -> (i32, i32) {
    %c0_i32 = arith.constant 0 : i32
    %c0_i32_0 = arith.constant 0 : i32
    %c0_i32_1 = arith.constant 0 : i32
    return %c0_i32, %c0_i32_0 : i32, i32
  }
  func.func @transform_5(%arg0: i32) -> (i32, i32, i32) {
    %c0_i32 = arith.constant 0 : i32
    %c0_i32_0 = arith.constant 0 : i32
    %c0_i32_1 = arith.constant 0 : i32
    return %arg0, %c0_i32, %c0_i32_0 : i32, i32, i32
  }
  func.func @transform_6(%arg0: i32) -> (i32, i32) {
    %c0_i32 = arith.constant 0 : i32
    %c0_i32_0 = arith.constant 0 : i32
    return %arg0, %c0_i32 : i32, i32
  }
}

module attributes {stable_mosaic.version = 11 : i64} {
  func.func @rnn_fc_kernel(%arg0: i32, %arg1: memref<4x2x16xf32, #tpu.memory_space<vmem>>, %arg2: memref<16x16xf32, #tpu.memory_space<vmem>>, %arg3: memref<1x16xf32, #tpu.memory_space<vmem>>, %arg4: memref<16x2xf32, #tpu.memory_space<vmem>>, %arg5: memref<1x2xf32, #tpu.memory_space<vmem>>, %arg6: memref<4x2x16xf32, #tpu.memory_space<vmem>>, %arg7: memref<4x2x2xf32, #tpu.memory_space<vmem>>, %arg8: memref<2x16xf32, #tpu.memory_space<vmem>>, %arg9: memref<2x16xf32, #tpu.memory_space<vmem>>) attributes {dimension_semantics = [#tpu.dimension_semantics<arbitrary>], iteration_bounds = array<i64: 1>, scalar_prefetch = 0 : i64, scratch_operands = 2 : i64, tpu.core_type = #tpu.core_type<tc>, window_params = [{transform_indices = @transform_0, window_bounds = array<i64: 4, 2, 16>}, {pipeline_mode = #tpu.pipeline_mode<synchronous>, transform_indices = @transform_1, window_bounds = array<i64: 16, 16>}, {pipeline_mode = #tpu.pipeline_mode<synchronous>, transform_indices = @transform_2, window_bounds = array<i64: 1, 16>}, {pipeline_mode = #tpu.pipeline_mode<synchronous>, transform_indices = @transform_3, window_bounds = array<i64: 16, 2>}, {pipeline_mode = #tpu.pipeline_mode<synchronous>, transform_indices = @transform_4, window_bounds = array<i64: 1, 2>}, {transform_indices = @transform_5, window_bounds = array<i64: 4, 2, 16>}, {transform_indices = @transform_6, window_bounds = array<i64: 4, 2, 2>}]} {
    %c0_i32 = arith.constant 0 : i32
    %0 = arith.cmpi eq, %arg0, %c0_i32 : i32
    %1 = arith.extui %0 : i1 to i32
    %c0_i32_0 = arith.constant 0 : i32
    %2 = arith.cmpi ne, %1, %c0_i32_0 : i32
    scf.if %2 {
      %cst = arith.constant 0.000000e+00 : f32
      %8 = vector.broadcast %cst : f32 to vector<2x16xf32>
      %c0_10 = arith.constant 0 : index
      %c0_11 = arith.constant 0 : index
      %9 = vector.load %arg8[%c0_10, %c0_11] : memref<2x16xf32, #tpu.memory_space<vmem>>, vector<2x16xf32>
      tpu.vector_store %arg8[%c0_10, %c0_11], %8 {strides = array<i32>} : memref<2x16xf32, #tpu.memory_space<vmem>>, vector<2x16xf32>,
      %cst_12 = arith.constant 0.000000e+00 : f32
      %10 = vector.broadcast %cst_12 : f32 to vector<2x16xf32>
      %c0_13 = arith.constant 0 : index
      %c0_14 = arith.constant 0 : index
      %11 = vector.load %arg9[%c0_13, %c0_14] : memref<2x16xf32, #tpu.memory_space<vmem>>, vector<2x16xf32>
      tpu.vector_store %arg9[%c0_13, %c0_14], %10 {strides = array<i32>} : memref<2x16xf32, #tpu.memory_space<vmem>>, vector<2x16xf32>,
    } else {
    }
    %c0 = arith.constant 0 : index
    %c0_1 = arith.constant 0 : index
    %3 = vector.load %arg2[%c0, %c0_1] : memref<16x16xf32, #tpu.memory_space<vmem>>, vector<16x16xf32>
    %c0_2 = arith.constant 0 : index
    %c0_3 = arith.constant 0 : index
    %4 = vector.load %arg3[%c0_2, %c0_3] : memref<1x16xf32, #tpu.memory_space<vmem>>, vector<1x16xf32>
    %c0_4 = arith.constant 0 : index
    %c0_5 = arith.constant 0 : index
    %5 = vector.load %arg4[%c0_4, %c0_5] : memref<16x2xf32, #tpu.memory_space<vmem>>, vector<16x2xf32>
    %c0_6 = arith.constant 0 : index
    %c0_7 = arith.constant 0 : index
    %6 = vector.load %arg5[%c0_6, %c0_7] : memref<1x2xf32, #tpu.memory_space<vmem>>, vector<1x2xf32>
    %c0_i32_8 = arith.constant 0 : i32
    %c4_i32 = arith.constant 4 : i32
    %7 = arith.addi %c0_i32_8, %c4_i32 : i32
    %c1_i32 = arith.constant 1 : i32
    scf.for %arg10 = %c0_i32_8 to %7 step %c1_i32  : i32 {
      %c0_10 = arith.constant 0 : index
      %c0_11 = arith.constant 0 : index
      %8 = vector.load %arg8[%c0_10, %c0_11] : memref<2x16xf32, #tpu.memory_space<vmem>>, vector<2x16xf32>
      %c0_12 = arith.constant 0 : index
      %c0_13 = arith.constant 0 : index
      %9 = vector.load %arg9[%c0_12, %c0_13] : memref<2x16xf32, #tpu.memory_space<vmem>>, vector<2x16xf32>
      %10 = arith.index_cast %arg10 : i32 to index
      %c0_14 = arith.constant 0 : index
      %c0_15 = arith.constant 0 : index
      %11 = vector.load %arg1[%10, %c0_14, %c0_15] : memref<4x2x16xf32, #tpu.memory_space<vmem>>, vector<1x2x16xf32>
      %12 = vector.shape_cast %11 : vector<1x2x16xf32> to vector<2x16xf32>
      %cst = arith.constant dense<0.000000e+00> : vector<2x16xf32>
      %13 = tpu.matmul %8, %3, %cst {dimension_numbers = #tpu.dot_dimension_numbers<[1], [0], [0], [1], [0, 0, 1, 1], [], []>} : vector<2x16xf32>, vector<16x16xf32>, vector<2x16xf32> -> vector<2x16xf32>
      %14 = arith.addf %12, %13 : vector<2x16xf32>
      %15 = vector.broadcast %4 : vector<1x16xf32> to vector<2x16xf32>
      %16 = arith.addf %14, %15 : vector<2x16xf32>
      %17 = arith.subf %16, %9 : vector<2x16xf32>
      %cst_16 = arith.constant 0.000000e+00 : f32
      %18 = vector.broadcast %cst_16 : f32 to vector<2x16xf32>
      %19 = arith.maximumf %17, %18 : vector<2x16xf32>
      %cst_17 = arith.constant 4.000000e-01 : f32
      %20 = vector.broadcast %cst_17 : f32 to vector<2x16xf32>
      %21 = arith.mulf %20, %19 : vector<2x16xf32>
      %22 = arith.addf %9, %21 : vector<2x16xf32>
      %cst_18 = arith.constant 1.000000e-01 : f32
      %23 = vector.broadcast %cst_18 : f32 to vector<2x16xf32>
      %24 = arith.mulf %23, %22 : vector<2x16xf32>
      %25 = arith.subf %22, %24 : vector<2x16xf32>
      %c0_19 = arith.constant 0 : index
      %c0_20 = arith.constant 0 : index
      %26 = vector.load %arg9[%c0_19, %c0_20] : memref<2x16xf32, #tpu.memory_space<vmem>>, vector<2x16xf32>
      tpu.vector_store %arg9[%c0_19, %c0_20], %25 {strides = array<i32>} : memref<2x16xf32, #tpu.memory_space<vmem>>, vector<2x16xf32>,
      %c0_21 = arith.constant 0 : index
      %c0_22 = arith.constant 0 : index
      %27 = vector.load %arg8[%c0_21, %c0_22] : memref<2x16xf32, #tpu.memory_space<vmem>>, vector<2x16xf32>
      tpu.vector_store %arg8[%c0_21, %c0_22], %19 {strides = array<i32>} : memref<2x16xf32, #tpu.memory_space<vmem>>, vector<2x16xf32>,
      %28 = arith.index_cast %arg10 : i32 to index
      %c0_23 = arith.constant 0 : index
      %c0_24 = arith.constant 0 : index
      %29 = vector.load %arg6[%28, %c0_23, %c0_24] : memref<4x2x16xf32, #tpu.memory_space<vmem>>, vector<1x2x16xf32>
      %30 = vector.shape_cast %29 : vector<1x2x16xf32> to vector<2x16xf32>
      %31 = vector.shape_cast %19 : vector<2x16xf32> to vector<1x2x16xf32>
      tpu.vector_store %arg6[%28, %c0_23, %c0_24], %31 {strides = array<i32>} : memref<4x2x16xf32, #tpu.memory_space<vmem>>, vector<1x2x16xf32>,
      %cst_25 = arith.constant dense<0.000000e+00> : vector<2x2xf32>
      %32 = tpu.matmul %19, %5, %cst_25 {dimension_numbers = #tpu.dot_dimension_numbers<[1], [0], [0], [1], [0, 0, 1, 1], [], []>} : vector<2x16xf32>, vector<16x2xf32>, vector<2x2xf32> -> vector<2x2xf32>
      %33 = vector.broadcast %6 : vector<1x2xf32> to vector<2x2xf32>
      %34 = arith.addf %32, %33 : vector<2x2xf32>
      %35 = arith.index_cast %arg10 : i32 to index
      %c0_26 = arith.constant 0 : index
      %c0_27 = arith.constant 0 : index
      %36 = vector.load %arg7[%35, %c0_26, %c0_27] : memref<4x2x2xf32, #tpu.memory_space<vmem>>, vector<1x2x2xf32>
      %37 = vector.shape_cast %36 : vector<1x2x2xf32> to vector<2x2xf32>
      %38 = vector.shape_cast %34 : vector<2x2xf32> to vector<1x2x2xf32>
      tpu.vector_store %arg7[%35, %c0_26, %c0_27], %38 {strides = array<i32>} : memref<4x2x2xf32, #tpu.memory_space<vmem>>, vector<1x2x2xf32>,
    }
    %c4_i32_9 = arith.constant 4 : i32
    return
  }
  func.func @transform_0(%arg0: i32) -> (i32, i32, i32) {
    %c0_i32 = arith.constant 0 : i32
    %c0_i32_0 = arith.constant 0 : i32
    %c0_i32_1 = arith.constant 0 : i32
    return %arg0, %c0_i32, %c0_i32_0 : i32, i32, i32
  }
  func.func @transform_1(%arg0: i32) -> (i32, i32) {
    %c0_i32 = arith.constant 0 : i32
    %c0_i32_0 = arith.constant 0 : i32
    %c0_i32_1 = arith.constant 0 : i32
    return %c0_i32, %c0_i32_0 : i32, i32
  }
  func.func @transform_2(%arg0: i32) -> (i32, i32) {
    %c0_i32 = arith.constant 0 : i32
    %c0_i32_0 = arith.constant 0 : i32
    %c0_i32_1 = arith.constant 0 : i32
    return %c0_i32, %c0_i32_0 : i32, i32
  }
  func.func @transform_3(%arg0: i32) -> (i32, i32) {
    %c0_i32 = arith.constant 0 : i32
    %c0_i32_0 = arith.constant 0 : i32
    %c0_i32_1 = arith.constant 0 : i32
    return %c0_i32, %c0_i32_0 : i32, i32
  }
  func.func @transform_4(%arg0: i32) -> (i32, i32) {
    %c0_i32 = arith.constant 0 : i32
    %c0_i32_0 = arith.constant 0 : i32
    %c0_i32_1 = arith.constant 0 : i32
    return %c0_i32, %c0_i32_0 : i32, i32
  }
  func.func @transform_5(%arg0: i32) -> (i32, i32, i32) {
    %c0_i32 = arith.constant 0 : i32
    %c0_i32_0 = arith.constant 0 : i32
    %c0_i32_1 = arith.constant 0 : i32
    return %arg0, %c0_i32, %c0_i32_0 : i32, i32, i32
  }
  func.func @transform_6(%arg0: i32) -> (i32, i32, i32) {
    %c0_i32 = arith.constant 0 : i32
    %c0_i32_0 = arith.constant 0 : i32
    %c0_i32_1 = arith.constant 0 : i32
    return %arg0, %c0_i32, %c0_i32_0 : i32, i32, i32
  }
}

</mosaic_0001>

<bundles_post_ra>
// kernel: model_forward.2
= control target key start
LH: loop header
LB: loop body
LE: loop exit
PB: predicated region body
PF: predicated region fallthrough
CT: control target
= control target key end

     0   :  { %s11799_s25 = smov 0   ;;  %s15606_s0 = inlined_call_operand.vmem [shape: f32[8,12,896], index: 0, kind: input, shape index: {}]   ;;  %s15607_s1 = inlined_call_operand.vmem [shape: f32[6,16,12], index: 1, kind: input, shape index: {}]   ;;  %s15608_s2 = inlined_call_operand.vmem [shape: f32[16,1], index: 2, kind: input, shape index: {}]   ;;  %s15609_s3 = inlined_call_operand.vmem [shape: f32[16,16,864], index: 3, kind: input, shape index: {}]   ;;  %s15610_s4 = inlined_call_operand.vmem [shape: f32[1,16], index: 4, kind: input, shape index: {}]   ;;  %s15611_s5 = inlined_call_operand.vmem [shape: f32[8,16,864], index: 5, kind: output, shape index: {0}]   ;;  %s15612_s6 = inlined_call_operand.vmem [shape: f32[8,16], index: 6, kind: output, shape index: {1}]  }
   0x1   :  { %v11792_v0 = vld [vmem:[%s15608_s2] sm:$0xff]  ;;  %v11797_v1 = vld [vmem:[%s15608_s2 + $0x8] sm:$0xff] }
   0x2 LB: > { %vm56_vm0 = vcmask 1043456   ;;  %v11742_v2 = vmov 0.0   ;;  %s10958_s26 = smul.u32 112, %s11740_s25  ;;  %v11743_v3 = vmov 0   ;;  %vm11744_vm1 = vmmov 1   ;;  %v47_v21 = vld [vmem:[%s15607_s1] sm:$0xff]  ;;  %s11740_s25 = sphi %s11799_s25, %s29_s25  }
   0x3   : > { %142 = vmatprep.mubr.f32.mxu0 %v11742_v2  ;;  %219 = vmatprep.mubr.f32.mxu1 %v11742_v2  ;;  %vm11814_vm2 = vmpackc.low %vm56_vm0, %vm11744_vm1  ;;  %vm49_vm3 = vcmask 97280   ;;  %v48_v27 = vld [vmem:[%s15607_s1 + $0x8] sm:$0xff]  ;;  %v10359_v28 = vld [vmem:[%s15607_s1 + $0x10] sm:$0xff]  ;;  %s11745_s30 = smov 127   ;;  %s11746_s7 = smov 126   ;;  %vm755_vm4 = vcmask 1039360  }
   0x4   : > { %11732 = vset.pattern.permute.xlu0 %v11743_v3  ;;  %11733 = vset.pattern.permute.xlu1 %v11743_v3  ;;  %s32_s28 = scalar_lea.vmem %s15606_s0, %s10958_s26  ;;  %v10360_v29 = vld [vmem:[%s15607_s1 + $0x18] sm:$0xff]  ;;  %v10376_v30 = vld [vmem:[%s15607_s1 + $0x20] sm:$0xff]  ;;  %v10377_v31 = vld [vmem:[%s15607_s1 + $0x28] sm:$0xff]  ;;  %s11747_s8 = smov 125   ;;  %vm1153_vm5 = vcmask 1031168   ;;  %vm1551_vm6 = vcmask 1022976  }
   0x5   : > { %2390 = vperm.xlu0 %11732, %v11792_v0   ;;  %2395 = vperm.xlu1 %11733, %v11797_v1   ;;  %v34_v5 = vld [vmem:[%s32_s28 + $0x8] sm:$0xff]  ;;  %v41_v6 = vld [vmem:[%s32_s28 + $0x40] sm:$0xf]  ;;  %v36_v7 = vld [vmem:[%s32_s28 + $0x18] sm:$0xff]  ;;  %s11748_s9 = smov 124   ;;  %s11749_s10 = smov 123  }
   0x6   : > { %v11818_v8 = vpack.c.bf16 %v41_v6, %v34_v5  ;;  %v43_v9 = vld [vmem:[%s32_s28 + $0x50] sm:$0xf]  ;;  %v33_v10 = vld [vmem:[%s32_s28] sm:$0xff]  ;;  %v40_v11 = vld [vmem:[%s32_s28 + $0x38] sm:$0xf]  ;;  %vm1949_vm7 = vcmask 1014784   ;;  %s12300_s13 = scalar_lea.vmem %s15611_s5, %s10958_s26 }
   0x7   : > { %v11820_v12 = vpack.c.bf16 %v43_v9, %v36_v7  ;;  %v11822_v13 = vpack.c.bf16 %v40_v11, %v33_v10  ;;  %v35_v14 = vld [vmem:[%s32_s28 + $0x10] sm:$0xff]  ;;  %v42_v15 = vld [vmem:[%s32_s28 + $0x48] sm:$0xf]  ;;  %v45_v18 = vld [vmem:[%s32_s28 + $0x60] sm:$0xf]  ;;  %vm2347_vm8 = vcmask 1006592  }
   0x8   : > { %v38_v16 = vld [vmem:[%s32_s28 + $0x28] sm:$0xff]  ;;  %11188 = vmatprep.subr.msk.bf16.mxu0 %vm11814_vm2, %v11818_v8  ;;  %v11827_v17 = vpack.c.bf16 %v42_v15, %v35_v14  ;;  %v37_v19 = vld [vmem:[%s32_s28 + $0x20] sm:$0xff]  ;;  %v44_v20 = vld [vmem:[%s32_s28 + $0x58] sm:$0xf]  ;;  %vm2420_vm9 = vcmask 785408   ;;  %s29_s25 = sadd.s32 1, %s11740_s25  }
   0x9   : > { %11194 = vmatprep.subr.msk.bf16.mxu1 %vm11814_vm2, %v11820_v12  ;;  %11191 = vmatpush1.bf16.msk.msra.mxu0 %vm11814_vm2, %v11822_v13  ;;  %v11838_v22 = vpack.c.bf16 %v45_v18, %v38_v16  ;;  %v11840_v23 = vpack.c.bf16 %v44_v20, %v37_v19  ;;  %v39_v24 = vld [vmem:[%s32_s28 + $0x30] sm:$0xff]  ;;  %v46_v25 = vld [vmem:[%s32_s28 + $0x68] sm:$0xf]  ;;  %v10394_v33 = vld [vmem:[%s15607_s1 + $0x38] sm:$0xff]  ;;  %p26_p0 = scmp.ge.s32.totalorder %s29_s25, 8  }
   0xa   : > { %11197 = vmatpush1.bf16.msk.msra.mxu1 %vm11814_vm2, %v11827_v17  ;;  %v11845_v26 = vpack.c.bf16 %v46_v25, %v39_v24  ;;  %v10393_v32 = vld [vmem:[%s15607_s1 + $0x30] sm:$0xff]  ;;  %v10410_v34 = vld [vmem:[%s15607_s1 + $0x40] sm:$0xff]  ;;  %v10411_v35 = vld [vmem:[%s15607_s1 + $0x48] sm:$0xff]  ;;  %vm11752_vm11 = vmmov (%p26_p0), 0   ;;  %vm10324_vm12 = vcmask (%p26_p0), 130048  }
   0xb   : > { %11200 = vmatprep.subr.msk.bf16.mxu0 %vm11814_vm2, %v11838_v22  ;;  %v10427_v36 = vld [vmem:[%s15607_s1 + $0x50] sm:$0xff]  ;;  %v10428_v37 = vld [vmem:[%s15607_s1 + $0x58] sm:$0xff]  ;;  %v10711_v0 = vld [vmem:[%s15609_s3 + $0x388] sm:$0xff] (%p26_p0) }
   0xc   : > { %10346 = vmatmul.mubr.msk.f32.vlgmr.msra.gmra.mrb[0].mxu0 %vm49_vm3, %v47_v21  ;;  %11206 = vmatprep.subr.msk.bf16.mxu1 %vm11814_vm2, %v11845_v26  ;;  %v10718_v1 = vld [vmem:[%s15609_s3 + $0x3c0] sm:$0xff] (%p26_p0)  ;;  %vm12896_vm10 = vmpackc.low (%p26_p0), %vm2420_vm9, %vm2420_vm9 }
   0xd   : > { %10350 = vmatmul.mubr.msk.f32.vlgmr.msra.gmra.mrb[0].mxu1 %vm49_vm3, %v47_v21  ;;  %11203 = vmatpush1.bf16.msk.msra.mxu0 %vm11814_vm2, %v11840_v23 }
   0xe   : > { %148 = vmatprep.mubr.f32.mxu0 %v11742_v2  ;;  %225 = vmatprep.mubr.f32.mxu1 %v11742_v2 }
   0xf   : > { %11209 = vmatpush3.bf16.msk.msra.mxu1 %vm11814_vm2, %v11845_v26  ;;  %11218 = vmatprep.subr.msk.bf16.mxu0 %vm11814_vm2, %v11820_v12 }
  0x10   : > { %10347 = vmatmul.mubr.msk.f32.gmra.mrb[2].mxu0 %vm49_vm3, %v48_v27  ;;  %11212 = vmatprep.subr.msk.bf16.mxu1 %vm11814_vm2, %v11818_v8 }
  0x11   : > { %10351 = vmatmul.mubr.msk.f32.gmra.mrb[2].mxu1 %vm49_vm3, %v48_v27  ;;  %296 = vmatprep.mubr.f32.mxu0 %v11742_v2 }
  0x12   : > { %11036 = vmatprep.mubr.msk.f32.mxu1 %vm49_vm3, %v47_v21 }
  0x14   : > { %10354 = vmatmul.mubr.msk.f32.vlgmr.msra.gmra.mrb[4].mxu0 %vm49_vm3, %v47_v21 }
  0x15   : > { %11037 = vmatmul.mubr.msk.f32.vlgmr.msra.gmra.mrb[4].mxu1 %vm49_vm3, %v48_v27  ;;  %11221 = vmatpush1.bf16.msk.msra.mxu0 %vm11814_vm2, %v11827_v17 }
  0x16   : > { %11215 = vmatpush1.bf16.msk.msra.mxu1 %vm11814_vm2, %v11822_v13  ;;  %302 = vmatprep.mubr.f32.mxu0 %v11742_v2 }
  0x17   : > { %471 = vmatprep.mubr.f32.mxu1 %v11742_v2  ;;  %11224 = vmatprep.subr.msk.bf16.mxu1 %vm11814_vm2, %v11838_v22 }
  0x18   : > { %10355 = vmatmul.mubr.msk.f32.gmra.mrb[6].mxu0 %vm49_vm3, %v48_v27  ;;  %11230 = vmatprep.subr.msk.bf16.mxu0 %vm11814_vm2, %v11845_v26 }
  0x19   : > { %10363 = vmatmul.mubr.msk.f32.vlgmr.msra.gmra.mrb[6].mxu1 %vm49_vm3, %v10359_v28  ;;  %548 = vmatprep.mubr.f32.mxu0 %v11742_v2 }
  0x1a   : > { %477 = vmatprep.mubr.f32.mxu1 %v11742_v2  ;;  %11227 = vmatpush1.bf16.msk.msra.mxu1 %vm11814_vm2, %v11840_v23 }
  0x1b   : > { %11242 = vmatprep.subr.msk.bf16.mxu1 %vm11814_vm2, %v11820_v12 }
  0x1c   : > { %10367 = vmatmul.mubr.msk.f32.vlgmr.msra.gmra.mrb[8].mxu0 %vm49_vm3, %v10359_v28 }
  0x1d   : > { %10364 = vmatmul.mubr.msk.f32.gmra.mrb[8].mxu1 %vm49_vm3, %v10360_v29  ;;  %554 = vmatprep.mubr.f32.mxu0 %v11742_v2 }
  0x1e   : > { %625 = vmatprep.mubr.f32.mxu1 %v11742_v2  ;;  %11233 = vmatpush3.bf16.msk.msra.mxu0 %vm11814_vm2, %v11845_v26 }
  0x1f   : > { %11236 = vmatprep.subr.msk.bf16.mxu0 %vm11814_vm2, %v11818_v8 }
  0x20   : > { %10368 = vmatmul.mubr.msk.f32.gmra.mrb[10].mxu0 %vm49_vm3, %v10360_v29 }
  0x21   : > { %10371 = vmatmul.mubr.msk.f32.vlgmr.msra.gmra.mrb[10].mxu1 %vm49_vm3, %v10359_v28  ;;  %11043 = vmatprep.mubr.msk.f32.mxu0 %vm49_vm3, %v10359_v28 }
  0x22   : > { %631 = vmatprep.mubr.f32.mxu1 %v11742_v2  ;;  %11245 = vmatpush1.bf16.msk.msra.mxu1 %vm11814_vm2, %v11827_v17 }
  0x23   : > { %11254 = vmatprep.subr.msk.bf16.mxu1 %vm11814_vm2, %v11845_v26 }
  0x24   : > { %11044 = vmatmul.mubr.msk.f32.vlgmr.msra.gmra.mrb[12].mxu0 %vm49_vm3, %v10360_v29 }
  0x25   : > { %10372 = vmatmul.mubr.msk.f32.gmra.mrb[12].mxu1 %vm49_vm3, %v10360_v29  ;;  %11239 = vmatpush1.bf16.msk.msra.mxu0 %vm11814_vm2, %v11822_v13 }
  0x26   : > { %869 = vmatprep.mubr.f32.mxu0 %v11742_v2  ;;  %946 = vmatprep.mubr.f32.mxu1 %v11742_v2 }
  0x27   : > { %11248 = vmatprep.subr.msk.bf16.mxu0 %vm11814_vm2, %v11838_v22 }
  0x28   : > { %10380 = vmatmul.mubr.msk.f32.vlgmr.msra.gmra.mrb[14].mxu0 %vm49_vm3, %v10376_v30 }
  0x29   : > { %10384 = vmatmul.mubr.msk.f32.vlgmr.msra.gmra.mrb[14].mxu1 %vm49_vm3, %v10376_v30  ;;  %875 = vmatprep.mubr.f32.mxu0 %v11742_v2 }
  0x2a   : > { %952 = vmatprep.mubr.f32.mxu1 %v11742_v2  ;;  %11251 = vmatpush1.bf16.msk.msra.mxu0 %vm11814_vm2, %v11840_v23 }
  0x2b   : > { %11257 = vmatpush3.bf16.msk.msra.mxu1 %vm11814_vm2, %v11845_v26  ;;  %11266 = vmatprep.subr.msk.bf16.mxu0 %vm11814_vm2, %v11820_v12 }
  0x2c   : > { %10381 = vmatmul.mubr.msk.f32.gmra.mrb[16].mxu0 %vm49_vm3, %v10377_v31  ;;  %11260 = vmatprep.subr.msk.bf16.mxu1 %vm11814_vm2, %v11818_v8 }
  0x2d   : > { %10385 = vmatmul.mubr.msk.f32.gmra.mrb[16].mxu1 %vm49_vm3, %v10377_v31  ;;  %1023 = vmatprep.mubr.f32.mxu0 %v11742_v2 }
  0x2e   : > { %11050 = vmatprep.mubr.msk.f32.mxu1 %vm49_vm3, %v10376_v30 }
  0x30   : > { %10388 = vmatmul.mubr.msk.f32.vlgmr.msra.gmra.mrb[18].mxu0 %vm49_vm3, %v10376_v30 }
  0x31   : > { %11051 = vmatmul.mubr.msk.f32.vlgmr.msra.gmra.mrb[18].mxu1 %vm49_vm3, %v10377_v31  ;;  %1029 = vmatprep.mubr.f32.mxu0 %v11742_v2 }
  0x32   : > { %11263 = vmatpush1.bf16.msk.msra.mxu1 %vm11814_vm2, %v11822_v13  ;;  %1267 = vmatprep.mubr.f32.mxu1 %v11742_v2 }
  0x33   : > { %11269 = vmatpush1.bf16.msk.msra.mxu0 %vm11814_vm2, %v11827_v17  ;;  %11272 = vmatprep.subr.msk.bf16.mxu1 %vm11814_vm2, %v11838_v22 }
  0x34   : > { %10389 = vmatmul.mubr.msk.f32.gmra.mrb[20].mxu0 %vm49_vm3, %v10377_v31  ;;  %11278 = vmatprep.subr.msk.bf16.mxu0 %vm11814_vm2, %v11845_v26 }
  0x35   : > { %10397 = vmatmul.mubr.msk.f32.vlgmr.msra.gmra.mrb[20].mxu1 %vm49_vm3, %v10393_v32  ;;  %1344 = vmatprep.mubr.f32.mxu0 %v11742_v2 }
  0x36   : > { %1273 = vmatprep.mubr.f32.mxu1 %v11742_v2  ;;  %11275 = vmatpush1.bf16.msk.msra.mxu1 %vm11814_vm2, %v11840_v23 }
  0x37   : > { %11290 = vmatprep.subr.msk.bf16.mxu1 %vm11814_vm2, %v11820_v12 }
  0x38   : > { %10401 = vmatmul.mubr.msk.f32.vlgmr.msra.gmra.mrb[22].mxu0 %vm49_vm3, %v10393_v32 }
  0x39   : > { %10398 = vmatmul.mubr.msk.f32.gmra.mrb[22].mxu1 %vm49_vm3, %v10394_v33  ;;  %1350 = vmatprep.mubr.f32.mxu0 %v11742_v2 }
  0x3a   : > { %1421 = vmatprep.mubr.f32.mxu1 %v11742_v2  ;;  %11281 = vmatpush3.bf16.msk.msra.mxu0 %vm11814_vm2, %v11845_v26 }
  0x3b   : > { %11284 = vmatprep.subr.msk.bf16.mxu0 %vm11814_vm2, %v11818_v8 }
  0x3c   : > { %10402 = vmatmul.mubr.msk.f32.gmra.mrb[24].mxu0 %vm49_vm3, %v10394_v33 }
  0x3d   : > { %10405 = vmatmul.mubr.msk.f32.vlgmr.msra.gmra.mrb[24].mxu1 %vm49_vm3, %v10393_v32  ;;  %11057 = vmatprep.mubr.msk.f32.mxu0 %vm49_vm3, %v10393_v32 }
  0x3e   : > { %1427 = vmatprep.mubr.f32.mxu1 %v11742_v2  ;;  %11293 = vmatpush1.bf16.msk.msra.mxu1 %vm11814_vm2, %v11827_v17 }
  0x3f   : > { %11302 = vmatprep.subr.msk.bf16.mxu1 %vm11814_vm2, %v11845_v26 }
  0x40   : > { %11058 = vmatmul.mubr.msk.f32.vlgmr.msra.gmra.mrb[26].mxu0 %vm49_vm3, %v10394_v33 }
  0x41   : > { %10406 = vmatmul.mubr.msk.f32.gmra.mrb[26].mxu1 %vm49_vm3, %v10394_v33  ;;  %11287 = vmatpush1.bf16.msk.msra.mxu0 %vm11814_vm2, %v11822_v13 }
  0x42   : > { %1665 = vmatprep.mubr.f32.mxu0 %v11742_v2  ;;  %1742 = vmatprep.mubr.f32.mxu1 %v11742_v2 }
  0x43   : > { %11296 = vmatprep.subr.msk.bf16.mxu0 %vm11814_vm2, %v11838_v22 }
  0x44   : > { %10414 = vmatmul.mubr.msk.f32.vlgmr.msra.gmra.mrb[28].mxu0 %vm49_vm3, %v10410_v34 }
  0x45   : > { %10418 = vmatmul.mubr.msk.f32.vlgmr.msra.gmra.mrb[28].mxu1 %vm49_vm3, %v10410_v34  ;;  %1671 = vmatprep.mubr.f32.mxu0 %v11742_v2 }
  0x46   : > { %1748 = vmatprep.mubr.f32.mxu1 %v11742_v2  ;;  %11299 = vmatpush1.bf16.msk.msra.mxu0 %vm11814_vm2, %v11840_v23 }
  0x47   : > { %11305 = vmatpush3.bf16.msk.msra.mxu1 %vm11814_vm2, %v11845_v26  ;;  %11314 = vmatprep.subr.msk.bf16.mxu0 %vm11814_vm2, %v11820_v12 }
  0x48   : > { %10415 = vmatmul.mubr.msk.f32.gmra.mrb[30].mxu0 %vm49_vm3, %v10411_v35  ;;  %11308 = vmatprep.subr.msk.bf16.mxu1 %vm11814_vm2, %v11818_v8 }
  0x49   : > { %10419 = vmatmul.mubr.msk.f32.gmra.mrb[30].mxu1 %vm49_vm3, %v10411_v35  ;;  %1819 = vmatprep.mubr.f32.mxu0 %v11742_v2 }
  0x4a   : > { %11064 = vmatprep.mubr.msk.f32.mxu1 %vm49_vm3, %v10410_v34 }
  0x4c   : > { %10422 = vmatmul.mubr.msk.f32.vlgmr.msra.gmra.mrb[32].mxu0 %vm49_vm3, %v10410_v34 }
  0x4d   : > { %11065 = vmatmul.mubr.msk.f32.vlgmr.msra.gmra.mrb[32].mxu1 %vm49_vm3, %v10411_v35  ;;  %1825 = vmatprep.mubr.f32.mxu0 %v11742_v2 }
  0x4e   : > { %11311 = vmatpush1.bf16.msk.msra.mxu1 %vm11814_vm2, %v11822_v13  ;;  %2063 = vmatprep.mubr.f32.mxu1 %v11742_v2 }
  0x4f   : > { %11317 = vmatpush1.bf16.msk.msra.mxu0 %vm11814_vm2, %v11827_v17  ;;  %11320 = vmatprep.subr.msk.bf16.mxu1 %vm11814_vm2, %v11838_v22 }
  0x50   : > { %10423 = vmatmul.mubr.msk.f32.gmra.mrb[34].mxu0 %vm49_vm3, %v10411_v35  ;;  %11326 = vmatprep.subr.msk.bf16.mxu0 %vm11814_vm2, %v11845_v26 }
  0x51   : > { %10431 = vmatmul.mubr.msk.f32.vlgmr.msra.gmra.mrb[34].mxu1 %vm49_vm3, %v10427_v36  ;;  %2140 = vmatprep.mubr.f32.mxu0 %v11742_v2 }
  0x52   : > { %2069 = vmatprep.mubr.f32.mxu1 %v11742_v2  ;;  %11323 = vmatpush1.bf16.msk.msra.mxu1 %vm11814_vm2, %v11840_v23 }
  0x54   : > { %10435 = vmatmul.mubr.msk.f32.vlgmr.msra.gmra.mrb[36].mxu0 %vm49_vm3, %v10427_v36 }
  0x55   : > { %10432 = vmatmul.mubr.msk.f32.gmra.mrb[36].mxu1 %vm49_vm3, %v10428_v37  ;;  %2146 = vmatprep.mubr.f32.mxu0 %v11742_v2 }
  0x56   : > { %2217 = vmatprep.mubr.f32.mxu1 %v11742_v2  ;;  %11329 = vmatpush3.bf16.msk.msra.mxu0 %vm11814_vm2, %v11845_v26 }
  0x58   : > { %10436 = vmatmul.mubr.msk.f32.gmra.mrb[38].mxu0 %vm49_vm3, %v10428_v37 }
  0x59   : > { %10439 = vmatmul.mubr.msk.f32.vlgmr.msra.gmra.mrb[38].mxu1 %vm49_vm3, %v10427_v36  ;;  %11071 = vmatprep.mubr.msk.f32.mxu0 %vm49_vm3, %v10427_v36 }
  0x5a   : > { %2223 = vmatprep.mubr.f32.mxu1 %v11742_v2 }
  0x5c   : > { %11072 = vmatmul.mubr.msk.f32.vlgmr.msra.gmra.mrb[40].mxu0 %vm49_vm3, %v10428_v37 }
  0x5d   : > { %10440 = vmatmul.mubr.msk.f32.gmra.mrb[40].mxu1 %vm49_vm3, %v10428_v37 }
  0xdf   : > { %v12094_v38 = vpop.f32.mrb[0].mxu0 }
  0xe0   : > { %v12096_v39 = vpop.f32.mrb[1].mxu0  ;;  %v12098_v40 = vpop.f32.mrb[0].mxu1 }
  0xe1   : > { %v12100_v41 = vpop.f32.mrb[1].mxu1 }
  0xe3   : > { %v12102_v42 = vpop.f32.mrb[2].mxu0 }
  0xe4   : > { %v12104_v43 = vpop.f32.mrb[3].mxu0  ;;  %v12106_v44 = vpop.f32.mrb[2].mxu1 }
  0xe5   : > { %v12108_v45 = vpop.f32.mrb[3].mxu1 }
  0xe7   : > { %v12110_v46 = vpop.f32.mrb[4].mxu0 }
  0xe8   : > { %v12112_v47 = vpop.f32.mrb[5].mxu0  ;;  %v12114_v48 = vpop.f32.mrb[4].mxu1 }
  0xe9   : > { %v12116_v49 = vpop.f32.mrb[5].mxu1 }
  0xeb   : > { %v12118_v50 = vpop.f32.mrb[6].mxu0 }
  0xec   : > { %v473_v51 = vpop.f32.mrb[6].mxu1  ;;  %v12120_v52 = vpop.f32.mrb[7].mxu0 }
  0xed   : > { %727 = vrot.lane.b32.xlu0 %v473_v51, %s11745_s30  ;;  %v475_v53 = vpop.f32.mrb[7].mxu1 }
  0xef   : > { %v550_v54 = vpop.f32.mrb[8].mxu0 }
  0xf0   : > { %731 = vrot.lane.b32.xlu1 %v550_v54, %s11745_s30  ;;  %v552_v55 = vpop.f32.mrb[9].mxu0  ;;  %v479_v56 = vpop.f32.mrb[8].mxu1 }
  0xf1   : > { %729 = vrot.lane.b32.xlu0 %v475_v53, %s11745_s30  ;;  %v481_v57 = vpop.f32.mrb[9].mxu1 }
  0xf3   : > { %v556_v58 = vpop.f32.mrb[10].mxu0 }
  0xf4   : > { %741 = vrot.lane.b32.xlu1 %v479_v56, %s11745_s30  ;;  %v627_v59 = vpop.f32.mrb[10].mxu1  ;;  %v558_v60 = vpop.f32.mrb[11].mxu0 }
  0xf5   : > { %743 = vrot.lane.b32.xlu0 %v481_v57, %s11745_s30  ;;  %v629_v61 = vpop.f32.mrb[11].mxu1 }
  0xf7   : > { %v11045_v62 = vpop.f32.mrb[12].mxu0 }
  0xf8   : > { %733 = vrot.lane.b32.xlu1 %v552_v55, %s11745_s30  ;;  %v704_v63 = vpop.f32.mrb[13].mxu0  ;;  %v633_v2 = vpop.f32.mrb[12].mxu1 }
  0xf9   : > { %735 = vrot.lane.b32.xlu0 %v627_v59, %s11745_s30  ;;  %v635_v3 = vpop.f32.mrb[13].mxu1 }
  0xfb   : > { %v871_v4 = vpop.f32.mrb[14].mxu0 }
  0xfc   : > { %745 = vrot.lane.b32.xlu1 %v556_v58, %s11745_s30  ;;  %v873_v5 = vpop.f32.mrb[15].mxu0  ;;  %v948_v6 = vpop.f32.mrb[14].mxu1 }
  0xfd   : > { %747 = vrot.lane.b32.xlu0 %v558_v60, %s11745_s30  ;;  %v950_v7 = vpop.f32.mrb[15].mxu1 }
  0xff   : > { %v877_v8 = vpop.f32.mrb[16].mxu0 }
 0x100   : > { %737 = vrot.lane.b32.xlu1 %v629_v61, %s11745_s30  ;;  %v879_v9 = vpop.f32.mrb[17].mxu0  ;;  %v954_v10 = vpop.f32.mrb[16].mxu1 }
 0x101   : > { %739 = vrot.lane.b32.xlu0 %v704_v63, %s11745_s30  ;;  %v956_v11 = vpop.f32.mrb[17].mxu1 }
 0x103   : > { %v1025_v12 = vpop.f32.mrb[18].mxu0 }
 0x104   : > { %749 = vrot.lane.b32.xlu1 %v633_v2, %s11745_s30  ;;  %v11052_v13 = vpop.f32.mrb[18].mxu1  ;;  %v1027_v14 = vpop.f32.mrb[19].mxu0 }
 0x105   : > { %751 = vrot.lane.b32.xlu0 %v635_v3, %s11745_s30  ;;  %v1102_v15 = vpop.f32.mrb[19].mxu1 }
 0x107   : > { %v1031_v16 = vpop.f32.mrb[20].mxu0 }
 0x108   : > { %753 = vrot.lane.b32.xlu1 %v11045_v62, %s11745_s30  ;;  %v1269_v17 = vpop.f32.mrb[20].mxu1  ;;  %v1033_v18 = vpop.f32.mrb[21].mxu0 }
 0x109   : > { %1125 = vrot.lane.b32.xlu0 %v871_v4, %s11746_s7  ;;  %v1271_v19 = vpop.f32.mrb[21].mxu1 }
 0x10b   : > { %v1346_v20 = vpop.f32.mrb[22].mxu0 }
 0x10c   : > { %1127 = vrot.lane.b32.xlu1 %v873_v5, %s11746_s7  ;;  %v1275_v21 = vpop.f32.mrb[22].mxu1  ;;  %v1348_v22 = vpop.f32.mrb[23].mxu0 }
 0x10d   : > { %1129 = vrot.lane.b32.xlu0 %v948_v6, %s11746_s7  ;;  %v1277_v23 = vpop.f32.mrb[23].mxu1 }
 0x10f   : > { %v1352_v24 = vpop.f32.mrb[24].mxu0 }
 0x110   : > { %1131 = vrot.lane.b32.xlu1 %v950_v7, %s11746_s7  ;;  %v1423_v25 = vpop.f32.mrb[24].mxu1  ;;  %v1354_v26 = vpop.f32.mrb[25].mxu0 }
 0x111   : > { %1141 = vrot.lane.b32.xlu0 %v879_v9, %s11746_s7  ;;  %v1425_v27 = vpop.f32.mrb[25].mxu1 }
 0x113   : > { %v11059_v28 = vpop.f32.mrb[26].mxu0 }
 0x114   : > { %1139 = vrot.lane.b32.xlu1 %v877_v8, %s11746_s7  ;;  %v1500_v29 = vpop.f32.mrb[27].mxu0  ;;  %v1429_v30 = vpop.f32.mrb[26].mxu1 }
 0x115   : > { %1145 = vrot.lane.b32.xlu0 %v956_v11, %s11746_s7  ;;  %v1431_v31 = vpop.f32.mrb[27].mxu1 }
 0x117   : > { %v1667_v32 = vpop.f32.mrb[28].mxu0 }
 0x118   : > { %1143 = vrot.lane.b32.xlu1 %v954_v10, %s11746_s7  ;;  %v1669_v33 = vpop.f32.mrb[29].mxu0  ;;  %v1744_v34 = vpop.f32.mrb[28].mxu1 }
 0x119   : > { %1133 = vrot.lane.b32.xlu0 %v1025_v12, %s11746_s7  ;;  %v1746_v35 = vpop.f32.mrb[29].mxu1  ;;  %v12174_v12 = vpop.permute.xlu0 %2390 }
 0x11b   : > { %v1673_v36 = vpop.f32.mrb[30].mxu0 }
 0x11c   : > { %1151 = vrot.lane.b32.xlu1 %v11052_v13, %s11746_s7  ;;  %v1675_v37 = vpop.f32.mrb[31].mxu0  ;;  %v1750_v51 = vpop.f32.mrb[30].mxu1 }
 0x11d   : > { %1137 = vrot.lane.b32.xlu0 %v1102_v15, %s11746_s7  ;;  %v1752_v53 = vpop.f32.mrb[31].mxu1  ;;  %v12177_v13 = vpop.permute.xlu1 %2395 }
 0x11f   : > { %v1821_v54 = vpop.f32.mrb[32].mxu0 }
 0x120   : > { %1135 = vrot.lane.b32.xlu1 %v1027_v14, %s11746_s7  ;;  %v11066_v55 = vpop.f32.mrb[32].mxu1  ;;  %v1823_v56 = vpop.f32.mrb[33].mxu0 }
 0x121   : > { %1523 = vrot.lane.b32.xlu0 %v1269_v17, %s11747_s8  ;;  %v1898_v57 = vpop.f32.mrb[33].mxu1 }
 0x123   : > { %v1827_v58 = vpop.f32.mrb[34].mxu0 }
 0x124   : > { %1147 = vrot.lane.b32.xlu1 %v1031_v16, %s11746_s7  ;;  %v2065_v59 = vpop.f32.mrb[34].mxu1  ;;  %v1829_v60 = vpop.f32.mrb[35].mxu0 }
 0x125   : > { %1149 = vrot.lane.b32.xlu0 %v1033_v18, %s11746_s7  ;;  %v2067_v61 = vpop.f32.mrb[35].mxu1 }
 0x127   : > { %v2142_v62 = vpop.f32.mrb[36].mxu0 }
 0x128   : > { %1525 = vrot.lane.b32.xlu1 %v1271_v19, %s11747_s8  ;;  %v2071_v63 = vpop.f32.mrb[36].mxu1  ;;  %v2144_v2 = vpop.f32.mrb[37].mxu0 }
 0x129   : > { %1527 = vrot.lane.b32.xlu0 %v1346_v20, %s11747_s8  ;;  %v2073_v3 = vpop.f32.mrb[37].mxu1 }
 0x12b   : > { %v2148_v4 = vpop.f32.mrb[38].mxu0 }
 0x12c   : > { %1537 = vrot.lane.b32.xlu1 %v1275_v21, %s11747_s8  ;;  %v2219_v5 = vpop.f32.mrb[38].mxu1  ;;  %v12154_v6 = vpop.f32.mrb[39].mxu0 }
 0x12d   : > { %1539 = vrot.lane.b32.xlu0 %v1277_v23, %s11747_s8  ;;  %v2221_v7 = vpop.f32.mrb[39].mxu1 }
 0x12f   : > { %v12157_v8 = vpop.f32.mrb[40].mxu0 }
 0x130   : > { %1529 = vrot.lane.b32.xlu1 %v1348_v22, %s11747_s8  ;;  %v12160_v9 = vpop.f32.mrb[40].mxu1  ;;  %v12162_v10 = vpop.f32.mrb[41].mxu0 }
 0x131   : > { %1531 = vrot.lane.b32.xlu0 %v1423_v25, %s11747_s8  ;;  %v12165_v11 = vpop.f32.mrb[41].mxu1 }
 0x134   : > { %1541 = vrot.lane.b32.xlu1 %v1352_v24, %s11747_s8 }
 0x135   : > { %1543 = vrot.lane.b32.xlu0 %v1354_v26, %s11747_s8 }
 0x138   : > { %1533 = vrot.lane.b32.xlu1 %v1425_v27, %s11747_s8 }
 0x139   : > { %1535 = vrot.lane.b32.xlu0 %v1500_v29, %s11747_s8 }
 0x13c   : > { %1545 = vrot.lane.b32.xlu1 %v1429_v30, %s11747_s8 }
 0x13d   : > { %1547 = vrot.lane.b32.xlu0 %v1431_v31, %s11747_s8 }
 0x140   : > { %1549 = vrot.lane.b32.xlu1 %v11059_v28, %s11747_s8 }
 0x141   : > { %1923 = vrot.lane.b32.xlu0 %v1669_v33, %s11748_s9 }
 0x144   : > { %1921 = vrot.lane.b32.xlu1 %v1667_v32, %s11748_s9 }
 0x145   : > { %1927 = vrot.lane.b32.xlu0 %v1746_v35, %s11748_s9 }
 0x148   : > { %1925 = vrot.lane.b32.xlu1 %v1744_v34, %s11748_s9 }
 0x149   : > { %1935 = vrot.lane.b32.xlu0 %v1673_v36, %s11748_s9 }
 0x14c   : > { %1937 = vrot.lane.b32.xlu1 %v1675_v37, %s11748_s9 }
 0x14d   : > { %1939 = vrot.lane.b32.xlu0 %v1750_v51, %s11748_s9 }
 0x150   : > { %1941 = vrot.lane.b32.xlu1 %v1752_v53, %s11748_s9 }
 0x151   : > { %1947 = vrot.lane.b32.xlu0 %v11066_v55, %s11748_s9 }
 0x154   : > { %1929 = vrot.lane.b32.xlu1 %v1821_v54, %s11748_s9 }
 0x155   : > { %1931 = vrot.lane.b32.xlu0 %v1823_v56, %s11748_s9 }
 0x158   : > { %1933 = vrot.lane.b32.xlu1 %v1898_v57, %s11748_s9 }
 0x159   : > { %1943 = vrot.lane.b32.xlu0 %v1827_v58, %s11748_s9 }
 0x15c   : > { %2319 = vrot.lane.b32.xlu1 %v2065_v59, %s11749_s10 }
 0x15d   : > { %2321 = vrot.lane.b32.xlu0 %v2067_v61, %s11749_s10 }
 0x15f   : > { %v728_v14 = vpop.permute.xlu0 %727 }
 0x160   : > { %1945 = vrot.lane.b32.xlu1 %v1829_v60, %s11748_s9 }
 0x161   : > { %2333 = vrot.lane.b32.xlu0 %v2071_v63, %s11749_s10 }
 0x162   : > { %v732_v15 = vpop.permute.xlu1 %731 }
 0x163   : > { %v730_v16 = vpop.permute.xlu0 %729 }
 0x164   : > { %v756_v17 = vsel %vm755_vm4, %v728_v14, %v730_v16  ;;  %v757_v18 = vsel %vm755_vm4, %v730_v16, %v732_v15  ;;  %2323 = vrot.lane.b32.xlu1 %v2142_v62, %s11749_s10 }
 0x165   : > { %v782_v19 = vadd.f32 %v756_v17, %v12094_v38  ;;  %v783_v20 = vadd.f32 %v757_v18, %v12096_v39  ;;  %2325 = vrot.lane.b32.xlu0 %v2144_v2, %s11749_s10 }
 0x166   : > { %v742_v21 = vpop.permute.xlu1 %741 }
 0x167   : > { %v744_v22 = vpop.permute.xlu0 %743 }
 0x168   : > { %v762_v23 = vsel %vm755_vm4, %v742_v21, %v744_v22  ;;  %2335 = vrot.lane.b32.xlu1 %v2073_v3, %s11749_s10 }
 0x169   : > { %v789_v24 = vadd.f32 %v762_v23, %v12102_v42  ;;  %2337 = vrot.lane.b32.xlu0 %v2148_v4, %s11749_s10 }
 0x16a   : > { %v734_v25 = vpop.permute.xlu1 %733 }
 0x16b   : > { %v736_v26 = vpop.permute.xlu0 %735  ;;  %v758_v27 = vsel %vm755_vm4, %v732_v15, %v734_v25 }
 0x16c   : > { %v759_v38 = vsel %vm755_vm4, %v734_v25, %v736_v26  ;;  %v784_v39 = vadd.f32 %v758_v27, %v12098_v40  ;;  %2327 = vrot.lane.b32.xlu1 %v2219_v5, %s11749_s10 }
 0x16d   : > { %v785_v28 = vadd.f32 %v759_v38, %v12100_v41  ;;  %2329 = vrot.lane.b32.xlu0 %v2221_v7, %s11749_s10 }
 0x16e   : > { %v746_v29 = vpop.permute.xlu1 %745 }
 0x16f   : > { %v763_v30 = vsel %vm755_vm4, %v744_v22, %v746_v29  ;;  %v748_v42 = vpop.permute.xlu0 %747 }
 0x170   : > { %v790_v31 = vadd.f32 %v763_v30, %v12104_v43  ;;  %v764_v32 = vsel %vm755_vm4, %v746_v29, %v748_v42  ;;  %2339 = vrot.lane.b32.xlu1 %v12154_v6, %s11749_s10 }
 0x171   : > { %v791_v33 = vadd.f32 %v764_v32, %v12106_v44  ;;  %2341 = vrot.lane.b32.xlu0 %v12160_v9, %s11749_s10 }
 0x172   : > { %v738_v40 = vpop.permute.xlu1 %737 }
 0x173   : > { %v760_v41 = vsel %vm755_vm4, %v736_v26, %v738_v40  ;;  %v740_v34 = vpop.permute.xlu0 %739 }
 0x174   : > { %v786_v35 = vadd.f32 %v760_v41, %v12110_v46  ;;  %v761_v36 = vsel %vm755_vm4, %v738_v40, %v740_v34  ;;  %v788_v43 = vadd.f32 %v740_v34, %v12116_v49  ;;  %2331 = vrot.lane.b32.xlu1 %v12162_v10, %s11749_s10 }
 0x175   : > { %v787_v37 = vadd.f32 %v761_v36, %v12112_v47  ;;  %2345 = vrot.lane.b32.xlu0 %v12157_v8, %s11749_s10 }
 0x176   : > { %v750_v44 = vpop.permute.xlu1 %749 }
 0x177   : > { %v765_v51 = vsel %vm755_vm4, %v748_v42, %v750_v44  ;;  %v752_v53 = vpop.permute.xlu0 %751 }
 0x178   : > { %v792_v54 = vadd.f32 %v765_v51, %v12108_v45  ;;  %v766_v46 = vsel %vm755_vm4, %v750_v44, %v752_v53  ;;  %2343 = vrot.lane.b32.xlu1 %v12165_v11, %s11749_s10 }
 0x179   : > { %v793_v49 = vadd.f32 %v766_v46, %v12118_v50 }
 0x17a   : > { %v754_v55 = vpop.permute.xlu1 %753 }
 0x17b   : > { %v767_v56 = vsel %vm755_vm4, %v752_v53, %v754_v55  ;;  %v795_v47 = vadd.f32 %v12114_v48, %v754_v55  ;;  %v1126_v57 = vpop.permute.xlu0 %1125 }
 0x17c   : > { %v794_v58 = vadd.f32 %v767_v56, %v12120_v52 }
 0x17e   : > { %v1128_v59 = vpop.permute.xlu1 %1127 }
 0x17f   : > { %v1130_v60 = vpop.permute.xlu0 %1129  ;;  %v1154_v45 = vsel %vm1153_vm5, %v1126_v57, %v1128_v59 }
 0x180   : > { %v1155_v61 = vsel %vm1153_vm5, %v1128_v59, %v1130_v60  ;;  %v12225_v62 = vadd.f32 %v1154_v45, %v782_v19 }
 0x181   : > { %v12227_v63 = vadd.f32 %v1155_v61, %v783_v20 }
 0x182   : > { %v1132_v50 = vpop.permute.xlu1 %1131 }
 0x183   : > { %v1156_v2 = vsel %vm1153_vm5, %v1130_v60, %v1132_v50  ;;  %v1142_v3 = vpop.permute.xlu0 %1141 }
 0x184   : > { %v12230_v4 = vadd.f32 %v1156_v2, %v784_v39 }
 0x186   : > { %v1140_v48 = vpop.permute.xlu1 %1139 }
 0x187   : > { %v1160_v52 = vsel %vm1153_vm5, %v1140_v48, %v1142_v3  ;;  %v1146_v5 = vpop.permute.xlu0 %1145 }
 0x188   : > { %v12233_v6 = vadd.f32 %v1160_v52, %v789_v24 }
 0x18a   : > { %v1144_v7 = vpop.permute.xlu1 %1143 }
 0x18b   : > { %v1161_v8 = vsel %vm1153_vm5, %v1142_v3, %v1144_v7  ;;  %v1162_v9 = vsel %vm1153_vm5, %v1144_v7, %v1146_v5  ;;  %v1134_v10 = vpop.permute.xlu0 %1133 }
 0x18c   : > { %v12237_v11 = vadd.f32 %v1161_v8, %v790_v31  ;;  %v12239_v14 = vadd.f32 %v1162_v9, %v791_v33  ;;  %v1157_v15 = vsel %vm1153_vm5, %v1132_v50, %v1134_v10 }
 0x18d   : > { %v12242_v16 = vadd.f32 %v1157_v15, %v785_v28 }
 0x18e   : > { %v1152_v17 = vpop.permute.xlu1 %1151 }
 0x18f   : > { %v12244_v18 = vadd.f32 %v1152_v17, %v795_v47  ;;  %v1138_v19 = vpop.permute.xlu0 %1137 }
 0x190   : > { %v12246_v20 = vadd.f32 %v1138_v19, %v788_v43 }
 0x192   : > { %v1136_v21 = vpop.permute.xlu1 %1135 }
 0x193   : > { %v1524_v22 = vpop.permute.xlu0 %1523  ;;  %v1158_v23 = vsel %vm1153_vm5, %v1134_v10, %v1136_v21  ;;  %v1159_v24 = vsel %vm1153_vm5, %v1136_v21, %v1138_v19 }
 0x194   : > { %v12250_v25 = vadd.f32 %v1158_v23, %v786_v35  ;;  %v12252_v26 = vadd.f32 %v1159_v24, %v787_v37 }
 0x196   : > { %v1148_v27 = vpop.permute.xlu1 %1147 }
 0x197   : > { %v1163_v38 = vsel %vm1153_vm5, %v1146_v5, %v1148_v27  ;;  %v1150_v39 = vpop.permute.xlu0 %1149 }
 0x198   : > { %v12255_v28 = vadd.f32 %v1163_v38, %v792_v54  ;;  %v1164_v29 = vsel %vm1153_vm5, %v1148_v27, %v1150_v39  ;;  %v1165_v30 = vsel %vm1153_vm5, %v1150_v39, %v1152_v17 }
 0x199   : > { %v12259_v42 = vadd.f32 %v1164_v29, %v793_v49  ;;  %v12261_v31 = vadd.f32 %v1165_v30, %v794_v58 }
 0x19a   : > { %v1526_v32 = vpop.permute.xlu1 %1525 }
 0x19b   : > { %v1528_v33 = vpop.permute.xlu0 %1527  ;;  %v1552_v50 = vsel %vm1551_vm6, %v1524_v22, %v1526_v32 }
 0x19c   : > { %v1578_v52 = vadd.f32 %v1552_v50, %v12225_v62  ;;  %v1553_v10 = vsel %vm1551_vm6, %v1526_v32, %v1528_v33 }
 0x19d   : > { %v1579_v23 = vadd.f32 %v1553_v10, %v12227_v63 }
 0x19e   : > { %v1538_v40 = vpop.permute.xlu1 %1537 }
 0x19f   : > { %v1540_v41 = vpop.permute.xlu0 %1539 }
 0x1a0   : > { %v1558_v27 = vsel %vm1551_vm6, %v1538_v40, %v1540_v41 }
 0x1a1   : > { %v1585_v63 = vadd.f32 %v1558_v27, %v12233_v6 }
 0x1a2   : > { %v1530_v34 = vpop.permute.xlu1 %1529 }
 0x1a3   : > { %v1532_v35 = vpop.permute.xlu0 %1531  ;;  %v1554_v17 = vsel %vm1551_vm6, %v1528_v33, %v1530_v34 }
 0x1a4   : > { %v1580_v38 = vadd.f32 %v1554_v17, %v12230_v4  ;;  %v1555_v50 = vsel %vm1551_vm6, %v1530_v34, %v1532_v35 }
 0x1a5   : > { %v1581_v34 = vadd.f32 %v1555_v50, %v12242_v16 }
 0x1a6   : > { %v12263_v36 = vpop.permute.xlu1 %1541 }
 0x1a7   : > { %v12265_v43 = vpop.permute.xlu0 %1543  ;;  %v1559_v39 = vsel %vm1551_vm6, %v1540_v41, %v12263_v36 }
 0x1a8   : > { %v1586_v41 = vadd.f32 %v1559_v39, %v12237_v11  ;;  %v1560_v17 = vsel %vm1551_vm6, %v12263_v36, %v12265_v43 }
 0x1aa   : > { %v12267_v37 = vpop.permute.xlu1 %1533 }
 0x1ab   : > { %v12269_v44 = vpop.permute.xlu0 %1535 }
 0x1ae   : > { %v12271_v51 = vpop.permute.xlu1 %1545 }
 0x1af   : > { %v12273_v53 = vpop.permute.xlu0 %1547  ;;  %v1561_v16 = vsel %vm1551_vm6, %v12265_v43, %v12271_v51 }
 0x1b0   : > { %v1562_v50 = vsel %vm1551_vm6, %v12271_v51, %v12273_v53 }
 0x1b2   : > { %v12275_v54 = vpop.permute.xlu1 %1549 }
 0x1b3   : > { %v1924_v46 = vpop.permute.xlu0 %1923 }
 0x1b6   : > { %v1922_v49 = vpop.permute.xlu1 %1921 }
 0x1b7   : > { %v1928_v55 = vpop.permute.xlu0 %1927  ;;  %v1950_v48 = vsel %vm1949_vm7, %v1922_v49, %v1924_v46 }
 0x1b8   : > { %v1976_v7 = vadd.f32 %v1950_v48, %v1578_v52 }
 0x1ba   : > { %v1926_v56 = vpop.permute.xlu1 %1925 }
 0x1bb   : > { %v1936_v47 = vpop.permute.xlu0 %1935  ;;  %v1951_v62 = vsel %vm1949_vm7, %v1924_v46, %v1926_v56  ;;  %v1952_v24 = vsel %vm1949_vm7, %v1926_v56, %v1928_v55 }
 0x1bc   : > { %v1977_v29 = vadd.f32 %v1951_v62, %v1579_v23  ;;  %v1978_v32 = vadd.f32 %v1952_v24, %v1580_v38  ;;  %v1587_v38 = vadd.f32 %v1560_v17, %v12239_v14  ;;  %v1584_v14 = vadd.f32 %v12269_v44, %v12246_v20 }
 0x1bd   : > { %v1591_v20 = vadd.f32 %v12275_v54, %v12244_v18 }
 0x1be   : > { %v1938_v57 = vpop.permute.xlu1 %1937 }
 0x1bf   : > { %v12277_v58 = vpop.permute.xlu0 %1939  ;;  %v1956_v33 = vsel %vm1949_vm7, %v1936_v47, %v1938_v57  ;;  %v1556_v47 = vsel %vm1551_vm6, %v1532_v35, %v12267_v37 }
 0x1c0   : > { %v1957_v56 = vsel %vm1949_vm7, %v1938_v57, %v12277_v58  ;;  %v1983_v52 = vadd.f32 %v1956_v33, %v1585_v63 }
 0x1c2   : > { %v12279_v59 = vpop.permute.xlu1 %1941 }
 0x1c3   : > { %v12281_v60 = vpop.permute.xlu0 %1947  ;;  %v1958_v23 = vsel %vm1949_vm7, %v12277_v58, %v12279_v59  ;;  %v1557_v58 = vsel %vm1551_vm6, %v12267_v37, %v12269_v44 }
 0x1c4   : > { %v1985_v33 = vadd.f32 %v1958_v23, %v1587_v38  ;;  %v1989_v18 = vadd.f32 %v12281_v60, %v1591_v20 }
 0x1c6   : > { %v1930_v45 = vpop.permute.xlu1 %1929 }
 0x1c7   : > { %v12283_v61 = vpop.permute.xlu0 %1931  ;;  %v1953_v57 = vsel %vm1949_vm7, %v1928_v55, %v1930_v45  ;;  %v1582_v55 = vadd.f32 %v1556_v47, %v12250_v25 }
 0x1c8   : > { %v1954_v11 = vsel %vm1949_vm7, %v1930_v45, %v12283_v61 }
 0x1c9   : > { %v1980_v24 = vadd.f32 %v1954_v11, %v1582_v55 }
 0x1ca   : > { %v12286_v2 = vpop.permute.xlu1 %1933 }
 0x1cb   : > { %v12288_v3 = vpop.permute.xlu0 %1943 }
 0x1cc   : > { %v1959_v43 = vsel %vm1949_vm7, %v12279_v59, %v12288_v3 }
 0x1ce   : > { %v2320_v5 = vpop.permute.xlu1 %2319 }
 0x1cf   : > { %v2322_v8 = vpop.permute.xlu0 %2321 }
 0x1d0   : > { %v2348_v9 = vsel %vm2347_vm8, %v2320_v5, %v2322_v8 }
 0x1d1   : > { %v2374_v15 = vadd.f32 %v2348_v9, %v1976_v7  ;;  %v1984_v7 = vadd.f32 %v1957_v56, %v1586_v41  ;;  %v1982_v41 = vadd.f32 %v12286_v2, %v1584_v14 }
 0x1d2   : > { %v12302_v19 = vpop.permute.xlu1 %1945 }
 0x1d3   : > { %v2398_v21 = vadd.f32 %v12174_v12, %v2374_v15  ;;  %v2334_v22 = vpop.permute.xlu0 %2333  ;;  %v1960_v47 = vsel %vm1949_vm7, %v12288_v3, %v12302_v19 }
 0x1d5   : > { %2414 = vst [vmem:[%s12300_s13] sm:$0xff] %v2398_v21  ;;  %v1979_v21 = vadd.f32 %v1953_v57, %v1581_v34 }
 0x1d6   : > { %v2324_v30 = vpop.permute.xlu1 %2323 }
 0x1d7   : > { %v2349_v46 = vsel %vm2347_vm8, %v2322_v8, %v2324_v30  ;;  %v2326_v49 = vpop.permute.xlu0 %2325 }
 0x1d8   : > { %v2375_v40 = vadd.f32 %v2349_v46, %v1977_v29  ;;  %v2350_v4 = vsel %vm2347_vm8, %v2324_v30, %v2326_v49  ;;  %v1588_v30 = vadd.f32 %v1561_v16, %v12255_v28  ;;  %v2509_v16 = vlaneseq (%p26_p0) }
 0x1d9   : > { %v2376_v48 = vadd.f32 %v2350_v4, %v1978_v32 }
 0x1da   : > { %v2399_v5 = vadd.f32 %v12174_v12, %v2375_v40  ;;  %v2336_v6 = vpop.permute.xlu1 %2335  ;;  %v1986_v63 = vadd.f32 %v1959_v43, %v1588_v30  ;;  %v1583_v40 = vadd.f32 %v1557_v58, %v12252_v26  ;;  %v2510_v43 = vshrl.u32 (%p26_p0), %v2509_v16, 7 }
 0x1db   : > { %v2400_v8 = vadd.f32 %v12174_v12, %v2376_v48  ;;  %v2354_v9 = vsel %vm2347_vm8, %v2334_v22, %v2336_v6  ;;  %v2338_v10 = vpop.permute.xlu0 %2337 }
 0x1dc   : > { %2415 = vst [vmem:[%s12300_s13 + $0x8] sm:$0xff] %v2399_v5  ;;  %v2381_v35 = vadd.f32 %v2354_v9, %v1983_v52  ;;  %v2355_v15 = vsel %vm2347_vm8, %v2336_v6, %v2338_v10 }
 0x1dd   : > { %2416 = vst [vmem:[%s12300_s13 + $0x10] sm:$0xff] %v2400_v8  ;;  %v2382_v62 = vadd.f32 %v2355_v15, %v1984_v7  ;;  %v1589_v7 = vadd.f32 %v1562_v50, %v12259_v42 }
 0x1de   : > { %v2405_v45 = vadd.f32 %v12177_v13, %v2381_v35  ;;  %v2328_v22 = vpop.permute.xlu1 %2327 }
 0x1df   : > { %v2406_v36 = vadd.f32 %v12177_v13, %v2382_v62  ;;  %v2351_v25 = vsel %vm2347_vm8, %v2326_v49, %v2328_v22  ;;  %v2330_v27 = vpop.permute.xlu0 %2329  ;;  %v1955_v49 = vsel %vm1949_vm7, %v12283_v61, %v12286_v2  ;;  %v1563_v61 = vsel %vm1551_vm6, %v12273_v53, %v12275_v54  ;;  %v2484_v62 = vld [vmem:[%s15609_s3 + $0x40] sm:$0xff] (%p26_p0) }
 0x1e0   : > { %2422 = vst [vmem:[%s12300_s13 + $0x38] sm:$0xff] %v2405_v45  ;;  %v2377_v39 = vadd.f32 %v2351_v25, %v1979_v21  ;;  %v2352_v29 = vsel %vm2347_vm8, %v2328_v22, %v2330_v27  ;;  %v1981_v48 = vadd.f32 %v1955_v49, %v1583_v40  ;;  %v1961_v53 = vsel %vm1949_vm7, %v12302_v19, %v12281_v60  ;;  %v2483_v45 = vld [vmem:[%s15609_s3 + $0x38] sm:$0xff] (%p26_p0)  ;;  %v10710_v25 = vld [vmem:[%s15609_s3 + $0x380] sm:$0xff] (%p26_p0) }
 0x1e1   : > { %2423 = vst [vmem:[%s12300_s13 + $0x40] sm:$0xff] %v2406_v36  ;;  %v2378_v32 = vadd.f32 %v2352_v29, %v1980_v24  ;;  %v1590_v3 = vadd.f32 %v1563_v61, %v12261_v31  ;;  %v1987_v19 = vadd.f32 %v1960_v47, %v1589_v7  ;;  %v11750_v22 = vmov (%p26_p0), 1966171168   ;;  %v2479_v7 = vld [vmem:[%s15609_s3 + $0x18] sm:$0xff] (%p26_p0) }
 0x1e2   : > { %v2401_v46 = vadd.f32 %v12174_v12, %v2377_v39  ;;  %v2340_v59 = vpop.permute.xlu1 %2339  ;;  %v2507_v23 = vunpack.c.l.s4 (%p26_p0), %v11750_v22  ;;  %v11458_v36 = vpack.c.bf16 (%p26_p0), %v10718_v1, %v10711_v0 }
 0x1e3   : > { %v2402_v37 = vadd.f32 %v12174_v12, %v2378_v32  ;;  %v2342_v56 = vpop.permute.xlu0 %2341  ;;  %v2356_v28 = vsel %vm2347_vm8, %v2338_v10, %v2340_v59  ;;  %v1988_v9 = vadd.f32 %v1961_v53, %v1590_v3  ;;  %v2486_v3 = vld [vmem:[%s15609_s3 + $0x50] sm:$0xff] (%p26_p0) }
 0x1e4   : > { %2417 = vst [vmem:[%s12300_s13 + $0x18] sm:$0xff] %v2401_v46  ;;  %v2357_v44 = vsel %vm2347_vm8, %v2340_v59, %v2342_v56  ;;  %v2383_v4 = vadd.f32 %v2356_v28, %v1985_v33  ;;  %11459 = vmatprep.subr.bf16.mxu0 (%p26_p0), %v11458_v36  ;;  %v2508_v46 = vunpack.c.0.s8 (%p26_p0), %v2507_v23 }
 0x1e5   : > { %2418 = vst [vmem:[%s12300_s13 + $0x20] sm:$0xff] %v2402_v37  ;;  %v2384_v26 = vadd.f32 %v2357_v44, %v1986_v63 }
 0x1e6   : > { %v2407_v52 = vadd.f32 %v12177_v13, %v2383_v4  ;;  %v2332_v51 = vpop.permute.xlu1 %2331 }
 0x1e7   : > { %v2408_v54 = vadd.f32 %v12177_v13, %v2384_v26  ;;  %v2346_v2 = vpop.permute.xlu0 %2345  ;;  %v2353_v5 = vsel %vm2347_vm8, %v2330_v27, %v2332_v51  ;;  %v2380_v6 = vadd.f32 %v2332_v51, %v1982_v41  ;;  %v10717_v27 = vld [vmem:[%s15609_s3 + $0x3b8] sm:$0xff] (%p26_p0) }
 0x1e8   : > { %2424 = vst [vmem:[%s12300_s13 + $0x48] sm:$0xff] %v2407_v52  ;;  %v2387_v57 = vadd.f32 %v2346_v2, %v1989_v18  ;;  %v2379_v8 = vadd.f32 %v2353_v5, %v1981_v48  ;;  %v11460_v39 = vpack.c.bf16 (%p26_p0), %v10717_v27, %v10710_v25  ;;  %v12478_v18 = vsub.s32 (%p26_p0), %v2508_v46, %v2510_v43 }
 0x1e9   : > { %2425 = vst [vmem:[%s12300_s13 + $0x50] sm:$0xff] %v2408_v54  ;;  %v2404_v60 = vadd.f32 %v12174_v12, %v2380_v6 }
 0x1ea   : > { %v2411_v10 = vadd.f32 %v12177_v13, %v2387_v57  ;;  %v2403_v34 = vadd.f32 %v12174_v12, %v2379_v8  ;;  %v2344_v11 = vpop.permute.xlu1 %2343  ;;  %28 = sbr.rel (!%p26_p0) target bundleno = 2 (0x2), region = 204  ;;  %v2477_v12 = vld [vmem:[%s15609_s3 + $0x8] sm:$0xff] (%p26_p0)  ;;  %11461 = vmatpush1.bf16.xpose.msra.mxu0 (%p26_p0), %v11460_v39  ;;  %v12492_v57 = vld [vmem:[%s15609_s3 + $0x10] sm:$0xff] (%p26_p0) }
 0x1eb   : > { %2421 = vst.msk [vmem:[%s12300_s13 + $0x30] sm:$0xff] %vm2420_vm9, %v2404_v60  ;;  %v2358_v42 = vsel %vm2347_vm8, %v2342_v56, %v2344_v11  ;;  %v2359_v31 = vsel %vm2347_vm8, %v2344_v11, %v2346_v2  ;;  %v11330_v21 = vpack.c.bf16 (%p26_p0), %v2484_v62, %v2477_v12 }
 0x1ec   : > { %2428 = vst.msk [vmem:[%s12300_s13 + $0x68] sm:$0xff] %vm2420_vm9, %v2411_v10  ;;  %2419 = vst [vmem:[%s12300_s13 + $0x28] sm:$0xff] %v2403_v34  ;;  %v2385_v35 = vadd.f32 %v2358_v42, %v1987_v19  ;;  %v2386_v15 = vadd.f32 %v2359_v31, %v1988_v9  ;;  %v11334_v19 = vpack.c.bf16 (%p26_p0), %v2486_v3, %v2479_v7  ;;  %v12500_v10 = vld [vmem:[%s15609_s3 + $0x48] sm:$0xff] (%p26_p0)  ;;  %v10713_v34 = vld [vmem:[%s15609_s3 + $0x398] sm:$0xff] (%p26_p0) }
 0x1ed   :  { %11331 = vmatprep.subr.bf16.mxu1 (%p26_p0), %v11330_v21 }
 0x1ee   : > { %v2409_v17 = vadd.f32 %v12177_v13, %v2385_v35  ;;  %v2410_v55 = vadd.f32 %v12177_v13, %v2386_v15  ;;  %v2476_v13 = vld [vmem:[%s15609_s3] sm:$0xff] (%p26_p0) }
 0x1ef   :  { %v11332_v24 = vpack.c.bf16 (%p26_p0), %v2483_v45, %v2476_v13  ;;  %v11336_v13 = vpack.c.bf16 (%p26_p0), %v12500_v10, %v12492_v57 }
 0x1f0   : > { %2426 = vst [vmem:[%s12300_s13 + $0x58] sm:$0xff] %v2409_v17  ;;  %2427 = vst [vmem:[%s12300_s13 + $0x60] sm:$0xff] %v2410_v55  ;;  %v10720_v17 = vld [vmem:[%s15609_s3 + $0x3d0] sm:$0xff] (%p26_p0) }
 0x1f1   :  { %11333 = vmatpush1.bf16.xpose.msra.mxu1 %v11332_v24  ;;  %v11462_v16 = vpack.c.bf16 %v10720_v17, %v10713_v34 }
 0x1f2   :  { %11335 = vmatprep.subr.bf16.mxu1 %v11334_v19 }
 0x1f3   :  { %11463 = vmatprep.subr.bf16.mxu0 %v11462_v16  ;;  %v12623_v16 = vld [vmem:[%s15609_s3 + $0x3e0] sm:$0xff] }
 0x1f7   :  { %v2437_v38 = vld [vmem:[%s15611_s5] ss:$8 sm:$0xf] }
 0x1f8   :  { %v2438_v29 = vld [vmem:[%s15611_s5] ss:$8 sm:$0x70] }
 0x1f9   :  { %v10446_v58 = vld [vmem:[%s15611_s5 + $0x70] ss:$8 sm:$0xf]  ;;  %v2439_v59 = vor.u32 %v2438_v29, %v2437_v38 }
 0x1fa   :  { %v10447_v30 = vld [vmem:[%s15611_s5 + $0x70] ss:$8 sm:$0x70] }
 0x1fb   :  { %v10448_v32 = vld [vmem:[%s15611_s5 + $0xe0] ss:$8 sm:$0xf]  ;;  %v2443_v49 = vor.u32 %v10447_v30, %v10446_v58  ;;  %v2468_v52 = vmax.f32 %v2439_v59, 0.0 }
 0x1fc   :  { %v10449_v14 = vld [vmem:[%s15611_s5 + $0xe0] ss:$8 sm:$0x70] }
 0x1fd   :  { %v10450_v33 = vld [vmem:[%s15611_s5 + $0x150] ss:$8 sm:$0xf]  ;;  %v2447_v63 = vor.u32 %v10449_v14, %v10448_v32  ;;  %v2469_v51 = vmax.f32 %v2443_v49, 0.0 }
 0x1fe   :  { %v10451_v37 = vld [vmem:[%s15611_s5 + $0x150] ss:$8 sm:$0x70] }
 0x1ff   :  { %v10452_v56 = vld [vmem:[%s15611_s5 + $0x1c0] ss:$8 sm:$0xf]  ;;  %v2451_v28 = vor.u32 %v10451_v37, %v10450_v33  ;;  %v2470_v53 = vmax.f32 %v2447_v63, 0.0  ;;  %v2498_v60 = vcombine.low %v2468_v52, %v2469_v51  ;;  %v2499_v11 = vcombine.high %v2468_v52, %v2469_v51 }
 0x200   :  { %v10453_v40 = vld [vmem:[%s15611_s5 + $0x1c0] ss:$8 sm:$0x70] }
 0x201   :  { %v10454_v20 = vld [vmem:[%s15611_s5 + $0x230] ss:$8 sm:$0xf]  ;;  %v2455_v44 = vor.u32 %v10453_v40, %v10452_v56  ;;  %v2471_v2 = vmax.f32 %v2451_v28, 0.0  ;;  %v2512_v55 = vrot.slane %v2498_v60, %v12478_v18  ;;  %v12535_v39 = vrot.slane %v2499_v11, %v12478_v18 }
 0x202   :  { %v10455_v4 = vld [vmem:[%s15611_s5 + $0x230] ss:$8 sm:$0x70]  ;;  %v12590_v60 = vld [vmem:[%s15609_s3 + $0x3c8] sm:$0xff] }
 0x203   :  { %v10456_v50 = vld [vmem:[%s15611_s5 + $0x2a0] ss:$8 sm:$0xf]  ;;  %v2459_v61 = vor.u32 %v10455_v4, %v10454_v20  ;;  %v2472_v5 = vmax.f32 %v2455_v44, 0.0  ;;  %v2500_v31 = vcombine.low %v2470_v53, %v2471_v2  ;;  %v2501_v21 = vcombine.high %v2470_v53, %v2471_v2 }
 0x204   :  { %v10457_v41 = vld [vmem:[%s15611_s5 + $0x2a0] ss:$8 sm:$0x70] }
 0x205   :  { %v10458_v26 = vld [vmem:[%s15611_s5 + $0x310] ss:$8 sm:$0xf]  ;;  %v2463_v48 = vor.u32 %v10457_v41, %v10456_v50  ;;  %v2473_v6 = vmax.f32 %v2459_v61, 0.0  ;;  %v2526_v0 = vrot.slane %v2500_v31, %v12478_v18  ;;  %v12551_v37 = vrot.slane %v2501_v21, %v12478_v18 }
 0x206   :  { %v10459_v47 = vld [vmem:[%s15611_s5 + $0x310] ss:$8 sm:$0x70] }
 0x207   :  { %v2467_v54 = vor.u32 %v10459_v47, %v10458_v26  ;;  %v2474_v8 = vmax.f32 %v2463_v48, 0.0  ;;  %v10694_v9 = vld [vmem:[%s15611_s5 + $0x38] ss:$8 sm:$0xf]  ;;  %v2502_v35 = vcombine.low %v2472_v5, %v2473_v6  ;;  %v2503_v38 = vcombine.high %v2472_v5, %v2473_v6 }
 0x208   :  { %v10695_v15 = vld [vmem:[%s15611_s5 + $0x38] ss:$8 sm:$0x70]  ;;  %v2563_v58 = vcombine.high %v2512_v55, %v2526_v0  ;;  %v2562_v33 = vcombine.low %v2512_v55, %v2526_v0  ;;  %v2565_v52 = vcombine.high %v12535_v39, %v12551_v37 }
 0x209   :  { %v2475_v42 = vmax.f32 %v2467_v54, 0.0  ;;  %v10696_v12 = vld [vmem:[%s15611_s5 + $0xa8] ss:$8 sm:$0xf]  ;;  %v2540_v1 = vrot.slane %v2502_v35, %v12478_v18  ;;  %v6383_v22 = vor.u32 %v10695_v15, %v10694_v9  ;;  %v12554_v56 = vrot.slane %v2503_v38, %v12478_v18 }
 0x20a   :  { %v10697_v62 = vld [vmem:[%s15611_s5 + $0xa8] ss:$8 sm:$0x70]  ;;  %v2590_v40 = vrot.slane %v2563_v58, %v12478_v18  ;;  %v12573_v47 = vrot.slane %v2562_v33, %v12478_v18  ;;  %v2488_v31 = vld [vmem:[%s15609_s3 + $0x60] sm:$0xff]  ;;  %v12653_v33 = vrot.slane %v2565_v52, %v12478_v18 }
 0x20b   :  { %v2504_v45 = vcombine.low %v2474_v8, %v2475_v42  ;;  %v10698_v23 = vld [vmem:[%s15611_s5 + $0x118] ss:$8 sm:$0xf]  ;;  %v6387_v36 = vor.u32 %v10697_v62, %v10696_v12  ;;  %v2505_v43 = vcombine.high %v2474_v8, %v2475_v42  ;;  %v6412_v54 = vmax.f32 %v6383_v22, 0.0 }
 0x20c   :  { %v10699_v24 = vld [vmem:[%s15611_s5 + $0x118] ss:$8 sm:$0x70]  ;;  %v12585_v8 = vld [vmem:[%s15609_s3 + $0x390] sm:$0xff] }
 0x20d   :  { %v10700_v25 = vld [vmem:[%s15611_s5 + $0x188] ss:$8 sm:$0xf]  ;;  %v2554_v29 = vrot.slane %v2504_v45, %v12478_v18  ;;  %v6391_v30 = vor.u32 %v10699_v24, %v10698_v23  ;;  %v12564_v50 = vrot.slane %v2505_v43, %v12478_v18  ;;  %v6413_v2 = vmax.f32 %v6387_v36, 0.0 }
 0x20e   :  { %v10701_v27 = vld [vmem:[%s15611_s5 + $0x188] ss:$8 sm:$0x70]  ;;  %v12603_v35 = vld [vmem:[%s15609_s3 + $0x20] sm:$0xff] }
 0x20f   :  { %v10702_v32 = vld [vmem:[%s15611_s5 + $0x1f8] ss:$8 sm:$0xf]  ;;  %v6395_v46 = vor.u32 %v10701_v27, %v10700_v25  ;;  %v2567_v28 = vcombine.high %v2540_v1, %v2554_v29  ;;  %v2566_v48 = vcombine.low %v2540_v1, %v2554_v29  ;;  %v6414_v5 = vmax.f32 %v6391_v30, 0.0 }
 0x210   :  { %v10703_v14 = vld [vmem:[%s15611_s5 + $0x1f8] ss:$8 sm:$0x70]  ;;  %v6443_v11 = vcombine.low %v6412_v54, %v6413_v2  ;;  %v2569_v21 = vcombine.high %v12554_v56, %v12564_v50  ;;  %v11464_v1 = vpack.c.bf16 %v12590_v60, %v12585_v8  ;;  %v10475_v8 = vld [vmem:[%s15611_s5 + $0x2a1] ss:$8 sm:$0xf] }
 0x211   :  { %v6399_v59 = vor.u32 %v10703_v14, %v10702_v32  ;;  %v10704_v49 = vld [vmem:[%s15611_s5 + $0x268] ss:$8 sm:$0xf]  ;;  %v2618_v51 = vrot.slane %v2567_v28, %v12478_v18  ;;  %v6415_v6 = vmax.f32 %v6395_v46, 0.0  ;;  %v12608_v55 = vrot.slane %v2566_v48, %v12478_v18 }
 0x212   :  { %v10705_v63 = vld [vmem:[%s15611_s5 + $0x268] ss:$8 sm:$0x70]  ;;  %v6457_v0 = vrot.slane %v6443_v11, %v12478_v18  ;;  %v12645_v58 = vld [vmem:[%s15609_s3 + $0x3a0] sm:$0xff]  ;;  %v12656_v46 = vrot.slane %v2569_v21, %v12478_v18  ;;  %v2568_v48 = vcombine.low %v12554_v56, %v12564_v50 }
 0x213   :  { %v6403_v20 = vor.u32 %v10705_v63, %v10704_v49  ;;  %v10706_v44 = vld [vmem:[%s15611_s5 + $0x2d8] ss:$8 sm:$0xf]  ;;  %v12578_v7 = vmax.f32 %v6399_v59, 0.0  ;;  %v2630_v19 = vcombine.low %v2590_v40, %v2618_v51  ;;  %v6445_v15 = vcombine.low %v6414_v5, %v6415_v6 }
 0x214   :  { %v10707_v4 = vld [vmem:[%s15611_s5 + $0x2d8] ss:$8 sm:$0x70]  ;;  %v2631_v22 = vcombine.high %v2590_v40, %v2618_v51  ;;  %v2626_v36 = vcombine.low %v12573_v47, %v12608_v55  ;;  %v2627_v38 = vcombine.high %v12573_v47, %v12608_v55  ;;  %v6444_v63 = vcombine.high %v6412_v54, %v6413_v2  ;;  %v12683_v47 = vld [vmem:[%s15609_s3 + $0x30] sm:$0xff] }
 0x215   :  { %v6407_v61 = vor.u32 %v10707_v4, %v10706_v44  ;;  %v10708_v41 = vld [vmem:[%s15611_s5 + $0x348] ss:$8 sm:$0xf]  ;;  %v12580_v3 = vmax.f32 %v6403_v20, 0.0  ;;  %2712 = vmatprep.mubr.f32.mxu1 %v2630_v19  ;;  %v6471_v23 = vrot.slane %v6445_v15, %v12478_v18  ;;  %v6446_v44 = vcombine.high %v6414_v5, %v6415_v6 }
 0x216   :  { %v10709_v26 = vld [vmem:[%s15611_s5 + $0x348] ss:$8 sm:$0x70]  ;;  %2713 = vmatmul.mubr.f32.vlgmr.msra.gmra.mrb[0].mxu1 %v2626_v36  ;;  %v2632_v56 = vcombine.low %v12653_v33, %v12656_v46  ;;  %v10465_v36 = vld [vmem:[%s15611_s5 + $0x71] ss:$8 sm:$0xf] }
 0x217   :  { %v6411_v53 = vor.u32 %v10709_v26, %v10708_v41  ;;  %v12592_v9 = vmax.f32 %v6407_v61, 0.0  ;;  %v2481_v42 = vld [vmem:[%s15609_s3 + $0x28] sm:$0xff]  ;;  %v6447_v17 = vcombine.low %v12578_v7, %v12580_v3  ;;  %v12613_v12 = vld [vmem:[%s15609_s3 + $0x58] sm:$0xff]  ;;  %v6508_v32 = vcombine.high %v6457_v0, %v6471_v23  ;;  %11337 = vmatpush1.bf16.xpose.msra.mxu1 %v11336_v13  ;;  %2782 = vmatprep.mubr.f32.mxu1 %v2631_v22  ;;  %v12693_v51 = vld [vmem:[%s15609_s3 + $0x3b0] sm:$0xff] }
 0x218   :  { %v12618_v62 = vld [vmem:[%s15609_s3 + $0x3a8] sm:$0xff]  ;;  %v11338_v25 = vpack.c.bf16 %v2488_v31, %v2481_v42  ;;  %v11340_v43 = vpack.c.bf16 %v12613_v12, %v12603_v35  ;;  %v12650_v30 = vld [vmem:[%s15609_s3 + $0x3d8] sm:$0xff]  ;;  %v6507_v14 = vcombine.low %v6457_v0, %v6471_v23  ;;  %v6448_v57 = vcombine.high %v12578_v7, %v12580_v3  ;;  %v12712_v2 = vld [vmem:[%s15609_s3 + $0xb0] sm:$0xff] }
 0x219   :  { %v6419_v34 = vmax.f32 %v6411_v53, 0.0  ;;  %v6485_v24 = vrot.slane %v6447_v17, %v12478_v18  ;;  %v11466_v29 = vpack.c.bf16 %v12623_v16, %v12618_v62  ;;  %v6535_v28 = vrot.slane %v6508_v32, %v12478_v18  ;;  %v12688_v52 = vld [vmem:[%s15609_s3 + $0x68] sm:$0xff]  ;;  %v12707_v54 = vld [vmem:[%s15609_s3 + $0x78] sm:$0xff]  ;;  %v12722_v19 = vld [vmem:[%s15609_s3 + $0x70] sm:$0xff] }
 0x21a   :  { %v12663_v40 = vrot.slane %v6507_v14, %v12478_v18  ;;  %11339 = vmatprep.subr.bf16.mxu1 %v11338_v25  ;;  %v11468_v20 = vpack.c.bf16 %v12650_v30, %v12645_v58  ;;  %v6464_v13 = vrot.slane %v6444_v63, %v12478_v18  ;;  %v6478_v41 = vrot.slane %v6446_v44, %v12478_v18  ;;  %v12702_v50 = vld [vmem:[%s15609_s3 + $0x3e8] sm:$0xff]  ;;  %v12737_v11 = vld [vmem:[%s15609_s3 + $0x430] sm:$0xff] }
 0x21b   :  { %v6449_v45 = vcombine.low %v12592_v9, %v6419_v34  ;;  %v6450_v10 = vcombine.high %v12592_v9, %v6419_v34  ;;  %v2564_v26 = vcombine.low %v12535_v39, %v12551_v37  ;;  %v6492_v5 = vrot.slane %v6448_v57, %v12478_v18  ;;  %v12727_v9 = vld [vmem:[%s15609_s3 + $0xa8] sm:$0xff]  ;;  %v12732_v34 = vld [vmem:[%s15609_s3 + $0x3f8] sm:$0xff]  ;;  %v12749_v55 = vld [vmem:[%s15609_s3 + $0x3f0] sm:$0xff] }
 0x21c   :  { %v6510_v7 = vcombine.high %v6464_v13, %v6478_v41  ;;  %v12742_v31 = vrot.slane %v2568_v48, %v12478_v18  ;;  %v11343_v15 = vpack.c.bf16 %v12688_v52, %v12683_v47  ;;  %v6509_v17 = vcombine.low %v6464_v13, %v6478_v41  ;;  %v12754_v21 = vld [vmem:[%s15609_s3 + $0x428] sm:$0xff]  ;;  %v10466_v25 = vld [vmem:[%s15611_s5 + $0x71] ss:$8 sm:$0x70] }
 0x21d   :  { %v6499_v27 = vrot.slane %v6449_v45, %v12478_v18  ;;  %v6506_v6 = vrot.slane %v6450_v10, %v12478_v18  ;;  %v12717_v3 = vrot.slane %v2564_v26, %v12478_v18  ;;  %v10463_v45 = vld [vmem:[%s15611_s5 + $0x1] ss:$8 sm:$0xf]  ;;  %v11471_v63 = vpack.c.bf16 %v12702_v50, %v12693_v51 }
 0x21e   :  { %v10464_v0 = vld [vmem:[%s15611_s5 + $0x1] ss:$8 sm:$0x70]  ;;  %2783 = vmatmul.mubr.f32.vlgmr.msra.gmra.mrb[0].mxu1 %v2627_v38  ;;  %v12763_v23 = vrot.slane %v6510_v7, %v12478_v18  ;;  %v15613_v12 = vmov 0.0|0.0   ;;  %v11348_v16 = vpack.c.bf16 %v12727_v9, %v12722_v19  ;;  %v13033_v19 = vld [vmem:[%s15609_s3 + $0x438] sm:$0xff] }
 0x21f   :  { %v6512_v59 = vcombine.high %v6485_v24, %v6499_v27  ;;  %v6511_v49 = vcombine.low %v6485_v24, %v6499_v27  ;;  %v6514_v22 = vcombine.high %v6492_v5, %v6506_v6  ;;  %v6513_v24 = vcombine.low %v6492_v5, %v6506_v6  ;;  %v10467_v27 = vld [vmem:[%s15611_s5 + $0xe1] ss:$8 sm:$0xf]  ;;  %11341 = vmatpush1.bf16.xpose.msra.mxu1 %v11340_v43 }
 0x220   :  { %v10468_v38 = vld [vmem:[%s15611_s5 + $0xe1] ss:$8 sm:$0x70]  ;;  %2852 = vmatprep.mubr.f32.mxu1 %v2632_v56  ;;  %11342 = vmatprep.subr.bf16.mxu1 %v15613_v12  ;;  %v2629_v62 = vcombine.high %v12717_v3, %v12742_v31  ;;  %v11474_v43 = vpack.c.bf16 %v12737_v11, %v12732_v34  ;;  %v2936_v56 = vor.u32 %v10466_v25, %v10465_v36 }
 0x221   :  { %v6563_v4 = vrot.slane %v6512_v59, %v12478_v18  ;;  %v12669_v61 = vrot.slane %v6511_v49, %v12478_v18  ;;  %v10469_v32 = vld [vmem:[%s15611_s5 + $0x151] ss:$8 sm:$0xf]  ;;  %v2628_v59 = vcombine.low %v12717_v3, %v12742_v31  ;;  %v12795_v49 = vrot.slane %v6509_v17, %v12478_v18 }
 0x222   :  { %v10470_v14 = vld [vmem:[%s15611_s5 + $0x151] ss:$8 sm:$0x70]  ;;  %v6570_v60 = vrot.slane %v6514_v22, %v12478_v18  ;;  %v12839_v10 = vld [vmem:[%s15609_s3 + $0x88] sm:$0xff]  ;;  %v2940_v5 = vor.u32 %v10468_v38, %v10467_v27  ;;  %v12871_v27 = vmax.f32 %v2936_v56, 0.0 }
 0x223   :  { %v6575_v53 = vcombine.low %v6535_v28, %v6563_v4  ;;  %v6571_v39 = vcombine.low %v12663_v40, %v12669_v61  ;;  %v6576_v37 = vcombine.high %v6535_v28, %v6563_v4  ;;  %v6572_v42 = vcombine.high %v12663_v40, %v12669_v61  ;;  %v10471_v33 = vld [vmem:[%s15611_s5 + $0x1c1] ss:$8 sm:$0xf] }
 0x224   :  { %v10472_v46 = vld [vmem:[%s15611_s5 + $0x1c1] ss:$8 sm:$0x70]  ;;  %v11346_v4 = vpack.c.bf16 %v12712_v2, %v12707_v54  ;;  %v6577_v41 = vcombine.low %v12763_v23, %v6570_v60  ;;  %v2944_v6 = vor.u32 %v10470_v14, %v10469_v32  ;;  %v12873_v38 = vmax.f32 %v2940_v5, 0.0 }
 0x225   :  { %6656 = vmatprep.mubr.f32.mxu0 %v6575_v53  ;;  %v10473_v28 = vld [vmem:[%s15611_s5 + $0x231] ss:$8 sm:$0xf]  ;;  %v2932_v53 = vor.u32 %v10464_v0, %v10463_v45  ;;  %v2948_v7 = vor.u32 %v10472_v46, %v10471_v33 }
 0x226   :  { %6657 = vmatmul.mubr.f32.vlgmr.msra.gmra.mrb[0].mxu0 %v6571_v39  ;;  %v10474_v44 = vld [vmem:[%s15611_s5 + $0x231] ss:$8 sm:$0x70]  ;;  %v12875_v32 = vmax.f32 %v2944_v6, 0.0  ;;  %2853 = vmatmul.mubr.f32.vlgmr.msra.gmra.mrb[0].mxu1 %v2628_v59  ;;  %v11753_v59 = vmov 0.0  }
 0x227   :  { %11465 = vmatpush1.bf16.xpose.msra.mxu0 %v11464_v1  ;;  %6726 = vmatprep.mubr.f32.mxu0 %v6576_v37  ;;  %v12816_v1 = vrot.slane %v6513_v24, %v12478_v18  ;;  %v10476_v57 = vld [vmem:[%s15611_s5 + $0x2a1] ss:$8 sm:$0x70]  ;;  %v2952_v0 = vor.u32 %v10474_v44, %v10473_v28  ;;  %v12863_v24 = vmax.f32 %v2932_v53, 0.0  ;;  %v12877_v14 = vmax.f32 %v2948_v7, 0.0 }
 0x228   :  { %11467 = vmatprep.subr.bf16.mxu0 %v11466_v29  ;;  %v10477_v35 = vld [vmem:[%s15611_s5 + $0x311] ss:$8 sm:$0xf]  ;;  %v2956_v22 = vor.u32 %v10476_v57, %v10475_v8  ;;  %v2994_v53 = vcombine.low %v12873_v38, %v12875_v32  ;;  %11345 = vmatpush3.bf16.xpose.msk.msra.mxu1 %vm12896_vm10, %v11343_v15 }
 0x229   :  { %v10478_v29 = vld [vmem:[%s15611_s5 + $0x311] ss:$8 sm:$0x70]  ;;  %v6573_v26 = vcombine.low %v12795_v49, %v12816_v1  ;;  %v12900_v60 = vmax.f32 %v2952_v0, 0.0  ;;  %11078 = vmatprep.mubr.msk.f32.mxu1 %vm11752_vm11, %v11753_v59  ;;  %11347 = vmatprep.subr.bf16.mxu1 %v11346_v4  ;;  %v6574_v9 = vcombine.high %v12795_v49, %v12816_v1 }
 0x22a   :  { %v12844_v13 = vld [vmem:[%s15609_s3 + $0xc0] sm:$0xff]  ;;  %v10730_v45 = vld [vmem:[%s15611_s5 + $0xa9] ss:$8 sm:$0x70]  ;;  %v2960_v23 = vor.u32 %v10478_v29, %v10477_v35  ;;  %v12902_v57 = vmax.f32 %v2956_v22, 0.0  ;;  %v3020_v7 = vrot.slane %v2994_v53, %v12478_v18 }
 0x22b   :  { %v10727_v39 = vld [vmem:[%s15611_s5 + $0x39] ss:$8 sm:$0xf]  ;;  %v2996_v58 = vcombine.low %v12877_v14, %v12900_v60 }
 0x22c   :  { %v10728_v37 = vld [vmem:[%s15611_s5 + $0x39] ss:$8 sm:$0x70]  ;;  %v12904_v35 = vmax.f32 %v2960_v23, 0.0  ;;  %v13050_v49 = vld [vmem:[%s15609_s3 + $0x90] sm:$0xff] }
 0x22d   :  { %v10729_v17 = vld [vmem:[%s15611_s5 + $0xa9] ss:$8 sm:$0xf]  ;;  %v6876_v56 = vor.u32 %v10728_v37, %v10727_v39  ;;  %v3034_v47 = vrot.slane %v2996_v58, %v12478_v18 }
 0x22e   :  { %v10731_v36 = vld [vmem:[%s15611_s5 + $0x119] ss:$8 sm:$0xf]  ;;  %6727 = vmatmul.mubr.f32.vlgmr.msra.gmra.mrb[0].mxu0 %v6572_v42  ;;  %v2992_v42 = vcombine.low %v12863_v24, %v12871_v27  ;;  %v2998_v30 = vcombine.low %v12902_v57, %v12904_v35 }
 0x22f   :  { %v10732_v25 = vld [vmem:[%s15611_s5 + $0x119] ss:$8 sm:$0x70]  ;;  %11469 = vmatpush1.bf16.xpose.msra.mxu0 %v11468_v20  ;;  %6796 = vmatprep.mubr.f32.mxu0 %v6577_v41  ;;  %v6880_v20 = vor.u32 %v10730_v45, %v10729_v17  ;;  %v12947_v45 = vmax.f32 %v6876_v56, 0.0 }
 0x230   :  { %v10733_v33 = vld [vmem:[%s15611_s5 + $0x189] ss:$8 sm:$0xf]  ;;  %11470 = vmatprep.subr.bf16.mxu0 %v15613_v12  ;;  %v3006_v37 = vrot.slane %v2992_v42, %v12478_v18  ;;  %v6884_v17 = vor.u32 %v10732_v25, %v10731_v36  ;;  %v3048_v52 = vrot.slane %v2998_v30, %v12478_v18  ;;  %11079 = vmatmul.mubr.msk.f32.vlgmr.msra.gmra.mrb[0].mxu1 %vm2420_vm9, %v2629_v62 }
 0x231   :  { %v10734_v46 = vld [vmem:[%s15611_s5 + $0x189] ss:$8 sm:$0x70]  ;;  %v12954_v29 = vmax.f32 %v6880_v20, 0.0  ;;  %v10753_v3 = vld [vmem:[%s15609_s3 + $0x440] sm:$0xff]  ;;  %11349 = vmatpush1.bf16.xpose.msra.mxu1 %v11348_v16  ;;  %v15619_v16 = vpack.c.bf16 %v12844_v13, %v12839_v10 }
 0x232   :  { %v10735_v28 = vld [vmem:[%s15611_s5 + $0x1f9] ss:$8 sm:$0xf]  ;;  %v6888_v15 = vor.u32 %v10734_v46, %v10733_v33  ;;  %v3057_v22 = vcombine.high %v3006_v37, %v3020_v7  ;;  %v3061_v42 = vcombine.high %v3034_v47, %v3048_v52  ;;  %v12956_v36 = vmax.f32 %v6884_v17, 0.0 }
 0x233   :  { %v10736_v44 = vld [vmem:[%s15611_s5 + $0x1f9] ss:$8 sm:$0x70]  ;;  %11351 = vmatprep.subr.bf16.mxu1 %v15619_v16  ;;  %v10491_v30 = vld [vmem:[%s15609_s3 + $0xd0] sm:$0xff] }
 0x234   :  { %v10737_v40 = vld [vmem:[%s15611_s5 + $0x269] ss:$8 sm:$0xf]  ;;  %v6892_v0 = vor.u32 %v10736_v44, %v10735_v28  ;;  %v12958_v25 = vmax.f32 %v6888_v15, 0.0  ;;  %v12961_v54 = vrot.slane %v3057_v22, %v12478_v18  ;;  %v12973_v46 = vrot.slane %v3061_v42, %v12478_v18 }
 0x235   :  { %v10738_v61 = vld [vmem:[%s15611_s5 + $0x269] ss:$8 sm:$0x70]  ;;  %v6936_v44 = vcombine.low %v12947_v45, %v12954_v29 }
 0x236   :  { %v10739_v5 = vld [vmem:[%s15611_s5 + $0x2d9] ss:$8 sm:$0xf]  ;;  %v6896_v23 = vor.u32 %v10738_v61, %v10737_v40  ;;  %v12963_v2 = vmax.f32 %v6892_v0, 0.0  ;;  %6797 = vmatmul.mubr.f32.vlgmr.msra.gmra.mrb[0].mxu0 %v6573_v26  ;;  %v6938_v40 = vcombine.low %v12956_v36, %v12958_v25  ;;  %v3056_v26 = vcombine.low %v3006_v37, %v3020_v7 }
 0x237   :  { %v10740_v6 = vld [vmem:[%s15611_s5 + $0x2d9] ss:$8 sm:$0x70]  ;;  %11473 = vmatpush3.bf16.xpose.msk.msra.mxu0 %vm12896_vm10, %v11471_v63  ;;  %11134 = vmatprep.mubr.msk.f32.mxu0 %vm11752_vm11, %v11753_v59  ;;  %v3124_v51 = vcombine.low %v12961_v54, %v12973_v46  ;;  %v6950_v63 = vrot.slane %v6936_v44, %v12478_v18  ;;  %v13067_v37 = vld [vmem:[%s15609_s3 + $0x450] sm:$0xff] }
 0x238   :  { %v10741_v41 = vld [vmem:[%s15611_s5 + $0x349] ss:$8 sm:$0xf]  ;;  %v6900_v12 = vor.u32 %v10740_v6, %v10739_v5  ;;  %v12965_v4 = vmax.f32 %v6896_v23, 0.0  ;;  %11475 = vmatprep.subr.bf16.mxu0 %v11474_v43  ;;  %v6964_v34 = vrot.slane %v6938_v40, %v12478_v18  ;;  %v13020_v31 = vrot.slane %v3056_v26, %v12478_v18 }
 0x239   :  { %v10742_v39 = vld [vmem:[%s15611_s5 + $0x349] ss:$8 sm:$0x70]  ;;  %v10481_v61 = vld [vmem:[%s15609_s3 + $0x80] sm:$0xff]  ;;  %3205 = vmatprep.mubr.f32.mxu1 %v3124_v51  ;;  %v15620_v26 = vpack.c.bf16 %v12754_v21, %v12749_v55  ;;  %v2999_v51 = vcombine.high %v12902_v57, %v12904_v35  ;;  %v6939_v57 = vcombine.high %v12956_v36, %v12958_v25 }
 0x23a   :  { %v6904_v48 = vor.u32 %v10742_v39, %v10741_v41  ;;  %v12967_v33 = vmax.f32 %v6900_v12, 0.0  ;;  %v6940_v12 = vcombine.low %v12963_v2, %v12965_v4  ;;  %v10488_v53 = vld [vmem:[%s15609_s3 + $0xb8] sm:$0xff]  ;;  %v10746_v56 = vld [vmem:[%s15609_s3 + $0x408] sm:$0xff]  ;;  %v13028_v43 = vld [vmem:[%s15609_s3 + $0x400] sm:$0xff]  ;;  %v7001_v1 = vcombine.high %v6950_v63, %v6964_v34 }
 0x23b   :  { %v11352_v6 = vpack.c.bf16 %v10488_v53, %v10481_v61  ;;  %v10484_v58 = vld [vmem:[%s15609_s3 + $0x98] sm:$0xff]  ;;  %v7000_v13 = vcombine.low %v6950_v63, %v6964_v34  ;;  %v11478_v20 = vpack.c.bf16 %v10753_v3, %v10746_v56  ;;  %v13057_v41 = vld [vmem:[%s15609_s3 + $0xc8] sm:$0xff]  ;;  %v13082_v42 = vld [vmem:[%s15609_s3 + $0x410] sm:$0xff]  ;;  %v2995_v61 = vcombine.high %v12873_v38, %v12875_v32 }
 0x23c   :  { %v12975_v28 = vmax.f32 %v6904_v48, 0.0  ;;  %v3060_v48 = vcombine.low %v3034_v47, %v3048_v52  ;;  %v6978_v11 = vrot.slane %v6940_v12, %v12478_v18  ;;  %v13062_v39 = vld [vmem:[%s15609_s3 + $0x418] sm:$0xff]  ;;  %v11480_v47 = vpack.c.bf16 %v13033_v19, %v13028_v43  ;;  %v13087_v44 = vld [vmem:[%s15609_s3 + $0x448] sm:$0xff]  ;;  %v13129_v19 = vld [vmem:[%s15609_s3 + $0xa0] sm:$0xff] }
 0x23d   :  { %v3125_v52 = vcombine.high %v12961_v54, %v12973_v46  ;;  %v7028_v15 = vrot.slane %v7001_v1, %v12478_v18  ;;  %v13075_v0 = vrot.slane %v7000_v13, %v12478_v18  ;;  %v11354_v22 = vpack.c.bf16 %v10491_v30, %v10484_v58  ;;  %v13172_v30 = vld [vmem:[%s15609_s3 + $0xe0] sm:$0xff]  ;;  %v13177_v1 = vld [vmem:[%s15609_s3 + $0x118] sm:$0xff] }
 0x23e   :  { %v6942_v50 = vcombine.low %v12967_v33, %v12975_v28  ;;  %v13023_v62 = vrot.slane %v3060_v48, %v12478_v18  ;;  %11135 = vmatmul.mubr.msk.f32.vlgmr.msra.gmra.mrb[0].mxu0 %vm2420_vm9, %v6574_v9  ;;  %v11356_v40 = vpack.c.bf16 %v13057_v41, %v13050_v49  ;;  %v11482_v12 = vpack.c.bf16 %v13067_v37, %v13062_v39  ;;  %v13158_v9 = vld [vmem:[%s15609_s3 + $0x120] sm:$0xff] }
 0x23f   :  { %11477 = vmatpush1.bf16.xpose.msra.mxu0 %v15620_v26  ;;  %v2993_v48 = vcombine.high %v12863_v24, %v12871_v27  ;;  %v2997_v53 = vcombine.high %v12877_v14, %v12900_v60  ;;  %v11484_v55 = vpack.c.bf16 %v13087_v44, %v13082_v42  ;;  %v3027_v27 = vrot.slane %v2995_v61, %v12478_v18  ;;  %v13187_v13 = vld [vmem:[%s15609_s3 + $0x4a0] sm:$0xff] }
 0x240   :  { %v6992_v5 = vrot.slane %v6942_v50, %v12478_v18  ;;  %v3120_v10 = vcombine.low %v13020_v31, %v13023_v62  ;;  %v3121_v23 = vcombine.high %v13020_v31, %v13023_v62  ;;  %11479 = vmatprep.subr.bf16.mxu0 %v11478_v20  ;;  %v3055_v32 = vrot.slane %v2999_v51, %v12478_v18  ;;  %v10500_v61 = vld [vmem:[%s15611_s5 + $0xe2] ss:$8 sm:$0xf] }
 0x241   :  { %v3013_v24 = vrot.slane %v2993_v48, %v12478_v18  ;;  %v3041_v38 = vrot.slane %v2997_v53, %v12478_v18  ;;  %v6937_v14 = vcombine.high %v12947_v45, %v12954_v29  ;;  %v6941_v35 = vcombine.high %v12963_v2, %v12965_v4  ;;  %v13134_v29 = vld [vmem:[%s15609_s3 + $0xd8] sm:$0xff]  ;;  %v13143_v4 = vld [vmem:[%s15609_s3 + $0x420] sm:$0xff] }
 0x242   :  { %v7005_v7 = vcombine.high %v6978_v11, %v6992_v5  ;;  %v7004_v17 = vcombine.low %v6978_v11, %v6992_v5  ;;  %3206 = vmatmul.mubr.f32.vlgmr.msra.gmra.mrb[0].mxu1 %v3120_v10  ;;  %v6943_v56 = vcombine.high %v12967_v33, %v12975_v28  ;;  %v6971_v36 = vrot.slane %v6939_v57, %v12478_v18  ;;  %v13148_v33 = vld [vmem:[%s15609_s3 + $0x458] sm:$0xff]  ;;  %v13153_v28 = vld [vmem:[%s15609_s3 + $0xe8] sm:$0xff] }
 0x243   :  { %11353 = vmatpush1.bf16.xpose.msra.mxu1 %v11352_v6  ;;  %3275 = vmatprep.mubr.f32.mxu1 %v3125_v52  ;;  %v3059_v60 = vcombine.high %v3013_v24, %v3027_v27  ;;  %v3063_v3 = vcombine.high %v3041_v38, %v3055_v32  ;;  %v6957_v34 = vrot.slane %v6937_v14, %v12478_v18  ;;  %v13182_v10 = vld [vmem:[%s15609_s3 + $0x468] sm:$0xff]  ;;  %v10503_v31 = vld [vmem:[%s15611_s5 + $0x152] ss:$8 sm:$0x70]  ;;  %v15621_v49 = vmov 0.0|0.0  }
 0x244   :  { %v7056_v54 = vrot.slane %v7005_v7, %v12478_v18  ;;  %v13092_v46 = vrot.slane %v7004_v17, %v12478_v18  ;;  %11355 = vmatprep.subr.bf16.mxu1 %v11354_v22  ;;  %v3058_v11 = vcombine.low %v3013_v24, %v3027_v27  ;;  %v3062_v43 = vcombine.low %v3041_v38, %v3055_v32  ;;  %v13192_v7 = vld [vmem:[%s15609_s3 + $0x460] sm:$0xff]  ;;  %v13197_v17 = vld [vmem:[%s15609_s3 + $0x498] sm:$0xff] }
 0x245   :  { %v3091_v45 = vrot.slane %v3059_v60, %v12478_v18  ;;  %v6985_v25 = vrot.slane %v6941_v35, %v12478_v18  ;;  %v6999_v2 = vrot.slane %v6943_v56, %v12478_v18  ;;  %v3119_v5 = vrot.slane %v3063_v3, %v12478_v18  ;;  %v10496_v52 = vld [vmem:[%s15611_s5 + $0x2] ss:$8 sm:$0xf] }
 0x246   :  { %v7068_v50 = vcombine.low %v7028_v15, %v7056_v54  ;;  %v7064_v63 = vcombine.low %v13075_v0, %v13092_v46  ;;  %v7069_v21 = vcombine.high %v7028_v15, %v7056_v54  ;;  %v7065_v16 = vcombine.high %v13075_v0, %v13092_v46  ;;  %v10498_v15 = vld [vmem:[%s15611_s5 + $0x72] ss:$8 sm:$0xf] }
 0x247   :  { %v13164_v6 = vrot.slane %v3058_v11, %v12478_v18  ;;  %v13167_v58 = vrot.slane %v3062_v43, %v12478_v18  ;;  %v7003_v20 = vcombine.high %v6957_v34, %v6971_v36  ;;  %v7007_v39 = vcombine.high %v6985_v25, %v6999_v2  ;;  %v10499_v22 = vld [vmem:[%s15611_s5 + $0x72] ss:$8 sm:$0x70] }
 0x248   :  { %7149 = vmatprep.mubr.f32.mxu0 %v7068_v50  ;;  %v7002_v37 = vcombine.low %v6957_v34, %v6971_v36  ;;  %v3126_v54 = vcombine.low %v3091_v45, %v3119_v5  ;;  %v11359_v26 = vpack.c.bf16 %v13134_v29, %v13129_v19  ;;  %v7006_v48 = vcombine.low %v6985_v25, %v6999_v2  ;;  %v10501_v53 = vld [vmem:[%s15611_s5 + $0xe2] ss:$8 sm:$0x70]  ;;  %v13279_v11 = vld [vmem:[%s15609_s3 + $0xf8] sm:$0xff] }
 0x249   :  { %7150 = vmatmul.mubr.f32.vlgmr.msra.gmra.mrb[0].mxu0 %v7064_v63  ;;  %v10502_v51 = vld [vmem:[%s15611_s5 + $0x152] ss:$8 sm:$0xf]  ;;  %v7035_v50 = vrot.slane %v7003_v20, %v12478_v18  ;;  %v7063_v63 = vrot.slane %v7007_v39, %v12478_v18  ;;  %v11362_v32 = vpack.c.bf16 %v13158_v9, %v13153_v28  ;;  %v3123_v35 = vcombine.high %v13164_v6, %v13167_v58 }
 0x24a   :  { %11481 = vmatpush1.bf16.xpose.msra.mxu0 %v11480_v47  ;;  %7219 = vmatprep.mubr.f32.mxu0 %v7069_v21  ;;  %v10497_v47 = vld [vmem:[%s15611_s5 + $0x2] ss:$8 sm:$0x70]  ;;  %v3122_v21 = vcombine.low %v13164_v6, %v13167_v58  ;;  %v13245_v24 = vrot.slane %v7002_v37, %v12478_v18  ;;  %v13255_v41 = vrot.slane %v7006_v48, %v12478_v18  ;;  %v10779_v58 = vld [vmem:[%s15609_s3 + $0x478] sm:$0xff] }
 0x24b   :  { %3276 = vmatmul.mubr.f32.vlgmr.msra.gmra.mrb[0].mxu1 %v3121_v23  ;;  %11483 = vmatprep.subr.bf16.mxu0 %v11482_v12  ;;  %v10504_v62 = vld [vmem:[%s15611_s5 + $0x1c2] ss:$8 sm:$0xf]  ;;  %v7070_v57 = vcombine.low %v7035_v50, %v7063_v63  ;;  %v11364_v56 = vpack.c.bf16 %v13177_v1, %v13172_v30  ;;  %v11490_v3 = vpack.c.bf16 %v13187_v13, %v13182_v10 }
 0x24c   :  { %v10505_v23 = vld [vmem:[%s15611_s5 + $0x1c2] ss:$8 sm:$0x70]  ;;  %11357 = vmatpush1.bf16.xpose.msra.mxu1 %v11356_v40  ;;  %3345 = vmatprep.mubr.f32.mxu1 %v3126_v54  ;;  %v11487_v40 = vpack.c.bf16 %v13148_v33, %v13143_v4  ;;  %v7066_v45 = vcombine.low %v13245_v24, %v13255_v41  ;;  %v3425_v25 = vor.u32 %v10497_v47, %v10496_v52 }
 0x24d   :  { %v10506_v12 = vld [vmem:[%s15611_s5 + $0x232] ss:$8 sm:$0xf]  ;;  %11358 = vmatprep.subr.bf16.mxu1 %v15621_v49  ;;  %v3429_v2 = vor.u32 %v10499_v22, %v10498_v15  ;;  %v3433_v5 = vor.u32 %v10501_v53, %v10500_v61  ;;  %v3437_v20 = vor.u32 %v10503_v31, %v10502_v51  ;;  %v3441_v39 = vor.u32 %v10505_v23, %v10504_v62 }
 0x24e   :  { %v10507_v27 = vld [vmem:[%s15611_s5 + $0x232] ss:$8 sm:$0x70]  ;;  %v13311_v61 = vmax.f32 %v3425_v25, 0.0  ;;  %v10521_v6 = vld [vmem:[%s15609_s3 + $0x128] sm:$0xff]  ;;  %v7067_v1 = vcombine.high %v13245_v24, %v13255_v41 }
 0x24f   :  { %v10508_v38 = vld [vmem:[%s15611_s5 + $0x2a2] ss:$8 sm:$0xf]  ;;  %v3445_v37 = vor.u32 %v10507_v27, %v10506_v12  ;;  %v13313_v53 = vmax.f32 %v3429_v2, 0.0  ;;  %v13330_v46 = vmax.f32 %v3433_v5, 0.0  ;;  %v13334_v23 = vmax.f32 %v3441_v39, 0.0 }
 0x250   :  { %v10509_v14 = vld [vmem:[%s15611_s5 + $0x2a2] ss:$8 sm:$0x70] }
 0x251   :  { %v10510_v60 = vld [vmem:[%s15611_s5 + $0x312] ss:$8 sm:$0xf]  ;;  %7220 = vmatmul.mubr.f32.vlgmr.msra.gmra.mrb[0].mxu0 %v7065_v16  ;;  %v3449_v22 = vor.u32 %v10509_v14, %v10508_v38  ;;  %v13332_v16 = vmax.f32 %v3437_v20, 0.0  ;;  %v13336_v12 = vmax.f32 %v3445_v37, 0.0  ;;  %v3485_v27 = vcombine.low %v13311_v61, %v13313_v53 }
 0x252   :  { %v10511_v34 = vld [vmem:[%s15611_s5 + $0x312] ss:$8 sm:$0x70]  ;;  %11485 = vmatpush1.bf16.xpose.msra.mxu0 %v11484_v55  ;;  %7289 = vmatprep.mubr.f32.mxu0 %v7070_v57  ;;  %v13448_v30 = vld [vmem:[%s15609_s3 + $0x4a8] sm:$0xff] }
 0x253   :  { %v13284_v43 = vld [vmem:[%s15609_s3 + $0x130] sm:$0xff]  ;;  %v10761_v9 = vld [vmem:[%s15611_s5 + $0x3a] ss:$8 sm:$0x70]  ;;  %v3453_v48 = vor.u32 %v10511_v34, %v10510_v60  ;;  %3346 = vmatmul.mubr.f32.vlgmr.msra.gmra.mrb[0].mxu1 %v3122_v21  ;;  %11486 = vmatprep.subr.bf16.mxu0 %v15621_v49  ;;  %v13348_v44 = vmax.f32 %v3449_v22, 0.0  ;;  %v3487_v21 = vcombine.low %v13330_v46, %v13332_v16  ;;  %v3489_v60 = vcombine.low %v13334_v23, %v13336_v12 }
 0x254   :  { %v10760_v28 = vld [vmem:[%s15611_s5 + $0x3a] ss:$8 sm:$0xf]  ;;  %v11366_v38 = vpack.c.bf16 %v13284_v43, %v13279_v11  ;;  %11361 = vmatpush3.bf16.xpose.msk.msra.mxu1 %vm12896_vm10, %v11359_v26  ;;  %11085 = vmatprep.mubr.msk.f32.mxu1 %vm11752_vm11, %v11753_v59  ;;  %v3499_v26 = vrot.slane %v3485_v27, %v12478_v18 }
 0x255   :  { %v10762_v54 = vld [vmem:[%s15611_s5 + $0xaa] ss:$8 sm:$0xf]  ;;  %v13350_v55 = vmax.f32 %v3453_v48, 0.0  ;;  %v7369_v57 = vor.u32 %v10761_v9, %v10760_v28  ;;  %11363 = vmatprep.subr.bf16.mxu1 %v11362_v32  ;;  %v3513_v25 = vrot.slane %v3487_v21, %v12478_v18  ;;  %v3527_v2 = vrot.slane %v3489_v60, %v12478_v18 }
 0x256   :  { %v10763_v52 = vld [vmem:[%s15611_s5 + $0xaa] ss:$8 sm:$0x70]  ;;  %v10524_v41 = vld [vmem:[%s15609_s3 + $0x140] sm:$0xff] }
 0x257   :  { %v10764_v47 = vld [vmem:[%s15611_s5 + $0x11a] ss:$8 sm:$0xf]  ;;  %v3491_v29 = vcombine.low %v13348_v44, %v13350_v55  ;;  %v7373_v11 = vor.u32 %v10763_v52, %v10762_v54  ;;  %v3550_v22 = vcombine.high %v3499_v26, %v3513_v25  ;;  %v13382_v32 = vmax.f32 %v7369_v57, 0.0 }
 0x258   :  { %v10765_v15 = vld [vmem:[%s15611_s5 + $0x11a] ss:$8 sm:$0x70] }
 0x259   :  { %v10766_v51 = vld [vmem:[%s15611_s5 + $0x18a] ss:$8 sm:$0xf]  ;;  %v7377_v43 = vor.u32 %v10765_v15, %v10764_v47  ;;  %v3541_v5 = vrot.slane %v3491_v29, %v12478_v18  ;;  %v13384_v48 = vmax.f32 %v7373_v11, 0.0  ;;  %7290 = vmatmul.mubr.f32.vlgmr.msra.gmra.mrb[0].mxu0 %v7066_v45 }
 0x25a   :  { %v10767_v31 = vld [vmem:[%s15611_s5 + $0x18a] ss:$8 sm:$0x70]  ;;  %11489 = vmatpush3.bf16.xpose.msk.msra.mxu0 %vm12896_vm10, %v11487_v40  ;;  %11141 = vmatprep.mubr.msk.f32.mxu0 %vm11752_vm11, %v11753_v59 }
 0x25b   :  { %v10768_v62 = vld [vmem:[%s15611_s5 + $0x1fa] ss:$8 sm:$0xf]  ;;  %v7381_v28 = vor.u32 %v10767_v31, %v10766_v51  ;;  %v13386_v36 = vmax.f32 %v7377_v43, 0.0  ;;  %v3554_v54 = vcombine.high %v3527_v2, %v3541_v5  ;;  %v13402_v51 = vrot.slane %v3550_v22, %v12478_v18  ;;  %11086 = vmatmul.mubr.msk.f32.vlgmr.msra.gmra.mrb[0].mxu1 %vm2420_vm9, %v3123_v35  ;;  %11491 = vmatprep.subr.bf16.mxu0 %v11490_v3 }
 0x25c   :  { %v10769_v0 = vld [vmem:[%s15611_s5 + $0x1fa] ss:$8 sm:$0x70]  ;;  %11365 = vmatpush1.bf16.xpose.msra.mxu1 %v11364_v56  ;;  %v3549_v35 = vcombine.low %v3499_v26, %v3513_v25  ;;  %v3553_v3 = vcombine.low %v3527_v2, %v3541_v5 }
 0x25d   :  { %v10770_v50 = vld [vmem:[%s15611_s5 + $0x26a] ss:$8 sm:$0xf]  ;;  %v7385_v9 = vor.u32 %v10769_v0, %v10768_v62  ;;  %v13388_v52 = vmax.f32 %v7381_v28, 0.0  ;;  %v7429_v62 = vcombine.low %v13382_v32, %v13384_v48  ;;  %v3605_v4 = vrot.slane %v3554_v54, %v12478_v18  ;;  %11367 = vmatprep.subr.bf16.mxu1 %v11366_v38 }
 0x25e   :  { %v10771_v63 = vld [vmem:[%s15611_s5 + $0x26a] ss:$8 sm:$0x70]  ;;  %v13457_v21 = vrot.slane %v3549_v35, %v12478_v18  ;;  %v13460_v60 = vrot.slane %v3553_v3, %v12478_v18  ;;  %v13471_v38 = vld [vmem:[%s15609_s3 + $0x100] sm:$0xff] }
 0x25f   :  { %v10772_v42 = vld [vmem:[%s15611_s5 + $0x2da] ss:$8 sm:$0xf]  ;;  %v7389_v20 = vor.u32 %v10771_v63, %v10770_v50  ;;  %v13390_v47 = vmax.f32 %v7385_v9, 0.0  ;;  %v7431_v33 = vcombine.low %v13386_v36, %v13388_v52  ;;  %v7443_v13 = vrot.slane %v7429_v62, %v12478_v18 }
 0x260   :  { %v10773_v14 = vld [vmem:[%s15611_s5 + $0x2da] ss:$8 sm:$0x70]  ;;  %v10514_v0 = vld [vmem:[%s15609_s3 + $0xf0] sm:$0xff]  ;;  %v3617_v56 = vcombine.low %v13402_v51, %v3605_v4  ;;  %v3613_v28 = vcombine.low %v13457_v21, %v13460_v60  ;;  %v3618_v5 = vcombine.high %v13402_v51, %v3605_v4  ;;  %v3614_v22 = vcombine.high %v13457_v21, %v13460_v60 }
 0x261   :  { %v10774_v34 = vld [vmem:[%s15611_s5 + $0x34a] ss:$8 sm:$0xf]  ;;  %v7393_v39 = vor.u32 %v10773_v14, %v10772_v42  ;;  %v13392_v15 = vmax.f32 %v7389_v20, 0.0  ;;  %v7457_v42 = vrot.slane %v7431_v33, %v12478_v18  ;;  %v11368_v57 = vpack.c.bf16 %v10521_v6, %v10514_v0  ;;  %11142 = vmatmul.mubr.msk.f32.vlgmr.msra.gmra.mrb[0].mxu0 %vm2420_vm9, %v7067_v1 }
 0x262   :  { %v10775_v19 = vld [vmem:[%s15611_s5 + $0x34a] ss:$8 sm:$0x70]  ;;  %3698 = vmatprep.mubr.f32.mxu1 %v3617_v56  ;;  %v13488_v25 = vld [vmem:[%s15609_s3 + $0x4c0] sm:$0xff]  ;;  %v15622_v62 = vpack.c.bf16 %v13197_v17, %v13192_v7  ;;  %v3486_v6 = vcombine.high %v13311_v61, %v13313_v53  ;;  %v3488_v7 = vcombine.high %v13330_v46, %v13332_v16  ;;  %v3490_v17 = vcombine.high %v13334_v23, %v13336_v12 }
 0x263   :  { %v7397_v37 = vor.u32 %v10775_v19, %v10774_v34  ;;  %v13404_v45 = vmax.f32 %v7393_v39, 0.0  ;;  %v7433_v40 = vcombine.low %v13390_v47, %v13392_v15  ;;  %v10786_v50 = vld [vmem:[%s15609_s3 + $0x4b0] sm:$0xff]  ;;  %v10517_v24 = vld [vmem:[%s15609_s3 + $0x108] sm:$0xff]  ;;  %v7494_v34 = vcombine.high %v7443_v13, %v7457_v42  ;;  %v13478_v11 = vld [vmem:[%s15609_s3 + $0x138] sm:$0xff]  ;;  %3699 = vmatmul.mubr.f32.vlgmr.msra.gmra.mrb[0].mxu1 %v3613_v28 }
 0x264   :  { %v13443_v63 = vld [vmem:[%s15609_s3 + $0x470] sm:$0xff]  ;;  %v7493_v19 = vcombine.low %v7443_v13, %v7457_v42  ;;  %v11494_v29 = vpack.c.bf16 %v10786_v50, %v10779_v58  ;;  %v13483_v43 = vld [vmem:[%s15609_s3 + $0x488] sm:$0xff]  ;;  %v13503_v54 = vld [vmem:[%s15609_s3 + $0x480] sm:$0xff]  ;;  %11493 = vmatpush1.bf16.xpose.msra.mxu0 %v15622_v62  ;;  %11369 = vmatpush1.bf16.xpose.msra.mxu1 %v11368_v57  ;;  %v3492_v61 = vcombine.high %v13348_v44, %v13350_v55 }
 0x265   :  { %v13406_v31 = vmax.f32 %v7397_v37, 0.0  ;;  %v7471_v27 = vrot.slane %v7433_v40, %v12478_v18  ;;  %v11496_v26 = vpack.c.bf16 %v13448_v30, %v13443_v63  ;;  %v7521_v20 = vrot.slane %v7494_v34, %v12478_v18  ;;  %v13508_v51 = vld [vmem:[%s15609_s3 + $0x4b8] sm:$0xff]  ;;  %3768 = vmatprep.mubr.f32.mxu1 %v3618_v5  ;;  %v13548_v30 = vld [vmem:[%s15609_s3 + $0x110] sm:$0xff]  ;;  %v13590_v60 = vld [vmem:[%s15609_s3 + $0x188] sm:$0xff] }
 0x266   :  { %v13496_v39 = vrot.slane %v7493_v19, %v12478_v18  ;;  %v11370_v37 = vpack.c.bf16 %v10524_v41, %v10517_v24  ;;  %v11372_v40 = vpack.c.bf16 %v13478_v11, %v13471_v38  ;;  %v11498_v0 = vpack.c.bf16 %v13488_v25, %v13483_v43  ;;  %11495 = vmatprep.subr.bf16.mxu0 %v11494_v29  ;;  %v13585_v21 = vld [vmem:[%s15609_s3 + $0x150] sm:$0xff]  ;;  %v13598_v34 = vld [vmem:[%s15609_s3 + $0x4d8] sm:$0xff] }
 0x267   :  { %v7435_v10 = vcombine.low %v13404_v45, %v13406_v31  ;;  %v11500_v13 = vpack.c.bf16 %v13508_v51, %v13503_v54  ;;  %v3506_v53 = vrot.slane %v3486_v6, %v12478_v18  ;;  %v3520_v46 = vrot.slane %v3488_v7, %v12478_v18  ;;  %v13603_v19 = vld [vmem:[%s15609_s3 + $0x510] sm:$0xff] }
 0x268   :  { %11371 = vmatprep.subr.bf16.mxu1 %v11370_v37  ;;  %v3534_v16 = vrot.slane %v3490_v17, %v12478_v18  ;;  %v7430_v23 = vcombine.high %v13382_v32, %v13384_v48  ;;  %v7432_v12 = vcombine.high %v13386_v36, %v13388_v52  ;;  %v7434_v3 = vcombine.high %v13390_v47, %v13392_v15  ;;  %v13558_v47 = vld [vmem:[%s15609_s3 + $0x148] sm:$0xff]  ;;  %v13563_v15 = vld [vmem:[%s15609_s3 + $0x490] sm:$0xff] }
 0x269   :  { %v7485_v14 = vrot.slane %v7435_v10, %v12478_v18  ;;  %v3548_v50 = vrot.slane %v3492_v61, %v12478_v18  ;;  %v3552_v63 = vcombine.high %v3506_v53, %v3520_v46  ;;  %v7436_v44 = vcombine.high %v13404_v45, %v13406_v31  ;;  %v13568_v45 = vld [vmem:[%s15609_s3 + $0x4c8] sm:$0xff]  ;;  %v10532_v25 = vld [vmem:[%s15611_s5 + $0x73] ss:$8 sm:$0x70] }
 0x26a   :  { %v3551_v55 = vcombine.low %v3506_v53, %v3520_v46  ;;  %v7450_v36 = vrot.slane %v7430_v23, %v12478_v18  ;;  %v7464_v48 = vrot.slane %v7432_v12, %v12478_v18  ;;  %v7478_v52 = vrot.slane %v7434_v3, %v12478_v18  ;;  %v13608_v29 = vld [vmem:[%s15611_s5 + $0x3] ss:$8 sm:$0xf] }
 0x26b   :  { %v7498_v2 = vcombine.high %v7471_v27, %v7485_v14  ;;  %v7497_v9 = vcombine.low %v7471_v27, %v7485_v14  ;;  %v3556_v31 = vcombine.high %v3534_v16, %v3548_v50  ;;  %v3584_v1 = vrot.slane %v3552_v63, %v12478_v18  ;;  %v13575_v27 = vld [vmem:[%s15609_s3 + $0x158] sm:$0xff]  ;;  %v13580_v14 = vld [vmem:[%s15609_s3 + $0x190] sm:$0xff]  ;;  %3769 = vmatmul.mubr.f32.vlgmr.msra.gmra.mrb[0].mxu1 %v3614_v22 }
 0x26c   :  { %v7492_v56 = vrot.slane %v7436_v44, %v12478_v18  ;;  %v3555_v42 = vcombine.low %v3534_v16, %v3548_v50  ;;  %v7496_v57 = vcombine.high %v7450_v36, %v7464_v48  ;;  %v13593_v24 = vrot.slane %v3551_v55, %v12478_v18  ;;  %v10531_v43 = vld [vmem:[%s15611_s5 + $0x73] ss:$8 sm:$0xf]  ;;  %11373 = vmatpush1.bf16.xpose.msra.mxu1 %v11372_v40 }
 0x26d   :  { %v7549_v4 = vrot.slane %v7498_v2, %v12478_v18  ;;  %v13515_v33 = vrot.slane %v7497_v9, %v12478_v18  ;;  %v7495_v41 = vcombine.low %v7450_v36, %v7464_v48  ;;  %v3612_v2 = vrot.slane %v3556_v31, %v12478_v18  ;;  %v13626_v5 = vld [vmem:[%s15609_s3 + $0x4d0] sm:$0xff]  ;;  %11374 = vmatprep.subr.bf16.mxu1 %v15621_v49 }
 0x26e   :  { %v7500_v28 = vcombine.high %v7478_v52, %v7492_v56  ;;  %v13621_v9 = vrot.slane %v3555_v42, %v12478_v18  ;;  %v10533_v37 = vld [vmem:[%s15611_s5 + $0xe3] ss:$8 sm:$0xf]  ;;  %v11375_v6 = vpack.c.bf16 %v13558_v47, %v13548_v30  ;;  %v7499_v7 = vcombine.low %v7478_v52, %v7492_v56 }
 0x26f   :  { %v7561_v58 = vcombine.low %v7521_v20, %v7549_v4  ;;  %v7557_v10 = vcombine.low %v13496_v39, %v13515_v33  ;;  %v7562_v35 = vcombine.high %v7521_v20, %v7549_v4  ;;  %v7558_v32 = vcombine.high %v13496_v39, %v13515_v33  ;;  %v13631_v20 = vld [vmem:[%s15609_s3 + $0x508] sm:$0xff]  ;;  %v10536_v4 = vld [vmem:[%s15611_s5 + $0x153] ss:$8 sm:$0x70] }
 0x270   :  { %v10534_v22 = vld [vmem:[%s15611_s5 + $0xe3] ss:$8 sm:$0x70]  ;;  %v13652_v17 = vrot.slane %v7495_v41, %v12478_v18  ;;  %v3619_v40 = vcombine.low %v3584_v1, %v3612_v2  ;;  %v3615_v61 = vcombine.low %v13593_v24, %v13621_v9  ;;  %v11503_v53 = vpack.c.bf16 %v13568_v45, %v13563_v15 }
 0x271   :  { %7642 = vmatprep.mubr.f32.mxu0 %v7561_v58  ;;  %v10535_v62 = vld [vmem:[%s15611_s5 + $0x153] ss:$8 sm:$0xf]  ;;  %v13679_v23 = vrot.slane %v7499_v7, %v12478_v18  ;;  %v11378_v12 = vpack.c.bf16 %v13580_v14, %v13575_v27  ;;  %v3616_v3 = vcombine.high %v13593_v24, %v13621_v9  ;;  %v11380_v50 = vpack.c.bf16 %v13590_v60, %v13585_v21 }
 0x272   :  { %7643 = vmatmul.mubr.f32.vlgmr.msra.gmra.mrb[0].mxu0 %v7557_v10  ;;  %v10537_v58 = vld [vmem:[%s15611_s5 + $0x1c3] ss:$8 sm:$0xf]  ;;  %3838 = vmatprep.mubr.f32.mxu1 %v3619_v40  ;;  %v11506_v30 = vpack.c.bf16 %v13603_v19, %v13598_v34  ;;  %v3922_v48 = vor.u32 %v10532_v25, %v10531_v43  ;;  %v11508_v1 = vpack.c.bf16 %v13631_v20, %v13626_v5 }
 0x273   :  { %11497 = vmatpush1.bf16.xpose.msra.mxu0 %v11496_v26  ;;  %7712 = vmatprep.mubr.f32.mxu0 %v7562_v35  ;;  %v10530_v26 = vld [vmem:[%s15611_s5 + $0x3] ss:$8 sm:$0x70]  ;;  %v7556_v35 = vrot.slane %v7500_v28, %v12478_v18  ;;  %v7559_v31 = vcombine.low %v13652_v17, %v13679_v23  ;;  %v3926_v56 = vor.u32 %v10534_v22, %v10533_v37  ;;  %v10554_v9 = vld [vmem:[%s15609_s3 + $0x198] sm:$0xff] }
 0x274   :  { %11499 = vmatprep.subr.bf16.mxu0 %v11498_v0  ;;  %v7528_v0 = vrot.slane %v7496_v57, %v12478_v18  ;;  %v10538_v10 = vld [vmem:[%s15611_s5 + $0x1c3] ss:$8 sm:$0x70]  ;;  %v3918_v36 = vor.u32 %v10530_v26, %v13608_v29  ;;  %v3930_v42 = vor.u32 %v10536_v4, %v10535_v62  ;;  %3839 = vmatmul.mubr.f32.vlgmr.msra.gmra.mrb[0].mxu1 %v3615_v61 }
 0x275   :  { %v10539_v38 = vld [vmem:[%s15611_s5 + $0x233] ss:$8 sm:$0xf]  ;;  %v3934_v29 = vor.u32 %v10538_v10, %v10537_v58  ;;  %v13744_v22 = vmax.f32 %v3926_v56, 0.0  ;;  %11377 = vmatpush3.bf16.xpose.msk.msra.mxu1 %vm12896_vm10, %v11375_v6  ;;  %11092 = vmatprep.mubr.msk.f32.mxu1 %vm11752_vm11, %v11753_v59  ;;  %v7560_v34 = vcombine.high %v13652_v17, %v13679_v23 }
 0x276   :  { %v10540_v11 = vld [vmem:[%s15611_s5 + $0x233] ss:$8 sm:$0x70]  ;;  %v7563_v55 = vcombine.low %v7528_v0, %v7556_v35  ;;  %v13699_v52 = vld [vmem:[%s15609_s3 + $0x168] sm:$0xff]  ;;  %v13740_v33 = vmax.f32 %v3918_v36, 0.0  ;;  %v13746_v62 = vmax.f32 %v3930_v42, 0.0  ;;  %11379 = vmatprep.subr.bf16.mxu1 %v11378_v12 }
 0x277   :  { %v10541_v46 = vld [vmem:[%s15611_s5 + $0x2a3] ss:$8 sm:$0xf]  ;;  %v3938_v26 = vor.u32 %v10540_v11, %v10539_v38 }
 0x278   :  { %v10542_v16 = vld [vmem:[%s15611_s5 + $0x2a3] ss:$8 sm:$0x70]  ;;  %v3980_v11 = vcombine.low %v13744_v22, %v13746_v62 }
 0x279   :  { %v10543_v63 = vld [vmem:[%s15611_s5 + $0x313] ss:$8 sm:$0xf]  ;;  %v3942_v43 = vor.u32 %v10542_v16, %v10541_v46  ;;  %v13763_v7 = vmax.f32 %v3938_v26, 0.0 }
 0x27a   :  { %v10544_v44 = vld [vmem:[%s15611_s5 + $0x313] ss:$8 sm:$0x70]  ;;  %7713 = vmatmul.mubr.f32.vlgmr.msra.gmra.mrb[0].mxu0 %v7558_v32  ;;  %v13742_v32 = vmax.f32 %v3922_v48, 0.0  ;;  %v4006_v12 = vrot.slane %v3980_v11, %v12478_v18 }
 0x27b   :  { %v13704_v47 = vld [vmem:[%s15609_s3 + $0x1a0] sm:$0xff]  ;;  %v10796_v41 = vld [vmem:[%s15611_s5 + $0xab] ss:$8 sm:$0x70]  ;;  %v3946_v25 = vor.u32 %v10544_v44, %v10543_v63  ;;  %11501 = vmatpush1.bf16.xpose.msra.mxu0 %v11500_v13  ;;  %7782 = vmatprep.mubr.f32.mxu0 %v7563_v55  ;;  %v13761_v13 = vmax.f32 %v3934_v29, 0.0  ;;  %v13765_v58 = vmax.f32 %v3942_v43, 0.0 }
 0x27c   :  { %v10793_v27 = vld [vmem:[%s15611_s5 + $0x3b] ss:$8 sm:$0xf]  ;;  %11502 = vmatprep.subr.bf16.mxu0 %v15621_v49  ;;  %v3978_v38 = vcombine.low %v13740_v33, %v13742_v32  ;;  %v11382_v40 = vpack.c.bf16 %v13704_v47, %v13699_v52  ;;  %11093 = vmatmul.mubr.msk.f32.vlgmr.msra.gmra.mrb[0].mxu1 %vm2420_vm9, %v3616_v3  ;;  %v3979_v5 = vcombine.high %v13740_v33, %v13742_v32 }
 0x27d   :  { %v10794_v14 = vld [vmem:[%s15611_s5 + $0x3b] ss:$8 sm:$0x70]  ;;  %v13767_v10 = vmax.f32 %v3946_v25, 0.0  ;;  %v3982_v61 = vcombine.low %v13761_v13, %v13763_v7  ;;  %11381 = vmatpush1.bf16.xpose.msra.mxu1 %v11380_v50  ;;  %v10557_v11 = vld [vmem:[%s15609_s3 + $0x1b0] sm:$0xff] }
 0x27e   :  { %v10795_v57 = vld [vmem:[%s15611_s5 + $0xab] ss:$8 sm:$0xf]  ;;  %v7862_v16 = vor.u32 %v10794_v14, %v10793_v27  ;;  %v3992_v36 = vrot.slane %v3978_v38, %v12478_v18  ;;  %11383 = vmatprep.subr.bf16.mxu1 %v11382_v40  ;;  %v3999_v33 = vrot.slane %v3979_v5, %v12478_v18 }
 0x27f   :  { %v10797_v2 = vld [vmem:[%s15611_s5 + $0x11b] ss:$8 sm:$0xf]  ;;  %v3984_v46 = vcombine.low %v13765_v58, %v13767_v10  ;;  %v7866_v63 = vor.u32 %v10796_v41, %v10795_v57  ;;  %v4020_v47 = vrot.slane %v3982_v61, %v12478_v18 }
 0x280   :  { %v10798_v28 = vld [vmem:[%s15611_s5 + $0x11b] ss:$8 sm:$0x70]  ;;  %v4043_v14 = vcombine.high %v3992_v36, %v4006_v12  ;;  %v13799_v29 = vmax.f32 %v7862_v16, 0.0  ;;  %v4042_v3 = vcombine.low %v3992_v36, %v4006_v12 }
 0x281   :  { %v10799_v37 = vld [vmem:[%s15611_s5 + $0x18b] ss:$8 sm:$0xf]  ;;  %v7870_v48 = vor.u32 %v10798_v28, %v10797_v2  ;;  %v4034_v56 = vrot.slane %v3984_v46, %v12478_v18  ;;  %v13801_v43 = vmax.f32 %v7866_v63, 0.0 }
 0x282   :  { %v10800_v39 = vld [vmem:[%s15611_s5 + $0x18b] ss:$8 sm:$0x70]  ;;  %7783 = vmatmul.mubr.f32.vlgmr.msra.gmra.mrb[0].mxu0 %v7559_v31  ;;  %v13815_v2 = vrot.slane %v4043_v14, %v12478_v18  ;;  %v10547_v24 = vld [vmem:[%s15609_s3 + $0x160] sm:$0xff] }
 0x283   :  { %v10801_v4 = vld [vmem:[%s15611_s5 + $0x1fb] ss:$8 sm:$0xf]  ;;  %v7874_v52 = vor.u32 %v10800_v39, %v10799_v37  ;;  %v4047_v26 = vcombine.high %v4020_v47, %v4034_v56  ;;  %v13803_v25 = vmax.f32 %v7870_v48, 0.0  ;;  %11505 = vmatpush3.bf16.xpose.msk.msra.mxu0 %vm12896_vm10, %v11503_v53  ;;  %11148 = vmatprep.mubr.msk.f32.mxu0 %vm11752_vm11, %v11753_v59  ;;  %v7922_v53 = vcombine.low %v13799_v29, %v13801_v43 }
 0x284   :  { %v10802_v0 = vld [vmem:[%s15611_s5 + $0x1fb] ss:$8 sm:$0x70]  ;;  %11507 = vmatprep.subr.bf16.mxu0 %v11506_v30  ;;  %v4046_v30 = vcombine.low %v4020_v47, %v4034_v56  ;;  %v11384_v61 = vpack.c.bf16 %v10554_v9, %v10547_v24  ;;  %v13887_v46 = vld [vmem:[%s15609_s3 + $0x170] sm:$0xff]  ;;  %v3981_v24 = vcombine.high %v13744_v22, %v13746_v62  ;;  %v3983_v9 = vcombine.high %v13761_v13, %v13763_v7 }
 0x285   :  { %v10803_v54 = vld [vmem:[%s15611_s5 + $0x26b] ss:$8 sm:$0xf]  ;;  %v7878_v42 = vor.u32 %v10802_v0, %v10801_v4  ;;  %v13805_v38 = vmax.f32 %v7874_v52, 0.0  ;;  %v4098_v15 = vrot.slane %v4047_v26, %v12478_v18  ;;  %v7936_v23 = vrot.slane %v7922_v53, %v12478_v18 }
 0x286   :  { %v10804_v51 = vld [vmem:[%s15611_s5 + $0x26b] ss:$8 sm:$0x70]  ;;  %v10819_v0 = vld [vmem:[%s15609_s3 + $0x520] sm:$0xff]  ;;  %v4013_v22 = vrot.slane %v3981_v24, %v12478_v18  ;;  %v4027_v62 = vrot.slane %v3983_v9, %v12478_v18  ;;  %v7923_v7 = vcombine.high %v13799_v29, %v13801_v43 }
 0x287   :  { %v10805_v35 = vld [vmem:[%s15611_s5 + $0x2db] ss:$8 sm:$0xf]  ;;  %v7882_v27 = vor.u32 %v10804_v51, %v10803_v54  ;;  %v13817_v31 = vmax.f32 %v7878_v42, 0.0  ;;  %v7924_v39 = vcombine.low %v13803_v25, %v13805_v38  ;;  %v4110_v60 = vcombine.low %v13815_v2, %v4098_v15 }
 0x288   :  { %v10806_v6 = vld [vmem:[%s15611_s5 + $0x2db] ss:$8 sm:$0x70]  ;;  %v13903_v48 = vld [vmem:[%s15609_s3 + $0x530] sm:$0xff]  ;;  %v4111_v56 = vcombine.high %v13815_v2, %v4098_v15 }
 0x289   :  { %v10807_v44 = vld [vmem:[%s15611_s5 + $0x34b] ss:$8 sm:$0xf]  ;;  %v7886_v57 = vor.u32 %v10806_v6, %v10805_v35  ;;  %v13819_v28 = vmax.f32 %v7882_v27, 0.0  ;;  %v7950_v50 = vrot.slane %v7924_v39, %v12478_v18  ;;  %v13879_v35 = vrot.slane %v4042_v3, %v12478_v18  ;;  %4191 = vmatprep.mubr.f32.mxu1 %v4110_v60 }
 0x28a   :  { %v10808_v55 = vld [vmem:[%s15611_s5 + $0x34b] ss:$8 sm:$0x70]  ;;  %v13859_v21 = vld [vmem:[%s15609_s3 + $0x4e0] sm:$0xff]  ;;  %v13882_v6 = vrot.slane %v4046_v30, %v12478_v18  ;;  %11149 = vmatmul.mubr.msk.f32.vlgmr.msra.gmra.mrb[0].mxu0 %vm2420_vm9, %v7560_v34  ;;  %v3985_v34 = vcombine.high %v13765_v58, %v13767_v10  ;;  %v7925_v10 = vcombine.high %v13803_v25, %v13805_v38 }
 0x28b   :  { %v7890_v41 = vor.u32 %v10808_v55, %v10807_v44  ;;  %v13821_v37 = vmax.f32 %v7886_v57, 0.0  ;;  %v7926_v19 = vcombine.low %v13817_v31, %v13819_v28  ;;  %v10812_v4 = vld [vmem:[%s15609_s3 + $0x4e8] sm:$0xff]  ;;  %v13869_v54 = vld [vmem:[%s15609_s3 + $0x518] sm:$0xff]  ;;  %v7987_v63 = vcombine.high %v7936_v23, %v7950_v50  ;;  %11509 = vmatpush1.bf16.xpose.msra.mxu0 %v11508_v1  ;;  %v13927_v53 = vld [vmem:[%s15609_s3 + $0x4f0] sm:$0xff] }
 0x28c   :  { %v10550_v51 = vld [vmem:[%s15609_s3 + $0x178] sm:$0xff]  ;;  %v7986_v44 = vcombine.low %v7936_v23, %v7950_v50  ;;  %v11510_v55 = vpack.c.bf16 %v10819_v0, %v10812_v4  ;;  %v13893_v36 = vld [vmem:[%s15609_s3 + $0x1a8] sm:$0xff]  ;;  %v4106_v52 = vcombine.low %v13879_v35, %v13882_v6  ;;  %v11512_v47 = vpack.c.bf16 %v13869_v54, %v13859_v21  ;;  %v13968_v29 = vld [vmem:[%s15609_s3 + $0x180] sm:$0xff] }
 0x28d   :  { %v13831_v45 = vmax.f32 %v7890_v41, 0.0  ;;  %v7964_v40 = vrot.slane %v7926_v19, %v12478_v18  ;;  %v13898_v12 = vld [vmem:[%s15609_s3 + $0x4f8] sm:$0xff]  ;;  %v11386_v42 = vpack.c.bf16 %v10557_v11, %v10550_v51  ;;  %v8014_v14 = vrot.slane %v7987_v63, %v12478_v18  ;;  %v13932_v39 = vld [vmem:[%s15609_s3 + $0x528] sm:$0xff]  ;;  %v13978_v25 = vld [vmem:[%s15609_s3 + $0x500] sm:$0xff] }
 0x28e   :  { %v13913_v41 = vrot.slane %v7986_v44, %v12478_v18  ;;  %v4107_v26 = vcombine.high %v13879_v35, %v13882_v6  ;;  %v11388_v2 = vpack.c.bf16 %v13893_v36, %v13887_v46  ;;  %v11514_v15 = vpack.c.bf16 %v13903_v48, %v13898_v12  ;;  %4192 = vmatmul.mubr.f32.vlgmr.msra.gmra.mrb[0].mxu1 %v4106_v52  ;;  %v13973_v43 = vld [vmem:[%s15609_s3 + $0x1b8] sm:$0xff]  ;;  %v13991_v50 = vld [vmem:[%s15609_s3 + $0x1c8] sm:$0xff]  ;;  %v13996_v54 = vld [vmem:[%s15609_s3 + $0x200] sm:$0xff] }
 0x28f   :  { %v7928_v17 = vcombine.low %v13821_v37, %v13831_v45  ;;  %11511 = vmatprep.subr.bf16.mxu0 %v11510_v55  ;;  %11385 = vmatpush1.bf16.xpose.msra.mxu1 %v11384_v61  ;;  %v11516_v30 = vpack.c.bf16 %v13932_v39, %v13927_v53  ;;  %v4041_v13 = vrot.slane %v3985_v34, %v12478_v18  ;;  %v14006_v35 = vld [vmem:[%s15609_s3 + $0x1c0] sm:$0xff]  ;;  %v14011_v6 = vld [vmem:[%s15609_s3 + $0x1f8] sm:$0xff]  ;;  %v14016_v61 = vld [vmem:[%s15609_s3 + $0x548] sm:$0xff] }
 0x290   :  { %4261 = vmatprep.mubr.f32.mxu1 %v4111_v56  ;;  %11387 = vmatprep.subr.bf16.mxu1 %v11386_v42  ;;  %v7927_v4 = vcombine.high %v13817_v31, %v13819_v28  ;;  %v7929_v0 = vcombine.high %v13821_v37, %v13831_v45  ;;  %v4045_v21 = vcombine.high %v3999_v33, %v4013_v22  ;;  %v13986_v45 = vld [vmem:[%s15609_s3 + $0x538] sm:$0xff]  ;;  %v14031_v44 = vld [vmem:[%s15611_s5 + $0x4] ss:$8 sm:$0x70] }
 0x291   :  { %v7978_v16 = vrot.slane %v7928_v17, %v12478_v18  ;;  %v4049_v60 = vcombine.high %v4027_v62, %v4041_v13  ;;  %v7943_v17 = vrot.slane %v7923_v7, %v12478_v18  ;;  %v4044_v23 = vcombine.low %v3999_v33, %v4013_v22  ;;  %v14026_v63 = vld [vmem:[%s15611_s5 + $0x4] ss:$8 sm:$0xf] }
 0x292   :  { %v7957_v38 = vrot.slane %v7925_v10, %v12478_v18  ;;  %v7971_v31 = vrot.slane %v7927_v4, %v12478_v18  ;;  %v7985_v28 = vrot.slane %v7929_v0, %v12478_v18  ;;  %v4048_v37 = vcombine.low %v4027_v62, %v4041_v13  ;;  %v14039_v52 = vld [vmem:[%s15609_s3 + $0x540] sm:$0xff] }
 0x293   :  { %v7991_v27 = vcombine.high %v7964_v40, %v7978_v16  ;;  %v7990_v57 = vcombine.low %v7964_v40, %v7978_v16  ;;  %v4077_v51 = vrot.slane %v4045_v21, %v12478_v18  ;;  %v4105_v11 = vrot.slane %v4049_v60, %v12478_v18  ;;  %v14021_v16 = vld [vmem:[%s15609_s3 + $0x580] sm:$0xff] }
 0x294   :  { %v14001_v40 = vrot.slane %v4044_v23, %v12478_v18  ;;  %v7989_v55 = vcombine.high %v7943_v17, %v7957_v38  ;;  %v7993_v12 = vcombine.high %v7971_v31, %v7985_v28  ;;  %v14034_v48 = vrot.slane %v4048_v37, %v12478_v18  ;;  %v10564_v56 = vld [vmem:[%s15611_s5 + $0x74] ss:$8 sm:$0xf] }
 0x295   :  { %v8042_v20 = vrot.slane %v7991_v27, %v12478_v18  ;;  %v13938_v1 = vrot.slane %v7990_v57, %v12478_v18  ;;  %v10565_v42 = vld [vmem:[%s15611_s5 + $0x74] ss:$8 sm:$0x70]  ;;  %v4112_v57 = vcombine.low %v4077_v51, %v4105_v11  ;;  %v7992_v5 = vcombine.low %v7971_v31, %v7985_v28 }
 0x296   :  { %4262 = vmatmul.mubr.f32.vlgmr.msra.gmra.mrb[0].mxu1 %v4107_v26  ;;  %v10566_v27 = vld [vmem:[%s15611_s5 + $0xe4] ss:$8 sm:$0xf]  ;;  %v11391_v26 = vpack.c.bf16 %v13973_v43, %v13968_v29  ;;  %v8021_v34 = vrot.slane %v7989_v55, %v12478_v18  ;;  %v8049_v33 = vrot.slane %v7993_v12, %v12478_v18  ;;  %v11394_v7 = vpack.c.bf16 %v13996_v54, %v13991_v50 }
 0x297   :  { %v8054_v32 = vcombine.low %v8014_v14, %v8042_v20  ;;  %v8050_v19 = vcombine.low %v13913_v41, %v13938_v1  ;;  %v8055_v3 = vcombine.high %v8014_v14, %v8042_v20  ;;  %v8051_v58 = vcombine.high %v13913_v41, %v13938_v1  ;;  %v10567_v14 = vld [vmem:[%s15611_s5 + $0xe4] ss:$8 sm:$0x70]  ;;  %11389 = vmatpush1.bf16.xpose.msra.mxu1 %v11388_v2 }
 0x298   :  { %v10568_v20 = vld [vmem:[%s15611_s5 + $0x154] ss:$8 sm:$0xf]  ;;  %11390 = vmatprep.subr.bf16.mxu1 %v15621_v49  ;;  %4331 = vmatprep.mubr.f32.mxu1 %v4112_v57  ;;  %v14098_v13 = vrot.slane %v7992_v5, %v12478_v18  ;;  %v4109_v10 = vcombine.high %v14001_v40, %v14034_v48  ;;  %v8056_v21 = vcombine.low %v8021_v34, %v8049_v33 }
 0x299   :  { %8135 = vmatprep.mubr.f32.mxu0 %v8054_v32  ;;  %v10569_v24 = vld [vmem:[%s15611_s5 + $0x154] ss:$8 sm:$0x70]  ;;  %v4108_v32 = vcombine.low %v14001_v40, %v14034_v48  ;;  %v11396_v60 = vpack.c.bf16 %v14011_v6, %v14006_v35  ;;  %v4411_v23 = vor.u32 %v14031_v44, %v14026_v63  ;;  %v4415_v51 = vor.u32 %v10565_v42, %v10564_v56 }
 0x29a   :  { %8136 = vmatmul.mubr.f32.vlgmr.msra.gmra.mrb[0].mxu0 %v8050_v19  ;;  %v10570_v9 = vld [vmem:[%s15611_s5 + $0x1c4] ss:$8 sm:$0xf]  ;;  %v11519_v19 = vpack.c.bf16 %v13986_v45, %v13978_v25  ;;  %v4419_v11 = vor.u32 %v10567_v14, %v10566_v27  ;;  %v4423_v56 = vor.u32 %v10569_v24, %v10568_v20 }
 0x29b   :  { %11513 = vmatpush1.bf16.xpose.msra.mxu0 %v11512_v47  ;;  %8205 = vmatprep.mubr.f32.mxu0 %v8055_v3  ;;  %v14044_v47 = vld [vmem:[%s15609_s3 + $0x578] sm:$0xff]  ;;  %v10571_v46 = vld [vmem:[%s15611_s5 + $0x1c4] ss:$8 sm:$0x70]  ;;  %v14168_v20 = vmax.f32 %v4415_v51, 0.0 }
 0x29c   :  { %11515 = vmatprep.subr.bf16.mxu0 %v11514_v15  ;;  %v7988_v15 = vcombine.low %v7943_v17, %v7957_v38  ;;  %v10572_v36 = vld [vmem:[%s15611_s5 + $0x234] ss:$8 sm:$0xf]  ;;  %v11522_v17 = vpack.c.bf16 %v14021_v16, %v14016_v61  ;;  %v11524_v54 = vpack.c.bf16 %v14044_v47, %v14039_v52  ;;  %v4427_v42 = vor.u32 %v10571_v46, %v10570_v9 }
 0x29d   :  { %v10573_v2 = vld [vmem:[%s15611_s5 + $0x234] ss:$8 sm:$0x70]  ;;  %v14170_v24 = vmax.f32 %v4419_v11, 0.0  ;;  %v14182_v39 = vmax.f32 %v4423_v56, 0.0 }
 0x29e   :  { %v10574_v3 = vld [vmem:[%s15611_s5 + $0x2a4] ss:$8 sm:$0xf]  ;;  %v14095_v62 = vrot.slane %v7988_v15, %v12478_v18  ;;  %v4431_v27 = vor.u32 %v10573_v2, %v10572_v36  ;;  %4332 = vmatmul.mubr.f32.vlgmr.msra.gmra.mrb[0].mxu1 %v4108_v32 }
 0x29f   :  { %v10575_v22 = vld [vmem:[%s15611_s5 + $0x2a4] ss:$8 sm:$0x70]  ;;  %v14119_v38 = vld [vmem:[%s15609_s3 + $0x1d8] sm:$0xff]  ;;  %11393 = vmatpush3.bf16.xpose.msk.msra.mxu1 %vm12896_vm10, %v11391_v26  ;;  %11099 = vmatprep.mubr.msk.f32.mxu1 %vm11752_vm11, %v11753_v59  ;;  %v4473_v29 = vcombine.low %v14170_v24, %v14182_v39 }
 0x2a0   :  { %v10576_v4 = vld [vmem:[%s15611_s5 + $0x314] ss:$8 sm:$0xf]  ;;  %v8052_v50 = vcombine.low %v14095_v62, %v14098_v13  ;;  %v4435_v14 = vor.u32 %v10575_v22, %v10574_v3  ;;  %v14186_v36 = vmax.f32 %v4431_v27, 0.0  ;;  %11395 = vmatprep.subr.bf16.mxu1 %v11394_v7  ;;  %v8053_v35 = vcombine.high %v14095_v62, %v14098_v13 }
 0x2a1   :  { %v10577_v0 = vld [vmem:[%s15611_s5 + $0x314] ss:$8 sm:$0x70]  ;;  %v10583_v13 = vld [vmem:[%s15609_s3 + $0x1e8] sm:$0xff] }
 0x2a2   :  { %v14124_v31 = vld [vmem:[%s15609_s3 + $0x210] sm:$0xff]  ;;  %v10827_v37 = vld [vmem:[%s15611_s5 + $0x3c] ss:$8 sm:$0x70]  ;;  %8206 = vmatmul.mubr.f32.vlgmr.msra.gmra.mrb[0].mxu0 %v8051_v58  ;;  %v4439_v1 = vor.u32 %v10577_v0, %v10576_v4  ;;  %v14166_v58 = vmax.f32 %v4411_v23, 0.0  ;;  %v14188_v2 = vmax.f32 %v4435_v14, 0.0 }
 0x2a3   :  { %v10826_v28 = vld [vmem:[%s15611_s5 + $0x3c] ss:$8 sm:$0xf]  ;;  %11517 = vmatpush1.bf16.xpose.msra.mxu0 %v11516_v30  ;;  %8275 = vmatprep.mubr.f32.mxu0 %v8056_v21  ;;  %v14184_v30 = vmax.f32 %v4427_v42, 0.0  ;;  %v11398_v32 = vpack.c.bf16 %v14124_v31, %v14119_v38 }
 0x2a4   :  { %v10828_v63 = vld [vmem:[%s15611_s5 + $0xac] ss:$8 sm:$0xf]  ;;  %11518 = vmatprep.subr.bf16.mxu0 %v15621_v49  ;;  %v14197_v34 = vmax.f32 %v4439_v1, 0.0  ;;  %v4471_v33 = vcombine.low %v14166_v58, %v14168_v20  ;;  %v8355_v3 = vor.u32 %v10827_v37, %v10826_v28  ;;  %v4499_v28 = vrot.slane %v4473_v29, %v12478_v18 }
 0x2a5   :  { %v10829_v44 = vld [vmem:[%s15611_s5 + $0xac] ss:$8 sm:$0x70]  ;;  %v4475_v43 = vcombine.low %v14184_v30, %v14186_v36  ;;  %v4472_v52 = vcombine.high %v14166_v58, %v14168_v20 }
 0x2a6   :  { %v10830_v55 = vld [vmem:[%s15611_s5 + $0x11c] ss:$8 sm:$0xf]  ;;  %v8359_v26 = vor.u32 %v10829_v44, %v10828_v63  ;;  %v4477_v23 = vcombine.low %v14188_v2, %v14197_v34  ;;  %v4485_v7 = vrot.slane %v4471_v33, %v12478_v18  ;;  %11100 = vmatmul.mubr.msk.f32.vlgmr.msra.gmra.mrb[0].mxu1 %vm2420_vm9, %v4109_v10  ;;  %v4478_v58 = vcombine.high %v14188_v2, %v14197_v34 }
 0x2a7   :  { %v10831_v12 = vld [vmem:[%s15611_s5 + $0x11c] ss:$8 sm:$0x70]  ;;  %v4513_v37 = vrot.slane %v4475_v43, %v12478_v18  ;;  %11397 = vmatpush1.bf16.xpose.msra.mxu1 %v11396_v60  ;;  %v10580_v1 = vld [vmem:[%s15609_s3 + $0x1d0] sm:$0xff]  ;;  %v4492_v20 = vrot.slane %v4472_v52, %v12478_v18 }
 0x2a8   :  { %v10832_v57 = vld [vmem:[%s15611_s5 + $0x18c] ss:$8 sm:$0xf]  ;;  %v8363_v4 = vor.u32 %v10831_v12, %v10830_v55  ;;  %v4527_v63 = vrot.slane %v4477_v23, %v12478_v18  ;;  %v14222_v55 = vmax.f32 %v8355_v3, 0.0  ;;  %v14224_v12 = vmax.f32 %v8359_v26, 0.0  ;;  %11399 = vmatprep.subr.bf16.mxu1 %v11398_v32 }
 0x2a9   :  { %v10833_v15 = vld [vmem:[%s15611_s5 + $0x18c] ss:$8 sm:$0x70]  ;;  %v4536_v56 = vcombine.high %v4485_v7, %v4499_v28  ;;  %v4535_v16 = vcombine.low %v4485_v7, %v4499_v28  ;;  %v10590_v32 = vld [vmem:[%s15609_s3 + $0x220] sm:$0xff] }
 0x2aa   :  { %v10834_v5 = vld [vmem:[%s15611_s5 + $0x1fc] ss:$8 sm:$0xf]  ;;  %v8367_v38 = vor.u32 %v10833_v15, %v10832_v57  ;;  %8276 = vmatmul.mubr.f32.vlgmr.msra.gmra.mrb[0].mxu0 %v8052_v50  ;;  %v14226_v42 = vmax.f32 %v8363_v4, 0.0  ;;  %v4540_v57 = vcombine.high %v4513_v37, %v4527_v63  ;;  %v8415_v45 = vcombine.low %v14222_v55, %v14224_v12 }
 0x2ab   :  { %v10835_v41 = vld [vmem:[%s15611_s5 + $0x1fc] ss:$8 sm:$0x70]  ;;  %11521 = vmatpush3.bf16.xpose.msk.msra.mxu0 %vm12896_vm10, %v11519_v19  ;;  %11155 = vmatprep.mubr.msk.f32.mxu0 %vm11752_vm11, %v11753_v59  ;;  %v4563_v25 = vrot.slane %v4536_v56, %v12478_v18  ;;  %v14284_v62 = vrot.slane %v4535_v16, %v12478_v18  ;;  %v10844_v26 = vld [vmem:[%s15609_s3 + $0x550] sm:$0xff] }
 0x2ac   :  { %v10836_v9 = vld [vmem:[%s15611_s5 + $0x26c] ss:$8 sm:$0xf]  ;;  %v8371_v31 = vor.u32 %v10835_v41, %v10834_v5  ;;  %v14228_v27 = vmax.f32 %v8367_v38, 0.0  ;;  %11523 = vmatprep.subr.bf16.mxu0 %v11522_v17  ;;  %v4591_v40 = vrot.slane %v4540_v57, %v12478_v18  ;;  %v8429_v6 = vrot.slane %v8415_v45, %v12478_v18 }
 0x2ad   :  { %v10837_v46 = vld [vmem:[%s15611_s5 + $0x26c] ss:$8 sm:$0x70]  ;;  %v4539_v41 = vcombine.low %v4513_v37, %v4527_v63  ;;  %v10854_v37 = vld [vmem:[%s15609_s3 + $0x5a0] sm:$0xff] }
 0x2ae   :  { %v10838_v53 = vld [vmem:[%s15611_s5 + $0x2dc] ss:$8 sm:$0xf]  ;;  %v8375_v51 = vor.u32 %v10837_v46, %v10836_v9  ;;  %v14230_v14 = vmax.f32 %v8371_v31, 0.0  ;;  %v8417_v19 = vcombine.low %v14226_v42, %v14228_v27  ;;  %v4603_v46 = vcombine.low %v4563_v25, %v4591_v40 }
 0x2af   :  { %v10839_v22 = vld [vmem:[%s15611_s5 + $0x2dc] ss:$8 sm:$0x70]  ;;  %v10852_v17 = vld [vmem:[%s15609_s3 + $0x590] sm:$0xff]  ;;  %v4604_v38 = vcombine.high %v4563_v25, %v4591_v40 }
 0x2b0   :  { %v10840_v0 = vld [vmem:[%s15611_s5 + $0x34c] ss:$8 sm:$0xf]  ;;  %v8379_v11 = vor.u32 %v10839_v22, %v10838_v53  ;;  %v14239_v15 = vmax.f32 %v8375_v51, 0.0  ;;  %v8443_v60 = vrot.slane %v8417_v19, %v12478_v18  ;;  %v14293_v22 = vrot.slane %v4539_v41, %v12478_v18  ;;  %4684 = vmatprep.mubr.f32.mxu1 %v4603_v46 }
 0x2b1   :  { %v10841_v21 = vld [vmem:[%s15611_s5 + $0x34c] ss:$8 sm:$0x70]  ;;  %v14329_v56 = vld [vmem:[%s15609_s3 + $0x560] sm:$0xff] }
 0x2b2   :  { %v8383_v44 = vor.u32 %v10841_v21, %v10840_v0  ;;  %v14241_v50 = vmax.f32 %v8379_v11, 0.0  ;;  %v8419_v48 = vcombine.low %v14230_v14, %v14239_v15  ;;  %v10845_v10 = vld [vmem:[%s15609_s3 + $0x558] sm:$0xff]  ;;  %v10587_v9 = vld [vmem:[%s15609_s3 + $0x208] sm:$0xff]  ;;  %v8480_v3 = vcombine.high %v8429_v6, %v8443_v60  ;;  %v14304_v0 = vld [vmem:[%s15609_s3 + $0x1e0] sm:$0xff]  ;;  %11156 = vmatmul.mubr.msk.f32.vlgmr.msra.gmra.mrb[0].mxu0 %vm2420_vm9, %v8053_v35 }
 0x2b3   :  { %v8479_v29 = vcombine.low %v8429_v6, %v8443_v60  ;;  %v11526_v43 = vpack.c.bf16 %v10852_v17, %v10845_v10  ;;  %v10851_v4 = vld [vmem:[%s15609_s3 + $0x588] sm:$0xff]  ;;  %v11400_v23 = vpack.c.bf16 %v10587_v9, %v10580_v1  ;;  %v14309_v31 = vld [vmem:[%s15609_s3 + $0x218] sm:$0xff]  ;;  %v4599_v11 = vcombine.low %v14284_v62, %v14293_v22  ;;  %11525 = vmatpush1.bf16.xpose.msra.mxu0 %v11524_v54  ;;  %v14391_v1 = vld [vmem:[%s15609_s3 + $0x570] sm:$0xff] }
 0x2b4   :  { %v14243_v5 = vmax.f32 %v8383_v44, 0.0  ;;  %v8457_v53 = vrot.slane %v8419_v48, %v12478_v18  ;;  %v14314_v28 = vld [vmem:[%s15609_s3 + $0x568] sm:$0xff]  ;;  %v8507_v51 = vrot.slane %v8480_v3, %v12478_v18  ;;  %v11402_v44 = vpack.c.bf16 %v10590_v32, %v10583_v13  ;;  %v14334_v57 = vld [vmem:[%s15609_s3 + $0x598] sm:$0xff]  ;;  %v14411_v32 = vld [vmem:[%s15609_s3 + $0x230] sm:$0xff] }
 0x2b5   :  { %v14324_v63 = vrot.slane %v8479_v29, %v12478_v18  ;;  %v11528_v19 = vpack.c.bf16 %v10851_v4, %v10844_v26  ;;  %v4600_v40 = vcombine.high %v14284_v62, %v14293_v22  ;;  %4685 = vmatmul.mubr.f32.vlgmr.msra.gmra.mrb[0].mxu1 %v4599_v11  ;;  %11527 = vmatprep.subr.bf16.mxu0 %v11526_v43  ;;  %v14396_v9 = vld [vmem:[%s15609_s3 + $0x5a8] sm:$0xff]  ;;  %v14401_v46 = vld [vmem:[%s15609_s3 + $0x238] sm:$0xff]  ;;  %v14426_v29 = vld [vmem:[%s15609_s3 + $0x5f0] sm:$0xff] }
 0x2b6   :  { %v8421_v61 = vcombine.low %v14241_v50, %v14243_v5  ;;  %v11404_v48 = vpack.c.bf16 %v14309_v31, %v14304_v0  ;;  %11401 = vmatpush1.bf16.xpose.msra.mxu1 %v11400_v23  ;;  %4754 = vmatprep.mubr.f32.mxu1 %v4604_v38  ;;  %v11532_v16 = vpack.c.bf16 %v14334_v57, %v14329_v56  ;;  %v14416_v3 = vld [vmem:[%s15609_s3 + $0x268] sm:$0xff]  ;;  %v14421_v22 = vld [vmem:[%s15609_s3 + $0x5b8] sm:$0xff]  ;;  %v14433_v0 = vld [vmem:[%s15609_s3 + $0x5b0] sm:$0xff] }
 0x2b7   :  { %11403 = vmatprep.subr.bf16.mxu1 %v11402_v44  ;;  %v4474_v17 = vcombine.high %v14170_v24, %v14182_v39  ;;  %v4476_v35 = vcombine.high %v14184_v30, %v14186_v36  ;;  %v8416_v6 = vcombine.high %v14222_v55, %v14224_v12  ;;  %v8418_v60 = vcombine.high %v14226_v42, %v14228_v27  ;;  %v14380_v42 = vld [vmem:[%s15609_s3 + $0x1f0] sm:$0xff]  ;;  %v14385_v27 = vld [vmem:[%s15609_s3 + $0x228] sm:$0xff] }
 0x2b8   :  { %v8471_v33 = vrot.slane %v8421_v61, %v12478_v18  ;;  %v11530_v61 = vpack.c.bf16 %v10854_v37, %v14314_v28  ;;  %v8420_v41 = vcombine.high %v14230_v14, %v14239_v15  ;;  %v4534_v30 = vrot.slane %v4478_v58, %v12478_v18  ;;  %v10595_v23 = vld [vmem:[%s15611_s5 + $0x5] ss:$8 sm:$0xf] }
 0x2b9   :  { %v4506_v24 = vrot.slane %v4474_v17, %v12478_v18  ;;  %v4520_v39 = vrot.slane %v4476_v35, %v12478_v18  ;;  %v8422_v36 = vcombine.high %v14241_v50, %v14243_v5  ;;  %v8436_v34 = vrot.slane %v8416_v6, %v12478_v18  ;;  %v10597_v38 = vld [vmem:[%s15611_s5 + $0x75] ss:$8 sm:$0xf] }
 0x2ba   :  { %v8484_v21 = vcombine.high %v8457_v53, %v8471_v33  ;;  %v8483_v7 = vcombine.low %v8457_v53, %v8471_v33  ;;  %v8450_v55 = vrot.slane %v8418_v60, %v12478_v18  ;;  %v8464_v12 = vrot.slane %v8420_v41, %v12478_v18  ;;  %v14406_v53 = vld [vmem:[%s15609_s3 + $0x270] sm:$0xff] }
 0x2bb   :  { %v4538_v14 = vcombine.high %v4492_v20, %v4506_v24  ;;  %v4542_v15 = vcombine.high %v4520_v39, %v4534_v30  ;;  %v8478_v50 = vrot.slane %v8422_v36, %v12478_v18  ;;  %v4537_v5 = vcombine.low %v4492_v20, %v4506_v24  ;;  %v10598_v31 = vld [vmem:[%s15611_s5 + $0x75] ss:$8 sm:$0x70] }
 0x2bc   :  { %v8535_v25 = vrot.slane %v8484_v21, %v12478_v18  ;;  %v14341_v45 = vrot.slane %v8483_v7, %v12478_v18  ;;  %v8482_v33 = vcombine.high %v8436_v34, %v8450_v55  ;;  %v4541_v62 = vcombine.low %v4520_v39, %v4534_v30  ;;  %v14438_v21 = vld [vmem:[%s15609_s3 + $0x5e8] sm:$0xff]  ;;  %v10606_v35 = vld [vmem:[%s15611_s5 + $0x235] ss:$8 sm:$0x70] }
 0x2bd   :  { %v8481_v13 = vcombine.low %v8436_v34, %v8450_v55  ;;  %4755 = vmatmul.mubr.f32.vlgmr.msra.gmra.mrb[0].mxu1 %v4600_v40  ;;  %v4570_v43 = vrot.slane %v4538_v14, %v12478_v18  ;;  %v4598_v26 = vrot.slane %v4542_v15, %v12478_v18  ;;  %v8486_v4 = vcombine.high %v8464_v12, %v8478_v50  ;;  %v10596_v7 = vld [vmem:[%s15611_s5 + $0x5] ss:$8 sm:$0x70] }
 0x2be   :  { %v8547_v47 = vcombine.low %v8507_v51, %v8535_v25  ;;  %v8543_v54 = vcombine.low %v14324_v63, %v14341_v45  ;;  %v8548_v10 = vcombine.high %v8507_v51, %v8535_v25  ;;  %v8544_v2 = vcombine.high %v14324_v63, %v14341_v45  ;;  %11405 = vmatpush1.bf16.xpose.msra.mxu1 %v11404_v48  ;;  %v10599_v44 = vld [vmem:[%s15611_s5 + $0xe5] ss:$8 sm:$0xf] }
 0x2bf   :  { %v8514_v28 = vrot.slane %v8482_v33, %v12478_v18  ;;  %v14454_v37 = vrot.slane %v4537_v5, %v12478_v18  ;;  %v14457_v51 = vrot.slane %v4541_v62, %v12478_v18  ;;  %v8485_v11 = vcombine.low %v8464_v12, %v8478_v50  ;;  %v10600_v25 = vld [vmem:[%s15611_s5 + $0xe5] ss:$8 sm:$0x70]  ;;  %11406 = vmatprep.subr.bf16.mxu1 %v15621_v49 }
 0x2c0   :  { %8628 = vmatprep.mubr.f32.mxu0 %v8547_v47  ;;  %v10602_v40 = vld [vmem:[%s15611_s5 + $0x155] ss:$8 sm:$0x70]  ;;  %v4605_v47 = vcombine.low %v4570_v43, %v4598_v26  ;;  %v14485_v17 = vrot.slane %v8481_v13, %v12478_v18  ;;  %v11535_v60 = vpack.c.bf16 %v14396_v9, %v14391_v1  ;;  %v11410_v41 = vpack.c.bf16 %v14406_v53, %v14401_v46 }
 0x2c1   :  { %8629 = vmatmul.mubr.f32.vlgmr.msra.gmra.mrb[0].mxu0 %v8543_v54  ;;  %v10603_v48 = vld [vmem:[%s15611_s5 + $0x1c5] ss:$8 sm:$0xf]  ;;  %v8542_v54 = vrot.slane %v8486_v4, %v12478_v18  ;;  %v4601_v20 = vcombine.low %v14454_v37, %v14457_v51  ;;  %v14496_v6 = vrot.slane %v8485_v11, %v12478_v18  ;;  %v4602_v36 = vcombine.high %v14454_v37, %v14457_v51 }
 0x2c2   :  { %11529 = vmatpush1.bf16.xpose.msra.mxu0 %v11528_v19  ;;  %8698 = vmatprep.mubr.f32.mxu0 %v8548_v10  ;;  %v10601_v19 = vld [vmem:[%s15611_s5 + $0x155] ss:$8 sm:$0xf]  ;;  %v11407_v10 = vpack.c.bf16 %v14385_v27, %v14380_v42  ;;  %v11412_v34 = vpack.c.bf16 %v14416_v3, %v14411_v32  ;;  %v11538_v55 = vpack.c.bf16 %v14426_v29, %v14421_v22 }
 0x2c3   :  { %11531 = vmatprep.subr.bf16.mxu0 %v11530_v61  ;;  %v10604_v61 = vld [vmem:[%s15611_s5 + $0x1c5] ss:$8 sm:$0x70]  ;;  %4824 = vmatprep.mubr.f32.mxu1 %v4605_v47  ;;  %v8549_v30 = vcombine.low %v8514_v28, %v8542_v54  ;;  %v8545_v14 = vcombine.low %v14485_v17, %v14496_v6  ;;  %v11540_v15 = vpack.c.bf16 %v14438_v21, %v14433_v0 }
 0x2c4   :  { %v10605_v52 = vld [vmem:[%s15611_s5 + $0x235] ss:$8 sm:$0xf]  ;;  %v4904_v50 = vor.u32 %v10596_v7, %v10595_v23  ;;  %v4908_v5 = vor.u32 %v10598_v31, %v10597_v38  ;;  %v4912_v13 = vor.u32 %v10600_v25, %v10599_v44  ;;  %v4916_v43 = vor.u32 %v10602_v40, %v10601_v19 }
 0x2c5   :  { %v10607_v58 = vld [vmem:[%s15611_s5 + $0x2a5] ss:$8 sm:$0xf]  ;;  %v4920_v26 = vor.u32 %v10604_v61, %v10603_v48  ;;  %v4924_v4 = vor.u32 %v10606_v35, %v10605_v52  ;;  %4825 = vmatmul.mubr.f32.vlgmr.msra.gmra.mrb[0].mxu1 %v4601_v20  ;;  %v8546_v3 = vcombine.high %v14485_v17, %v14496_v6 }
 0x2c6   :  { %v10608_v24 = vld [vmem:[%s15611_s5 + $0x2a5] ss:$8 sm:$0x70]  ;;  %v14561_v31 = vmax.f32 %v4904_v50, 0.0  ;;  %v14563_v28 = vmax.f32 %v4908_v5, 0.0  ;;  %v14580_v25 = vmax.f32 %v4916_v43, 0.0  ;;  %11409 = vmatpush3.bf16.xpose.msk.msra.mxu1 %vm12896_vm10, %v11407_v10  ;;  %11106 = vmatprep.mubr.msk.f32.mxu1 %vm11752_vm11, %v11753_v59 }
 0x2c7   :  { %v10609_v39 = vld [vmem:[%s15611_s5 + $0x315] ss:$8 sm:$0xf]  ;;  %v4928_v45 = vor.u32 %v10608_v24, %v10607_v58  ;;  %v14582_v19 = vmax.f32 %v4920_v26, 0.0  ;;  %v14584_v40 = vmax.f32 %v4924_v4, 0.0  ;;  %11411 = vmatprep.subr.bf16.mxu1 %v11410_v41 }
 0x2c8   :  { %v10610_v12 = vld [vmem:[%s15611_s5 + $0x315] ss:$8 sm:$0x70]  ;;  %v14520_v42 = vld [vmem:[%s15609_s3 + $0x248] sm:$0xff]  ;;  %v4964_v47 = vcombine.low %v14561_v31, %v14563_v28 }
 0x2c9   :  { %v14525_v27 = vld [vmem:[%s15609_s3 + $0x280] sm:$0xff]  ;;  %v10862_v62 = vld [vmem:[%s15611_s5 + $0xad] ss:$8 sm:$0x70]  ;;  %8699 = vmatmul.mubr.f32.vlgmr.msra.gmra.mrb[0].mxu0 %v8544_v2  ;;  %v4932_v2 = vor.u32 %v10610_v12, %v10609_v39  ;;  %v14593_v61 = vmax.f32 %v4928_v45, 0.0  ;;  %v4968_v58 = vcombine.low %v14582_v19, %v14584_v40 }
 0x2ca   :  { %v10859_v46 = vld [vmem:[%s15611_s5 + $0x3d] ss:$8 sm:$0xf]  ;;  %11533 = vmatpush1.bf16.xpose.msra.mxu0 %v11532_v16  ;;  %8768 = vmatprep.mubr.f32.mxu0 %v8549_v30  ;;  %v14578_v16 = vmax.f32 %v4912_v13, 0.0  ;;  %v11414_v54 = vpack.c.bf16 %v14525_v27, %v14520_v42  ;;  %v4978_v41 = vrot.slane %v4964_v47, %v12478_v18 }
 0x2cb   :  { %v10860_v53 = vld [vmem:[%s15611_s5 + $0x3d] ss:$8 sm:$0x70]  ;;  %11534 = vmatprep.subr.bf16.mxu0 %v15621_v49  ;;  %v14595_v52 = vmax.f32 %v4932_v2, 0.0  ;;  %v5006_v5 = vrot.slane %v4968_v58, %v12478_v18  ;;  %v10623_v17 = vld [vmem:[%s15609_s3 + $0x290] sm:$0xff] }
 0x2cc   :  { %v10861_v33 = vld [vmem:[%s15611_s5 + $0xad] ss:$8 sm:$0xf]  ;;  %v4966_v10 = vcombine.low %v14578_v16, %v14580_v25  ;;  %v8848_v20 = vor.u32 %v10860_v53, %v10859_v46 }
 0x2cd   :  { %v10863_v23 = vld [vmem:[%s15611_s5 + $0x11d] ss:$8 sm:$0xf]  ;;  %v8852_v24 = vor.u32 %v10862_v62, %v10861_v33  ;;  %v4970_v12 = vcombine.low %v14593_v61, %v14595_v52  ;;  %11107 = vmatmul.mubr.msk.f32.vlgmr.msra.gmra.mrb[0].mxu1 %vm2420_vm9, %v4602_v36 }
 0x2ce   :  { %v10864_v7 = vld [vmem:[%s15611_s5 + $0x11d] ss:$8 sm:$0x70]  ;;  %v4992_v50 = vrot.slane %v4966_v10, %v12478_v18  ;;  %v14620_v43 = vmax.f32 %v8848_v20, 0.0  ;;  %11413 = vmatpush1.bf16.xpose.msra.mxu1 %v11412_v34  ;;  %v14705_v58 = vld [vmem:[%s15609_s3 + $0x250] sm:$0xff] }
 0x2cf   :  { %v10865_v38 = vld [vmem:[%s15611_s5 + $0x18d] ss:$8 sm:$0xf]  ;;  %v8856_v42 = vor.u32 %v10864_v7, %v10863_v23  ;;  %v5020_v33 = vrot.slane %v4970_v12, %v12478_v18  ;;  %v14622_v4 = vmax.f32 %v8852_v24, 0.0  ;;  %11415 = vmatprep.subr.bf16.mxu1 %v11414_v54 }
 0x2d0   :  { %v10866_v63 = vld [vmem:[%s15611_s5 + $0x18d] ss:$8 sm:$0x70]  ;;  %v5029_v26 = vcombine.high %v4978_v41, %v4992_v50  ;;  %v5028_v29 = vcombine.low %v4978_v41, %v4992_v50  ;;  %v10613_v36 = vld [vmem:[%s15609_s3 + $0x240] sm:$0xff] }
 0x2d1   :  { %v10867_v11 = vld [vmem:[%s15611_s5 + $0x1fd] ss:$8 sm:$0xf]  ;;  %v8860_v27 = vor.u32 %v10866_v63, %v10865_v38  ;;  %8769 = vmatmul.mubr.f32.vlgmr.msra.gmra.mrb[0].mxu0 %v8545_v14  ;;  %v14624_v45 = vmax.f32 %v8856_v42, 0.0  ;;  %v5033_v7 = vcombine.high %v5006_v5, %v5020_v33  ;;  %v5032_v51 = vcombine.low %v5006_v5, %v5020_v33 }
 0x2d2   :  { %v10868_v44 = vld [vmem:[%s15611_s5 + $0x1fd] ss:$8 sm:$0x70]  ;;  %11537 = vmatpush3.bf16.xpose.msk.msra.mxu0 %vm12896_vm10, %v11535_v60  ;;  %11162 = vmatprep.mubr.msk.f32.mxu0 %vm11752_vm11, %v11753_v59  ;;  %v5056_v1 = vrot.slane %v5029_v26, %v12478_v18  ;;  %v8908_v60 = vcombine.low %v14620_v43, %v14622_v4  ;;  %v14687_v47 = vrot.slane %v5028_v29, %v12478_v18  ;;  %v14721_v42 = vld [vmem:[%s15609_s3 + $0x610] sm:$0xff] }
 0x2d3   :  { %v10869_v56 = vld [vmem:[%s15611_s5 + $0x26d] ss:$8 sm:$0xf]  ;;  %v8864_v46 = vor.u32 %v10868_v44, %v10867_v11  ;;  %v14626_v23 = vmax.f32 %v8860_v27, 0.0  ;;  %11539 = vmatprep.subr.bf16.mxu0 %v11538_v55  ;;  %v5084_v37 = vrot.slane %v5033_v7, %v12478_v18  ;;  %v14690_v54 = vrot.slane %v5032_v51, %v12478_v18 }
 0x2d4   :  { %v10870_v57 = vld [vmem:[%s15611_s5 + $0x26d] ss:$8 sm:$0x70]  ;;  %v10885_v32 = vld [vmem:[%s15609_s3 + $0x600] sm:$0xff]  ;;  %v8922_v11 = vrot.slane %v8908_v60, %v12478_v18  ;;  %v4969_v29 = vcombine.high %v14582_v19, %v14584_v40  ;;  %v4971_v51 = vcombine.high %v14593_v61, %v14595_v52  ;;  %v8909_v19 = vcombine.high %v14620_v43, %v14622_v4 }
 0x2d5   :  { %v10871_v48 = vld [vmem:[%s15611_s5 + $0x2dd] ss:$8 sm:$0xf]  ;;  %v8868_v53 = vor.u32 %v10870_v57, %v10869_v56  ;;  %v14635_v38 = vmax.f32 %v8864_v46, 0.0  ;;  %v8910_v2 = vcombine.low %v14624_v45, %v14626_v23  ;;  %v5096_v6 = vcombine.low %v5056_v1, %v5084_v37 }
 0x2d6   :  { %v10872_v35 = vld [vmem:[%s15611_s5 + $0x2dd] ss:$8 sm:$0x70]  ;;  %v5092_v27 = vcombine.low %v14687_v47, %v14690_v54  ;;  %v5097_v5 = vcombine.high %v5056_v1, %v5084_v37  ;;  %v5093_v7 = vcombine.high %v14687_v47, %v14690_v54  ;;  %v4965_v37 = vcombine.high %v14561_v31, %v14563_v28 }
 0x2d7   :  { %v10873_v39 = vld [vmem:[%s15611_s5 + $0x34d] ss:$8 sm:$0xf]  ;;  %v8872_v62 = vor.u32 %v10872_v35, %v10871_v48  ;;  %v14637_v14 = vmax.f32 %v8868_v53, 0.0  ;;  %v8936_v44 = vrot.slane %v8910_v2, %v12478_v18  ;;  %5177 = vmatprep.mubr.f32.mxu1 %v5096_v6  ;;  %v8911_v40 = vcombine.high %v14624_v45, %v14626_v23 }
 0x2d8   :  { %v10874_v30 = vld [vmem:[%s15611_s5 + $0x34d] ss:$8 sm:$0x70]  ;;  %v14695_v35 = vld [vmem:[%s15609_s3 + $0x5c0] sm:$0xff]  ;;  %5178 = vmatmul.mubr.f32.vlgmr.msra.gmra.mrb[0].mxu1 %v5092_v27  ;;  %v4985_v28 = vrot.slane %v4965_v37, %v12478_v18  ;;  %v8929_v4 = vrot.slane %v8909_v19, %v12478_v18 }
 0x2d9   :  { %v8876_v13 = vor.u32 %v10874_v30, %v10873_v39  ;;  %v14639_v63 = vmax.f32 %v8872_v62, 0.0  ;;  %v8912_v22 = vcombine.low %v14635_v38, %v14637_v14  ;;  %v10878_v55 = vld [vmem:[%s15609_s3 + $0x5c8] sm:$0xff]  ;;  %v10620_v56 = vld [vmem:[%s15609_s3 + $0x278] sm:$0xff]  ;;  %v8973_v24 = vcombine.high %v8922_v11, %v8936_v44  ;;  %11163 = vmatmul.mubr.msk.f32.vlgmr.msra.gmra.mrb[0].mxu0 %vm2420_vm9, %v8546_v3  ;;  %v14744_v2 = vld [vmem:[%s15609_s3 + $0x5d0] sm:$0xff]  ;;  %5247 = vmatprep.mubr.f32.mxu1 %v5097_v5 }
 0x2da   :  { %v10616_v57 = vld [vmem:[%s15609_s3 + $0x258] sm:$0xff]  ;;  %v8972_v39 = vcombine.low %v8922_v11, %v8936_v44  ;;  %v11542_v30 = vpack.c.bf16 %v10885_v32, %v10878_v55  ;;  %v14711_v12 = vld [vmem:[%s15609_s3 + $0x288] sm:$0xff]  ;;  %v11416_v50 = vpack.c.bf16 %v10620_v56, %v10613_v36  ;;  %11541 = vmatpush1.bf16.xpose.msra.mxu0 %v11540_v15  ;;  %v8913_v61 = vcombine.high %v14635_v38, %v14637_v14  ;;  %v14796_v14 = vld [vmem:[%s15609_s3 + $0x5e0] sm:$0xff] }
 0x2db   :  { %v14649_v9 = vmax.f32 %v8876_v13, 0.0  ;;  %v8950_v48 = vrot.slane %v8912_v22, %v12478_v18  ;;  %v14700_v10 = vld [vmem:[%s15609_s3 + $0x5f8] sm:$0xff]  ;;  %v11418_v46 = vpack.c.bf16 %v10623_v17, %v10616_v57  ;;  %v9000_v33 = vrot.slane %v8973_v24, %v12478_v18  ;;  %v14749_v0 = vld [vmem:[%s15609_s3 + $0x608] sm:$0xff]  ;;  %v14782_v57 = vld [vmem:[%s15609_s3 + $0x260] sm:$0xff] }
 0x2dc   :  { %v14716_v41 = vld [vmem:[%s15609_s3 + $0x5d8] sm:$0xff]  ;;  %v14728_v13 = vrot.slane %v8972_v39, %v12478_v18  ;;  %v11544_v26 = vpack.c.bf16 %v14700_v10, %v14695_v35  ;;  %v11420_v1 = vpack.c.bf16 %v14711_v12, %v14705_v58  ;;  %11543 = vmatprep.subr.bf16.mxu0 %v11542_v30  ;;  %11417 = vmatpush1.bf16.xpose.msra.mxu1 %v11416_v50  ;;  %v14811_v17 = vld [vmem:[%s15609_s3 + $0x2e0] sm:$0xff]  ;;  %v14831_v10 = vld [vmem:[%s15609_s3 + $0x628] sm:$0xff] }
 0x2dd   :  { %v8914_v34 = vcombine.low %v14639_v63, %v14649_v9  ;;  %v11546_v60 = vpack.c.bf16 %v14721_v42, %v14716_v41  ;;  %v4967_v22 = vcombine.high %v14578_v16, %v14580_v25  ;;  %11419 = vmatprep.subr.bf16.mxu1 %v11418_v46  ;;  %v11548_v31 = vpack.c.bf16 %v14749_v0, %v14744_v2  ;;  %v14787_v43 = vld [vmem:[%s15609_s3 + $0x298] sm:$0xff]  ;;  %v14821_v54 = vld [vmem:[%s15609_s3 + $0x2a0] sm:$0xff] }
 0x2de   :  { %v5013_v16 = vrot.slane %v4969_v29, %v12478_v18  ;;  %v5027_v25 = vrot.slane %v4971_v51, %v12478_v18  ;;  %v8915_v52 = vcombine.high %v14639_v63, %v14649_v9  ;;  %v8943_v45 = vrot.slane %v8911_v40, %v12478_v18  ;;  %v14801_v63 = vld [vmem:[%s15609_s3 + $0x618] sm:$0xff]  ;;  %v14806_v9 = vld [vmem:[%s15609_s3 + $0x2a8] sm:$0xff]  ;;  %v14836_v58 = vld [vmem:[%s15609_s3 + $0x660] sm:$0xff] }
 0x2df   :  { %v8964_v20 = vrot.slane %v8914_v34, %v12478_v18  ;;  %v4999_v3 = vrot.slane %v4967_v22, %v12478_v18  ;;  %v8957_v23 = vrot.slane %v8913_v61, %v12478_v18  ;;  %v14826_v35 = vld [vmem:[%s15609_s3 + $0x2d8] sm:$0xff]  ;;  %v14844_v30 = vld [vmem:[%s15609_s3 + $0x620] sm:$0xff]  ;;  %v11423_v29 = vpack.c.bf16 %v14787_v43, %v14782_v57 }
 0x2e0   :  { %v5035_v11 = vcombine.high %v5013_v16, %v5027_v25  ;;  %v5034_v56 = vcombine.low %v5013_v16, %v5027_v25  ;;  %v8971_v38 = vrot.slane %v8915_v52, %v12478_v18  ;;  %v14849_v12 = vld [vmem:[%s15609_s3 + $0x658] sm:$0xff]  ;;  %v10629_v42 = vld [vmem:[%s15611_s5 + $0x6] ss:$8 sm:$0x70]  ;;  %v11428_v61 = vpack.c.bf16 %v14826_v35, %v14821_v54 }
 0x2e1   :  { %v8977_v53 = vcombine.high %v8950_v48, %v8964_v20  ;;  %v8976_v62 = vcombine.low %v8950_v48, %v8964_v20  ;;  %v5031_v34 = vcombine.high %v4985_v28, %v4999_v3  ;;  %v5030_v44 = vcombine.low %v4985_v28, %v4999_v3  ;;  %v10628_v41 = vld [vmem:[%s15611_s5 + $0x6] ss:$8 sm:$0xf] }
 0x2e2   :  { %v5091_v48 = vrot.slane %v5035_v11, %v12478_v18  ;;  %v8975_v20 = vcombine.high %v8929_v4, %v8943_v45  ;;  %v8979_v24 = vcombine.high %v8957_v23, %v8971_v38  ;;  %v14839_v39 = vrot.slane %v5034_v56, %v12478_v18  ;;  %v10630_v27 = vld [vmem:[%s15611_s5 + $0x76] ss:$8 sm:$0xf] }
 0x2e3   :  { %v9028_v21 = vrot.slane %v8977_v53, %v12478_v18  ;;  %v14753_v15 = vrot.slane %v8976_v62, %v12478_v18  ;;  %v5063_v6 = vrot.slane %v5031_v34, %v12478_v18  ;;  %v14816_v47 = vrot.slane %v5030_v44, %v12478_v18  ;;  %5248 = vmatmul.mubr.f32.vlgmr.msra.gmra.mrb[0].mxu1 %v5093_v7  ;;  %v10631_v50 = vld [vmem:[%s15611_s5 + $0x76] ss:$8 sm:$0x70] }
 0x2e4   :  { %11421 = vmatpush1.bf16.xpose.msra.mxu1 %v11420_v1  ;;  %v8974_v53 = vcombine.low %v8929_v4, %v8943_v45  ;;  %v10632_v62 = vld [vmem:[%s15611_s5 + $0xe6] ss:$8 sm:$0xf]  ;;  %v9035_v37 = vrot.slane %v8979_v24, %v12478_v18  ;;  %v11551_v28 = vpack.c.bf16 %v14801_v63, %v14796_v14  ;;  %v11426_v3 = vpack.c.bf16 %v14811_v17, %v14806_v9 }
 0x2e5   :  { %v9040_v36 = vcombine.low %v9000_v33, %v9028_v21  ;;  %v9036_v55 = vcombine.low %v14728_v13, %v14753_v15  ;;  %v9041_v32 = vcombine.high %v9000_v33, %v9028_v21  ;;  %v9037_v5 = vcombine.high %v14728_v13, %v14753_v15  ;;  %v10634_v7 = vld [vmem:[%s15611_s5 + $0x156] ss:$8 sm:$0xf]  ;;  %11422 = vmatprep.subr.bf16.mxu1 %v15621_v49 }
 0x2e6   :  { %v5098_v46 = vcombine.low %v5063_v6, %v5091_v48  ;;  %v8978_v33 = vcombine.low %v8957_v23, %v8971_v38  ;;  %v10635_v1 = vld [vmem:[%s15611_s5 + $0x156] ss:$8 sm:$0x70]  ;;  %v9007_v15 = vrot.slane %v8975_v20, %v12478_v18  ;;  %v5094_v22 = vcombine.low %v14816_v47, %v14839_v39 }
 0x2e7   :  { %9121 = vmatprep.mubr.f32.mxu0 %v9040_v36  ;;  %v10636_v13 = vld [vmem:[%s15611_s5 + $0x1c6] ss:$8 sm:$0xf]  ;;  %v5095_v40 = vcombine.high %v14816_v47, %v14839_v39  ;;  %v11554_v52 = vpack.c.bf16 %v14836_v58, %v14831_v10  ;;  %v11556_v57 = vpack.c.bf16 %v14849_v12, %v14844_v30  ;;  %v5397_v43 = vor.u32 %v10629_v42, %v10628_v41 }
 0x2e8   :  { %9122 = vmatmul.mubr.f32.vlgmr.msra.gmra.mrb[0].mxu0 %v9036_v55  ;;  %v10638_v21 = vld [vmem:[%s15611_s5 + $0x236] ss:$8 sm:$0xf]  ;;  %5317 = vmatprep.mubr.f32.mxu1 %v5098_v46  ;;  %v14900_v55 = vrot.slane %v8974_v53, %v12478_v18  ;;  %v9042_v19 = vcombine.low %v9007_v15, %v9035_v37  ;;  %v5401_v4 = vor.u32 %v10631_v50, %v10630_v27 }
 0x2e9   :  { %11545 = vmatpush1.bf16.xpose.msra.mxu0 %v11544_v26  ;;  %9191 = vmatprep.mubr.f32.mxu0 %v9041_v32  ;;  %v10633_v26 = vld [vmem:[%s15611_s5 + $0xe6] ss:$8 sm:$0x70]  ;;  %v14903_v32 = vrot.slane %v8978_v33, %v12478_v18  ;;  %v14927_v11 = vld [vmem:[%s15609_s3 + $0x2b8] sm:$0xff]  ;;  %v5409_v6 = vor.u32 %v10635_v1, %v10634_v7  ;;  %v14965_v46 = vmax.f32 %v5397_v43, 0.0 }
 0x2ea   :  { %11547 = vmatprep.subr.bf16.mxu0 %v11546_v60  ;;  %v10637_v60 = vld [vmem:[%s15611_s5 + $0x1c6] ss:$8 sm:$0x70]  ;;  %v5405_v17 = vor.u32 %v10633_v26, %v10632_v62  ;;  %v14967_v53 = vmax.f32 %v5401_v4, 0.0  ;;  %v15153_v30 = vld [vmem:[%s15609_s3 + $0x678] sm:$0xff] }
 0x2eb   :  { %v10639_v51 = vld [vmem:[%s15611_s5 + $0x236] ss:$8 sm:$0x70]  ;;  %v9038_v56 = vcombine.low %v14900_v55, %v14903_v32  ;;  %v5413_v48 = vor.u32 %v10637_v60, %v10636_v13  ;;  %5318 = vmatmul.mubr.f32.vlgmr.msra.gmra.mrb[0].mxu1 %v5094_v22  ;;  %v14984_v26 = vmax.f32 %v5409_v6, 0.0  ;;  %v9039_v35 = vcombine.high %v14900_v55, %v14903_v32 }
 0x2ec   :  { %v10640_v36 = vld [vmem:[%s15611_s5 + $0x2a6] ss:$8 sm:$0xf]  ;;  %v5417_v20 = vor.u32 %v10639_v51, %v10638_v21  ;;  %11425 = vmatpush3.bf16.xpose.msk.msra.mxu1 %vm12896_vm10, %v11423_v29  ;;  %11113 = vmatprep.mubr.msk.f32.mxu1 %vm11752_vm11, %v11753_v59  ;;  %v5457_v15 = vcombine.low %v14965_v46, %v14967_v53 }
 0x2ed   :  { %v10641_v16 = vld [vmem:[%s15611_s5 + $0x2a6] ss:$8 sm:$0x70]  ;;  %v14986_v7 = vmax.f32 %v5413_v48, 0.0  ;;  %11427 = vmatprep.subr.bf16.mxu1 %v11426_v3 }
 0x2ee   :  { %v10642_v25 = vld [vmem:[%s15611_s5 + $0x316] ss:$8 sm:$0xf]  ;;  %v5421_v50 = vor.u32 %v10641_v16, %v10640_v36  ;;  %v14988_v1 = vmax.f32 %v5417_v20, 0.0  ;;  %v5471_v3 = vrot.slane %v5457_v15, %v12478_v18 }
 0x2ef   :  { %v10643_v34 = vld [vmem:[%s15611_s5 + $0x316] ss:$8 sm:$0x70] }
 0x2f0   :  { %v14932_v44 = vld [vmem:[%s15609_s3 + $0x2f0] sm:$0xff]  ;;  %v10893_v23 = vld [vmem:[%s15611_s5 + $0x3e] ss:$8 sm:$0x70]  ;;  %9192 = vmatmul.mubr.f32.vlgmr.msra.gmra.mrb[0].mxu0 %v9037_v5  ;;  %v5425_v5 = vor.u32 %v10643_v34, %v10642_v25  ;;  %v14997_v60 = vmax.f32 %v5421_v50, 0.0  ;;  %v5461_v51 = vcombine.low %v14986_v7, %v14988_v1 }
 0x2f1   :  { %v10892_v45 = vld [vmem:[%s15611_s5 + $0x3e] ss:$8 sm:$0xf]  ;;  %11549 = vmatpush1.bf16.xpose.msra.mxu0 %v11548_v31  ;;  %9261 = vmatprep.mubr.f32.mxu0 %v9042_v19  ;;  %v14982_v31 = vmax.f32 %v5405_v17, 0.0  ;;  %v11430_v37 = vpack.c.bf16 %v14932_v44, %v14927_v11 }
 0x2f2   :  { %v10894_v38 = vld [vmem:[%s15611_s5 + $0xae] ss:$8 sm:$0xf]  ;;  %11550 = vmatprep.subr.bf16.mxu0 %v15621_v49  ;;  %v14999_v21 = vmax.f32 %v5425_v5, 0.0  ;;  %v9341_v36 = vor.u32 %v10893_v23, %v10892_v45  ;;  %v5499_v4 = vrot.slane %v5461_v51, %v12478_v18 }
 0x2f3   :  { %v10895_v9 = vld [vmem:[%s15611_s5 + $0xae] ss:$8 sm:$0x70]  ;;  %v5459_v29 = vcombine.low %v14982_v31, %v14984_v26  ;;  %11114 = vmatmul.mubr.msk.f32.vlgmr.msra.gmra.mrb[0].mxu1 %vm2420_vm9, %v5095_v40  ;;  %v10656_v55 = vld [vmem:[%s15609_s3 + $0x300] sm:$0xff] }
 0x2f4   :  { %v10896_v24 = vld [vmem:[%s15611_s5 + $0x11e] ss:$8 sm:$0xf]  ;;  %v9345_v16 = vor.u32 %v10895_v9, %v10894_v38  ;;  %v5463_v34 = vcombine.low %v14997_v60, %v14999_v21  ;;  %v15024_v6 = vmax.f32 %v9341_v36, 0.0  ;;  %11429 = vmatpush1.bf16.xpose.msra.mxu1 %v11428_v61 }
 0x2f5   :  { %v10897_v41 = vld [vmem:[%s15611_s5 + $0x11e] ss:$8 sm:$0x70]  ;;  %v5485_v43 = vrot.slane %v5459_v29, %v12478_v18  ;;  %v10646_v40 = vld [vmem:[%s15609_s3 + $0x2b0] sm:$0xff]  ;;  %11431 = vmatprep.subr.bf16.mxu1 %v11430_v37 }
 0x2f6   :  { %v10898_v42 = vld [vmem:[%s15611_s5 + $0x18e] ss:$8 sm:$0xf]  ;;  %v9349_v11 = vor.u32 %v10897_v41, %v10896_v24  ;;  %v5513_v38 = vrot.slane %v5463_v34, %v12478_v18  ;;  %v15026_v20 = vmax.f32 %v9345_v16, 0.0 }
 0x2f7   :  { %v10899_v27 = vld [vmem:[%s15611_s5 + $0x18e] ss:$8 sm:$0x70]  ;;  %v5522_v48 = vcombine.high %v5471_v3, %v5485_v43  ;;  %v5521_v58 = vcombine.low %v5471_v3, %v5485_v43  ;;  %v15109_v51 = vld [vmem:[%s15609_s3 + $0x2c0] sm:$0xff] }
 0x2f8   :  { %v10900_v33 = vld [vmem:[%s15611_s5 + $0x1fe] ss:$8 sm:$0xf]  ;;  %v9353_v44 = vor.u32 %v10899_v27, %v10898_v42  ;;  %9262 = vmatmul.mubr.f32.vlgmr.msra.gmra.mrb[0].mxu0 %v9038_v56  ;;  %v15028_v50 = vmax.f32 %v9349_v11, 0.0  ;;  %v5526_v41 = vcombine.high %v5499_v4, %v5513_v38  ;;  %v5525_v39 = vcombine.low %v5499_v4, %v5513_v38 }
 0x2f9   :  { %v10901_v62 = vld [vmem:[%s15611_s5 + $0x1fe] ss:$8 sm:$0x70]  ;;  %11553 = vmatpush3.bf16.xpose.msk.msra.mxu0 %vm12896_vm10, %v11551_v28  ;;  %11169 = vmatprep.mubr.msk.f32.mxu0 %vm11752_vm11, %v11753_v59  ;;  %v5549_v14 = vrot.slane %v5522_v48, %v12478_v18  ;;  %v9401_v28 = vcombine.low %v15024_v6, %v15026_v20  ;;  %v10918_v54 = vld [vmem:[%s15609_s3 + $0x670] sm:$0xff]  ;;  %v15091_v15 = vrot.slane %v5521_v58, %v12478_v18 }
 0x2fa   :  { %v10902_v2 = vld [vmem:[%s15611_s5 + $0x26e] ss:$8 sm:$0xf]  ;;  %v9357_v45 = vor.u32 %v10901_v62, %v10900_v33  ;;  %v15030_v24 = vmax.f32 %v9353_v44, 0.0  ;;  %11555 = vmatprep.subr.bf16.mxu0 %v11554_v52  ;;  %v5577_v47 = vrot.slane %v5526_v41, %v12478_v18  ;;  %v15094_v37 = vrot.slane %v5525_v39, %v12478_v18 }
 0x2fb   :  { %v10903_v0 = vld [vmem:[%s15611_s5 + $0x26e] ss:$8 sm:$0x70]  ;;  %v9415_v33 = vrot.slane %v9401_v28, %v12478_v18  ;;  %v15125_v11 = vld [vmem:[%s15609_s3 + $0x680] sm:$0xff]  ;;  %v5462_v58 = vcombine.high %v14986_v7, %v14988_v1  ;;  %v5464_v39 = vcombine.high %v14997_v60, %v14999_v21  ;;  %v9402_v7 = vcombine.high %v15024_v6, %v15026_v20 }
 0x2fc   :  { %v10904_v13 = vld [vmem:[%s15611_s5 + $0x2de] ss:$8 sm:$0xf]  ;;  %v9361_v23 = vor.u32 %v10903_v0, %v10902_v2  ;;  %v15039_v42 = vmax.f32 %v9357_v45, 0.0  ;;  %v9403_v5 = vcombine.low %v15028_v50, %v15030_v24  ;;  %v5589_v32 = vcombine.low %v5549_v14, %v5577_v47 }
 0x2fd   :  { %v10905_v22 = vld [vmem:[%s15611_s5 + $0x2de] ss:$8 sm:$0x70]  ;;  %v5585_v44 = vcombine.low %v15091_v15, %v15094_v37  ;;  %v5590_v4 = vcombine.high %v5549_v14, %v5577_v47  ;;  %v5586_v41 = vcombine.high %v15091_v15, %v15094_v37  ;;  %v5458_v47 = vcombine.high %v14965_v46, %v14967_v53  ;;  %v15225_v37 = vld [vmem:[%s15609_s3 + $0x310] sm:$0xff] }
 0x2fe   :  { %v10906_v25 = vld [vmem:[%s15611_s5 + $0x34e] ss:$8 sm:$0xf]  ;;  %v9365_v9 = vor.u32 %v10905_v22, %v10904_v13  ;;  %v15041_v56 = vmax.f32 %v9361_v23, 0.0  ;;  %v9429_v62 = vrot.slane %v9403_v5, %v12478_v18  ;;  %5670 = vmatprep.mubr.f32.mxu1 %v5589_v32  ;;  %v9404_v1 = vcombine.high %v15028_v50, %v15030_v24 }
 0x2ff   :  { %v10907_v19 = vld [vmem:[%s15611_s5 + $0x34e] ss:$8 sm:$0x70]  ;;  %v15148_v5 = vld [vmem:[%s15609_s3 + $0x640] sm:$0xff]  ;;  %5671 = vmatmul.mubr.f32.vlgmr.msra.gmra.mrb[0].mxu1 %v5585_v44  ;;  %v5478_v53 = vrot.slane %v5458_v47, %v12478_v18  ;;  %v9422_v20 = vrot.slane %v9402_v7, %v12478_v18 }
 0x300   :  { %v9369_v17 = vor.u32 %v10907_v19, %v10906_v25  ;;  %v15043_v27 = vmax.f32 %v9365_v9, 0.0  ;;  %v9405_v10 = vcombine.low %v15039_v42, %v15041_v56  ;;  %v10911_v52 = vld [vmem:[%s15609_s3 + $0x638] sm:$0xff]  ;;  %v10653_v2 = vld [vmem:[%s15609_s3 + $0x2e8] sm:$0xff]  ;;  %v15099_v22 = vld [vmem:[%s15609_s3 + $0x630] sm:$0xff]  ;;  %v9466_v16 = vcombine.high %v9415_v33, %v9429_v62  ;;  %11170 = vmatmul.mubr.msk.f32.vlgmr.msra.gmra.mrb[0].mxu0 %vm2420_vm9, %v9039_v35  ;;  %5740 = vmatprep.mubr.f32.mxu1 %v5590_v4 }
 0x301   :  { %v10649_v0 = vld [vmem:[%s15609_s3 + $0x2c8] sm:$0xff]  ;;  %v9465_v25 = vcombine.low %v9415_v33, %v9429_v62  ;;  %v11558_v19 = vpack.c.bf16 %v10918_v54, %v10911_v52  ;;  %v15115_v34 = vld [vmem:[%s15609_s3 + $0x2f8] sm:$0xff]  ;;  %v11432_v43 = vpack.c.bf16 %v10653_v2, %v10646_v40  ;;  %11557 = vmatpush1.bf16.xpose.msra.mxu0 %v11556_v57  ;;  %v11564_v46 = vpack.c.bf16 %v15153_v30, %v15148_v5 }
 0x302   :  { %v15053_v63 = vmax.f32 %v9369_v17, 0.0  ;;  %v9443_v13 = vrot.slane %v9405_v10, %v12478_v18  ;;  %v15104_v29 = vld [vmem:[%s15609_s3 + $0x668] sm:$0xff]  ;;  %v11434_v45 = vpack.c.bf16 %v10656_v55, %v10649_v0  ;;  %v9493_v38 = vrot.slane %v9466_v16, %v12478_v18  ;;  %v15186_v0 = vld [vmem:[%s15609_s3 + $0x2d0] sm:$0xff] }
 0x303   :  { %v15120_v3 = vld [vmem:[%s15609_s3 + $0x648] sm:$0xff]  ;;  %v15132_v17 = vrot.slane %v9465_v25, %v12478_v18  ;;  %v11560_v48 = vpack.c.bf16 %v15104_v29, %v15099_v22  ;;  %v11436_v14 = vpack.c.bf16 %v15115_v34, %v15109_v51  ;;  %11559 = vmatprep.subr.bf16.mxu0 %v11558_v19  ;;  %11433 = vmatpush1.bf16.xpose.msra.mxu1 %v11432_v43  ;;  %v15215_v55 = vld [vmem:[%s15609_s3 + $0x350] sm:$0xff]  ;;  %v15235_v29 = vld [vmem:[%s15609_s3 + $0x698] sm:$0xff] }
 0x304   :  { %v9407_v61 = vcombine.low %v15043_v27, %v15053_v63  ;;  %v11562_v28 = vpack.c.bf16 %v15125_v11, %v15120_v3  ;;  %v5460_v10 = vcombine.high %v14982_v31, %v14984_v26  ;;  %11435 = vmatprep.subr.bf16.mxu1 %v11434_v45  ;;  %v5506_v31 = vrot.slane %v5462_v58, %v12478_v18  ;;  %v15191_v6 = vld [vmem:[%s15609_s3 + $0x308] sm:$0xff]  ;;  %v15240_v51 = vld [vmem:[%s15609_s3 + $0x6d0] sm:$0xff] }
 0x305   :  { %v5520_v26 = vrot.slane %v5464_v39, %v12478_v18  ;;  %v9406_v60 = vcombine.high %v15039_v42, %v15041_v56  ;;  %v9408_v21 = vcombine.high %v15043_v27, %v15053_v63  ;;  %v9436_v50 = vrot.slane %v9404_v1, %v12478_v18  ;;  %v15200_v56 = vld [vmem:[%s15609_s3 + $0x650] sm:$0xff]  ;;  %v15205_v27 = vld [vmem:[%s15609_s3 + $0x688] sm:$0xff]  ;;  %v15210_v63 = vld [vmem:[%s15609_s3 + $0x318] sm:$0xff] }
 0x306   :  { %v9457_v36 = vrot.slane %v9407_v61, %v12478_v18  ;;  %v5492_v35 = vrot.slane %v5460_v10, %v12478_v18  ;;  %v15230_v22 = vld [vmem:[%s15609_s3 + $0x348] sm:$0xff]  ;;  %v15248_v19 = vld [vmem:[%s15609_s3 + $0x690] sm:$0xff]  ;;  %v11439_v58 = vpack.c.bf16 %v15191_v6, %v15186_v0 }
 0x307   :  { %v5528_v33 = vcombine.high %v5506_v31, %v5520_v26  ;;  %v5527_v2 = vcombine.low %v5506_v31, %v5520_v26  ;;  %v9450_v24 = vrot.slane %v9406_v60, %v12478_v18  ;;  %v9464_v42 = vrot.slane %v9408_v21, %v12478_v18  ;;  %v15253_v34 = vld [vmem:[%s15609_s3 + $0x6c8] sm:$0xff]  ;;  %v10664_v43 = vld [vmem:[%s15611_s5 + $0x77] ss:$8 sm:$0x70] }
 0x308   :  { %v9470_v23 = vcombine.high %v9443_v13, %v9457_v36  ;;  %v9469_v9 = vcombine.low %v9443_v13, %v9457_v36  ;;  %v5524_v61 = vcombine.high %v5478_v53, %v5492_v35  ;;  %v5523_v62 = vcombine.low %v5478_v53, %v5492_v35  ;;  %v10661_v3 = vld [vmem:[%s15611_s5 + $0x7] ss:$8 sm:$0xf] }
 0x309   :  { %v5584_v13 = vrot.slane %v5528_v33, %v12478_v18  ;;  %v9468_v36 = vcombine.high %v9422_v20, %v9436_v50  ;;  %v9472_v16 = vcombine.high %v9450_v24, %v9464_v42  ;;  %v15243_v25 = vrot.slane %v5527_v2, %v12478_v18  ;;  %v10662_v11 = vld [vmem:[%s15611_s5 + $0x7] ss:$8 sm:$0x70] }
 0x30a   :  { %v9521_v12 = vrot.slane %v9470_v23, %v12478_v18  ;;  %v15157_v57 = vrot.slane %v9469_v9, %v12478_v18  ;;  %v5556_v32 = vrot.slane %v5524_v61, %v12478_v18  ;;  %v15220_v15 = vrot.slane %v5523_v62, %v12478_v18  ;;  %5741 = vmatmul.mubr.f32.vlgmr.msra.gmra.mrb[0].mxu1 %v5586_v41  ;;  %v10663_v44 = vld [vmem:[%s15611_s5 + $0x77] ss:$8 sm:$0xf] }
 0x30b   :  { %11437 = vmatpush1.bf16.xpose.msra.mxu1 %v11436_v14  ;;  %v9467_v23 = vcombine.low %v9422_v20, %v9436_v50  ;;  %v10665_v9 = vld [vmem:[%s15611_s5 + $0xe7] ss:$8 sm:$0xf]  ;;  %v9528_v47 = vrot.slane %v9472_v16, %v12478_v18  ;;  %v11567_v53 = vpack.c.bf16 %v15205_v27, %v15200_v56  ;;  %v11442_v35 = vpack.c.bf16 %v15215_v55, %v15210_v63 }
 0x30c   :  { %v9533_v40 = vcombine.low %v9493_v38, %v9521_v12  ;;  %v9529_v52 = vcombine.low %v15132_v17, %v15157_v57  ;;  %v9534_v54 = vcombine.high %v9493_v38, %v9521_v12  ;;  %v9530_v4 = vcombine.high %v15132_v17, %v15157_v57  ;;  %v10667_v41 = vld [vmem:[%s15611_s5 + $0x157] ss:$8 sm:$0xf]  ;;  %11438 = vmatprep.subr.bf16.mxu1 %v15621_v49 }
 0x30d   :  { %v5591_v45 = vcombine.low %v5556_v32, %v5584_v13  ;;  %v9471_v38 = vcombine.low %v9450_v24, %v9464_v42  ;;  %v10668_v14 = vld [vmem:[%s15611_s5 + $0x157] ss:$8 sm:$0x70]  ;;  %v9500_v57 = vrot.slane %v9468_v36, %v12478_v18  ;;  %v5587_v10 = vcombine.low %v15220_v15, %v15243_v25  ;;  %v15331_v33 = vld [vmem:[%s15609_s3 + $0x328] sm:$0xff] }
 0x30e   :  { %9614 = vmatprep.mubr.f32.mxu0 %v9533_v40  ;;  %v10669_v17 = vld [vmem:[%s15611_s5 + $0x1c7] ss:$8 sm:$0xf]  ;;  %v5588_v1 = vcombine.high %v15220_v15, %v15243_v25  ;;  %v11444_v60 = vpack.c.bf16 %v15230_v22, %v15225_v37  ;;  %v11570_v21 = vpack.c.bf16 %v15240_v51, %v15235_v29  ;;  %v11572_v0 = vpack.c.bf16 %v15253_v34, %v15248_v19 }
 0x30f   :  { %9615 = vmatmul.mubr.f32.vlgmr.msra.gmra.mrb[0].mxu0 %v9529_v52  ;;  %v10671_v12 = vld [vmem:[%s15611_s5 + $0x237] ss:$8 sm:$0xf]  ;;  %5810 = vmatprep.mubr.f32.mxu1 %v5591_v45  ;;  %v15304_v52 = vrot.slane %v9467_v23, %v12478_v18  ;;  %v9535_v7 = vcombine.low %v9500_v57, %v9528_v47  ;;  %v5890_v6 = vor.u32 %v10662_v11, %v10661_v3 }
 0x310   :  { %11561 = vmatpush1.bf16.xpose.msra.mxu0 %v11560_v48  ;;  %9684 = vmatprep.mubr.f32.mxu0 %v9534_v54  ;;  %v10666_v48 = vld [vmem:[%s15611_s5 + $0xe7] ss:$8 sm:$0x70]  ;;  %v15307_v54 = vrot.slane %v9471_v38, %v12478_v18  ;;  %v5894_v20 = vor.u32 %v10664_v43, %v10663_v44  ;;  %v5902_v32 = vor.u32 %v10668_v14, %v10667_v41 }
 0x311   :  { %11563 = vmatprep.subr.bf16.mxu0 %v11562_v28  ;;  %v10670_v28 = vld [vmem:[%s15611_s5 + $0x1c7] ss:$8 sm:$0x70]  ;;  %v5898_v55 = vor.u32 %v10666_v48, %v10665_v9  ;;  %v15369_v45 = vmax.f32 %v5890_v6, 0.0 }
 0x312   :  { %v10672_v39 = vld [vmem:[%s15611_s5 + $0x237] ss:$8 sm:$0x70]  ;;  %v9531_v2 = vcombine.low %v15304_v52, %v15307_v54  ;;  %v5906_v13 = vor.u32 %v10670_v28, %v10669_v17  ;;  %v15371_v23 = vmax.f32 %v5894_v20, 0.0  ;;  %5811 = vmatmul.mubr.f32.vlgmr.msra.gmra.mrb[0].mxu1 %v5587_v10  ;;  %v15388_v48 = vmax.f32 %v5902_v32, 0.0 }
 0x313   :  { %v10673_v40 = vld [vmem:[%s15611_s5 + $0x2a7] ss:$8 sm:$0xf]  ;;  %v5910_v36 = vor.u32 %v10672_v39, %v10671_v12  ;;  %11441 = vmatpush3.bf16.xpose.msk.msra.mxu1 %vm12896_vm10, %v11439_v58  ;;  %11120 = vmatprep.mubr.msk.f32.mxu1 %vm11752_vm11, %v11753_v59  ;;  %v9532_v22 = vcombine.high %v15304_v52, %v15307_v54 }
 0x314   :  { %v10674_v31 = vld [vmem:[%s15611_s5 + $0x2a7] ss:$8 sm:$0x70]  ;;  %v15390_v41 = vmax.f32 %v5906_v13, 0.0  ;;  %v5950_v57 = vcombine.low %v15369_v45, %v15371_v23  ;;  %11443 = vmatprep.subr.bf16.mxu1 %v11442_v35  ;;  %v5951_v34 = vcombine.high %v15369_v45, %v15371_v23 }
 0x315   :  { %v10675_v26 = vld [vmem:[%s15611_s5 + $0x317] ss:$8 sm:$0xf]  ;;  %v5914_v43 = vor.u32 %v10674_v31, %v10673_v40  ;;  %v15392_v14 = vmax.f32 %v5910_v36, 0.0 }
 0x316   :  { %v10676_v61 = vld [vmem:[%s15611_s5 + $0x317] ss:$8 sm:$0x70]  ;;  %v5964_v35 = vrot.slane %v5950_v57, %v12478_v18 }
 0x317   :  { %v15336_v62 = vld [vmem:[%s15609_s3 + $0x360] sm:$0xff]  ;;  %v10928_v63 = vld [vmem:[%s15611_s5 + $0xaf] ss:$8 sm:$0x70]  ;;  %9685 = vmatmul.mubr.f32.vlgmr.msra.gmra.mrb[0].mxu0 %v9530_v4  ;;  %v5918_v4 = vor.u32 %v10676_v61, %v10675_v26  ;;  %v15401_v28 = vmax.f32 %v5914_v43, 0.0  ;;  %v5954_v39 = vcombine.low %v15390_v41, %v15392_v14 }
 0x318   :  { %v10925_v50 = vld [vmem:[%s15611_s5 + $0x3f] ss:$8 sm:$0xf]  ;;  %11565 = vmatpush1.bf16.xpose.msra.mxu0 %v11564_v46  ;;  %9754 = vmatprep.mubr.f32.mxu0 %v9535_v7  ;;  %v15386_v46 = vmax.f32 %v5898_v55, 0.0  ;;  %v11446_v47 = vpack.c.bf16 %v15336_v62, %v15331_v33 }
 0x319   :  { %v10926_v24 = vld [vmem:[%s15611_s5 + $0x3f] ss:$8 sm:$0x70]  ;;  %11566 = vmatprep.subr.bf16.mxu0 %v15621_v49  ;;  %v15403_v12 = vmax.f32 %v5918_v4, 0.0  ;;  %v5992_v20 = vrot.slane %v5954_v39, %v12478_v18  ;;  %v10689_v52 = vld [vmem:[%s15609_s3 + $0x370] sm:$0xff] }
 0x31a   :  { %v10927_v42 = vld [vmem:[%s15611_s5 + $0xaf] ss:$8 sm:$0xf]  ;;  %v5952_v58 = vcombine.low %v15386_v46, %v15388_v48  ;;  %v9834_v40 = vor.u32 %v10926_v24, %v10925_v50  ;;  %11121 = vmatmul.mubr.msk.f32.vlgmr.msra.gmra.mrb[0].mxu1 %vm2420_vm9, %v5588_v1 }
 0x31b   :  { %v10929_v16 = vld [vmem:[%s15611_s5 + $0x11f] ss:$8 sm:$0xf]  ;;  %v9838_v31 = vor.u32 %v10928_v63, %v10927_v42  ;;  %v5956_v61 = vcombine.low %v15401_v28, %v15403_v12  ;;  %11445 = vmatpush1.bf16.xpose.msra.mxu1 %v11444_v60 }
 0x31c   :  { %v10930_v3 = vld [vmem:[%s15611_s5 + $0x11f] ss:$8 sm:$0x70]  ;;  %v5978_v6 = vrot.slane %v5952_v58, %v12478_v18  ;;  %v15428_v32 = vmax.f32 %v9834_v40, 0.0  ;;  %11447 = vmatprep.subr.bf16.mxu1 %v11446_v47 }
 0x31d   :  { %v10931_v11 = vld [vmem:[%s15611_s5 + $0x18f] ss:$8 sm:$0xf]  ;;  %v9842_v33 = vor.u32 %v10930_v3, %v10929_v16  ;;  %v6006_v42 = vrot.slane %v5956_v61, %v12478_v18  ;;  %v15430_v36 = vmax.f32 %v9838_v31, 0.0 }
 0x31e   :  { %v10932_v44 = vld [vmem:[%s15611_s5 + $0x18f] ss:$8 sm:$0x70]  ;;  %v6015_v13 = vcombine.high %v5964_v35, %v5978_v6  ;;  %v6014_v51 = vcombine.low %v5964_v35, %v5978_v6  ;;  %v10679_v1 = vld [vmem:[%s15609_s3 + $0x320] sm:$0xff] }
 0x31f   :  { %v10933_v38 = vld [vmem:[%s15611_s5 + $0x1ff] ss:$8 sm:$0xf]  ;;  %v9846_v62 = vor.u32 %v10932_v44, %v10931_v11  ;;  %9755 = vmatmul.mubr.f32.vlgmr.msra.gmra.mrb[0].mxu0 %v9531_v2  ;;  %v15432_v43 = vmax.f32 %v9842_v33, 0.0  ;;  %v6019_v3 = vcombine.high %v5992_v20, %v6006_v42  ;;  %v6018_v25 = vcombine.low %v5992_v20, %v6006_v42 }
 0x320   :  { %v10934_v9 = vld [vmem:[%s15611_s5 + $0x1ff] ss:$8 sm:$0x70]  ;;  %11569 = vmatpush3.bf16.xpose.msk.msra.mxu0 %vm12896_vm10, %v11567_v53  ;;  %11176 = vmatprep.mubr.msk.f32.mxu0 %vm11752_vm11, %v11753_v59  ;;  %v6042_v56 = vrot.slane %v6015_v13, %v12478_v18  ;;  %v9894_v53 = vcombine.low %v15428_v32, %v15430_v36  ;;  %v15495_v57 = vrot.slane %v6014_v51, %v12478_v18 }
 0x321   :  { %v10935_v5 = vld [vmem:[%s15611_s5 + $0x26f] ss:$8 sm:$0xf]  ;;  %v9850_v50 = vor.u32 %v10934_v9, %v10933_v38  ;;  %v15434_v16 = vmax.f32 %v9846_v62, 0.0  ;;  %11571 = vmatprep.subr.bf16.mxu0 %v11570_v21  ;;  %v6070_v15 = vrot.slane %v6019_v3, %v12478_v18  ;;  %v15498_v47 = vrot.slane %v6018_v25, %v12478_v18 }
 0x322   :  { %v10936_v30 = vld [vmem:[%s15611_s5 + $0x26f] ss:$8 sm:$0x70]  ;;  %v10951_v37 = vld [vmem:[%s15609_s3 + $0x6e0] sm:$0xff]  ;;  %v9908_v38 = vrot.slane %v9894_v53, %v12478_v18 }
 0x323   :  { %v10937_v17 = vld [vmem:[%s15611_s5 + $0x2df] ss:$8 sm:$0xf]  ;;  %v9854_v24 = vor.u32 %v10936_v30, %v10935_v5  ;;  %v15443_v11 = vmax.f32 %v9850_v50, 0.0  ;;  %v9896_v4 = vcombine.low %v15432_v43, %v15434_v16  ;;  %v6082_v54 = vcombine.low %v6042_v56, %v6070_v15 }
 0x324   :  { %v10938_v10 = vld [vmem:[%s15611_s5 + $0x2df] ss:$8 sm:$0x70]  ;;  %v6078_v35 = vcombine.low %v15495_v57, %v15498_v47  ;;  %v6083_v62 = vcombine.high %v6042_v56, %v6070_v15  ;;  %v10953_v56 = vld [vmem:[%s15609_s3 + $0x6f0] sm:$0xff]  ;;  %v5957_v15 = vcombine.high %v15401_v28, %v15403_v12 }
 0x325   :  { %v10939_v26 = vld [vmem:[%s15611_s5 + $0x34f] ss:$8 sm:$0xf]  ;;  %v9858_v63 = vor.u32 %v10938_v10, %v10937_v17  ;;  %v15445_v2 = vmax.f32 %v9854_v24, 0.0  ;;  %v9922_v9 = vrot.slane %v9896_v4, %v12478_v18  ;;  %6163 = vmatprep.mubr.f32.mxu1 %v6082_v54  ;;  %v5955_v4 = vcombine.high %v15390_v41, %v15392_v14 }
 0x326   :  { %v10940_v7 = vld [vmem:[%s15611_s5 + $0x34f] ss:$8 sm:$0x70]  ;;  %v10943_v10 = vld [vmem:[%s15609_s3 + $0x6a0] sm:$0xff]  ;;  %6164 = vmatmul.mubr.f32.vlgmr.msra.gmra.mrb[0].mxu1 %v6078_v35  ;;  %v9897_v41 = vcombine.high %v15432_v43, %v15434_v16 }
 0x327   :  { %v9862_v55 = vor.u32 %v10940_v7, %v10939_v26  ;;  %v15447_v44 = vmax.f32 %v9858_v63, 0.0  ;;  %v9898_v29 = vcombine.low %v15443_v11, %v15445_v2  ;;  %v10944_v21 = vld [vmem:[%s15609_s3 + $0x6a8] sm:$0xff]  ;;  %v10686_v5 = vld [vmem:[%s15609_s3 + $0x358] sm:$0xff]  ;;  %v9959_v39 = vcombine.high %v9908_v38, %v9922_v9  ;;  %v15510_v7 = vld [vmem:[%s15609_s3 + $0x330] sm:$0xff]  ;;  %11177 = vmatmul.mubr.msk.f32.vlgmr.msra.gmra.mrb[0].mxu0 %vm2420_vm9, %v9532_v22  ;;  %6233 = vmatprep.mubr.f32.mxu1 %v6083_v62 }
 0x328   :  { %v10682_v30 = vld [vmem:[%s15609_s3 + $0x338] sm:$0xff]  ;;  %v9958_v40 = vcombine.low %v9908_v38, %v9922_v9  ;;  %v11574_v31 = vpack.c.bf16 %v10951_v37, %v10944_v21  ;;  %v10688_v61 = vld [vmem:[%s15609_s3 + $0x368] sm:$0xff]  ;;  %v11448_v33 = vpack.c.bf16 %v10686_v5, %v10679_v1  ;;  %11573 = vmatpush1.bf16.xpose.msra.mxu0 %v11572_v0  ;;  %v5953_v0 = vcombine.high %v15386_v46, %v15388_v48 }
 0x329   :  { %v15457_v27 = vmax.f32 %v9862_v55, 0.0  ;;  %v9936_v17 = vrot.slane %v9898_v29, %v12478_v18  ;;  %v10950_v26 = vld [vmem:[%s15609_s3 + $0x6d8] sm:$0xff]  ;;  %v11450_v6 = vpack.c.bf16 %v10689_v52, %v10682_v30  ;;  %v9986_v50 = vrot.slane %v9959_v39, %v12478_v18 }
 0x32a   :  { %v15520_v42 = vrot.slane %v9958_v40, %v12478_v18  ;;  %v11576_v63 = vpack.c.bf16 %v10950_v26, %v10943_v10  ;;  %v6079_v55 = vcombine.high %v15495_v57, %v15498_v47  ;;  %v11452_v13 = vpack.c.bf16 %v10688_v61, %v15510_v7  ;;  %v10946_v3 = vld [vmem:[%s15609_s3 + $0x6b8] sm:$0xff]  ;;  %11575 = vmatprep.subr.bf16.mxu0 %v11574_v31  ;;  %v10683_v47 = vld [vmem:[%s15609_s3 + $0x340] sm:$0xff] }
 0x32b   :  { %v9900_v60 = vcombine.low %v15447_v44, %v15457_v27  ;;  %11449 = vmatpush1.bf16.xpose.msra.mxu1 %v11448_v33  ;;  %v11578_v1 = vpack.c.bf16 %v10953_v56, %v10946_v3  ;;  %v5971_v21 = vrot.slane %v5951_v34, %v12478_v18  ;;  %v5985_v45 = vrot.slane %v5953_v0, %v12478_v18  ;;  %v10690_v10 = vld [vmem:[%s15609_s3 + $0x378] sm:$0xff]  ;;  %v10947_v33 = vld [vmem:[%s15609_s3 + $0x6c0] sm:$0xff] }
 0x32c   :  { %11451 = vmatprep.subr.bf16.mxu1 %v11450_v6  ;;  %v5999_v23 = vrot.slane %v5955_v4, %v12478_v18  ;;  %v6013_v46 = vrot.slane %v5957_v15, %v12478_v18  ;;  %v9895_v48 = vcombine.high %v15428_v32, %v15430_v36  ;;  %v9899_v14 = vcombine.high %v15443_v11, %v15445_v2  ;;  %v10945_v2 = vld [vmem:[%s15609_s3 + $0x6b0] sm:$0xff]  ;;  %v10954_v62 = vld [vmem:[%s15609_s3 + $0x6f8] sm:$0xff] }
 0x32d   :  { %v9950_v58 = vrot.slane %v9900_v60, %v12478_v18  ;;  %v9901_v28 = vcombine.high %v15447_v44, %v15457_v27  ;;  %v6017_v12 = vcombine.high %v5971_v21, %v5985_v45  ;;  %v6016_v22 = vcombine.low %v5971_v21, %v5985_v45  ;;  %v10952_v44 = vld [vmem:[%s15609_s3 + $0x6e8] sm:$0xff] }
 0x32e   :  { %v6021_v37 = vcombine.high %v5999_v23, %v6013_v46  ;;  %v6020_v60 = vcombine.low %v5999_v23, %v6013_v46  ;;  %v9915_v38 = vrot.slane %v9895_v48, %v12478_v18  ;;  %v9929_v9 = vrot.slane %v9897_v41, %v12478_v18 }
 0x32f   :  { %v9963_v20 = vcombine.high %v9936_v17, %v9950_v58  ;;  %v9962_v24 = vcombine.low %v9936_v17, %v9950_v58  ;;  %v9943_v32 = vrot.slane %v9899_v14, %v12478_v18  ;;  %v9957_v36 = vrot.slane %v9901_v28, %v12478_v18 }
 0x330   :  { %v6049_v43 = vrot.slane %v6017_v12, %v12478_v18  ;;  %v6077_v16 = vrot.slane %v6021_v37, %v12478_v18  ;;  %v6035_v11 = vrot.slane %v6016_v22, %v12478_v18  ;;  %v9961_v27 = vcombine.high %v9915_v38, %v9929_v9 }
 0x331   :  { %v10014_v53 = vrot.slane %v9963_v20, %v12478_v18  ;;  %v10000_v19 = vrot.slane %v9962_v24, %v12478_v18  ;;  %v9965_v5 = vcombine.high %v9943_v32, %v9957_v36  ;;  %v6063_v30 = vrot.slane %v6020_v60, %v12478_v18 }
 0x332   :  { %6234 = vmatmul.mubr.f32.vlgmr.msra.gmra.mrb[0].mxu1 %v6079_v55  ;;  %v6084_v54 = vcombine.low %v6049_v43, %v6077_v16  ;;  %v9993_v17 = vrot.slane %v9961_v27, %v12478_v18  ;;  %v9960_v58 = vcombine.low %v9915_v38, %v9929_v9  ;;  %v9964_v39 = vcombine.low %v9943_v32, %v9957_v36 }
 0x333   :  { %v10026_v29 = vcombine.low %v9986_v50, %v10014_v53  ;;  %v10022_v51 = vcombine.low %v15520_v42, %v10000_v19  ;;  %v10027_v25 = vcombine.high %v9986_v50, %v10014_v53  ;;  %11453 = vmatpush1.bf16.xpose.msra.mxu1 %v11452_v13  ;;  %v10023_v52 = vcombine.high %v15520_v42, %v10000_v19  ;;  %v10445_v50 = vld [vmem:[%s15610_s4] ss:$0 sm:$0xff] }
 0x334   :  { %11454 = vmatprep.subr.bf16.mxu1 %v15621_v49  ;;  %v10021_v57 = vrot.slane %v9965_v5, %v12478_v18  ;;  %v11580_v40 = vpack.c.bf16 %v10952_v44, %v10945_v2  ;;  %6303 = vmatprep.mubr.f32.mxu1 %v6084_v54  ;;  %v6080_v26 = vcombine.low %v6035_v11, %v6063_v30 }
 0x335   :  { %10107 = vmatprep.mubr.f32.mxu0 %v10026_v29  ;;  %v11455_v7 = vpack.c.bf16 %v10690_v10, %v10683_v47  ;;  %v9979_v61 = vrot.slane %v9960_v58, %v12478_v18  ;;  %v10007_v35 = vrot.slane %v9964_v39, %v12478_v18  ;;  %v11583_v6 = vpack.c.bf16 %v10954_v62, %v10947_v33 }
 0x336   :  { %10108 = vmatmul.mubr.f32.vlgmr.msra.gmra.mrb[0].mxu0 %v10022_v51  ;;  %v10028_v31 = vcombine.low %v9993_v17, %v10021_v57  ;;  %v6081_v20 = vcombine.high %v6035_v11, %v6063_v30 }
 0x337   :  { %11577 = vmatpush1.bf16.xpose.msra.mxu0 %v11576_v63  ;;  %10177 = vmatprep.mubr.f32.mxu0 %v10027_v25  ;;  %v10024_v18 = vcombine.low %v9979_v61, %v10007_v35 }
 0x338   :  { %11579 = vmatprep.subr.bf16.mxu0 %v11578_v1 }
 0x33a   :  { %6304 = vmatmul.mubr.f32.vlgmr.msra.gmra.mrb[0].mxu1 %v6080_v26 }
 0x33b   :  { %11457 = vmatpush3.bf16.xpose.msk.msra.mxu1 %vm12896_vm10, %v11455_v7  ;;  %11127 = vmatprep.mubr.msk.f32.mxu1 %vm11752_vm11, %v11753_v59 }
 0x33e   :  { %10178 = vmatmul.mubr.f32.vlgmr.msra.gmra.mrb[0].mxu0 %v10023_v52 }
 0x33f   :  { %11581 = vmatpush1.bf16.xpose.msra.mxu0 %v11580_v40  ;;  %10247 = vmatprep.mubr.f32.mxu0 %v10028_v31 }
 0x340   :  { %11582 = vmatprep.subr.bf16.mxu0 %v15621_v49  ;;  %v10025_v49 = vcombine.high %v9979_v61, %v10007_v35 }
 0x342   :  { %11128 = vmatmul.mubr.msk.f32.vlgmr.msra.gmra.mrb[0].mxu1 %vm2420_vm9, %v6081_v20 }
 0x346   :  { %10248 = vmatmul.mubr.f32.vlgmr.msra.gmra.mrb[0].mxu0 %v10024_v18 }
 0x347   :  { %11585 = vmatpush3.bf16.xpose.msk.msra.mxu0 %vm12896_vm10, %v11583_v6  ;;  %11183 = vmatprep.mubr.msk.f32.mxu0 %vm11752_vm11, %v11753_v59 }
 0x34e   :  { %11184 = vmatmul.mubr.msk.f32.vlgmr.msra.gmra.mrb[0].mxu0 %vm2420_vm9, %v10025_v49 }
 0x415   :  { %v6375_v24 = vpop.f32.mrb[0].mxu1 }
 0x416   :  { %v11129_v42 = vpop.f32.mrb[1].mxu1  ;;  %v11586_v63 = vadd.f32 %v10445_v50, %v6375_v24 }
 0x421   :  { %v10319_v55 = vpop.f32.mrb[0].mxu0 }
 0x422   :  { %v11587_v13 = vadd.f32 %v11586_v63, %v10319_v55  ;;  %v11185_v8 = vpop.f32.mrb[1].mxu0 }
 0x424   :  { %10325 = vst.msk [vmem:[%s15612_s6] sm:$0xff] %vm10324_vm12, %v11587_v13 }

// kernel: model_forward.3
= control target key start
LH: loop header
LB: loop body
LE: loop exit
PB: predicated region body
PF: predicated region fallthrough
CT: control target
= control target key end

     0   :  { %vm26_vm0 = vcmask 123904   ;;  %v291_v0 = vmov 0.0   ;;  %s350_s9 = smov 0   ;;  %s373_s0 = inlined_call_operand.vmem [shape: f32[4,2,16], index: 0, kind: input, shape index: {}]   ;;  %s374_s1 = inlined_call_operand.vmem [shape: f32[16,16], index: 1, kind: input, shape index: {}]   ;;  %s375_s2 = inlined_call_operand.vmem [shape: f32[1,16], index: 2, kind: input, shape index: {}]   ;;  %s376_s3 = inlined_call_operand.vmem [shape: f32[16,2], index: 3, kind: input, shape index: {}]   ;;  %s377_s4 = inlined_call_operand.vmem [shape: f32[1,2], index: 4, kind: input, shape index: {}]   ;;  %s378_s5 = inlined_call_operand.vmem [shape: f32[4,2,16], index: 5, kind: output, shape index: {0}]   ;;  %s379_s6 = inlined_call_operand.vmem [shape: f32[4,2,2], index: 6, kind: output, shape index: {1}]  }
   0x1   :  { %27 = vst.msk [vmem:[#allocation2] sm:$0x3] %vm26_vm0, %v291_v0  ;;  %28 = vst.msk [vmem:[#allocation3] sm:$0x3] %vm26_vm0, %v291_v0  ;;  %v29_v1 = vld [vmem:[%s374_s1] sm:$0xff]  ;;  %v30_v2 = vld [vmem:[%s374_s1 + $0x8] sm:$0xff] }
   0x2   :  { %v242_v3 = vld [vmem:[%s375_s2] ss:$0 sm:$0xff]  ;;  %v33_v5 = vld [vmem:[%s376_s3 + $0x8] sm:$0xff] }
   0x3   :  { %v32_v4 = vld [vmem:[%s376_s3] sm:$0xff] }
   0x4   :  { %v243_v6 = vld [vmem:[%s377_s4] ss:$0 sm:$0xff] }
   0x5 LB: > { %v266_v7 = vpack.c.bf16 %v30_v2, %v29_v1  ;;  %v292_v8 = vmov 0.0|0.0   ;;  %vm293_vm1 = vmmov 0   ;;  %v294_v9 = vmov 0.0   ;;  %s240_s1 = sshll.u32 %s289_s9, 1  ;;  %s40_s9 = sadd.s32 1, %s289_s9   ;;  %s289_s9 = sphi %s350_s9, %s40_s9  }
   0x6   : > { %265 = vmatprep.subr.bf16.mxu0 %v292_v8  ;;  %255 = vmatprep.mubr.msk.f32.mxu0 %vm293_vm1, %v294_v9  ;;  %vm46_vm2 = vcmask 130048   ;;  %v269_v11 = vpack.c.bf16 %v33_v5, %v32_v4  ;;  %s44_s4 = scalar_lea.vmem %s373_s0, %s240_s1  ;;  %s137_s12 = scalar_lea.vmem %s378_s5, %s240_s1  ;;  %vm219_vm3 = vcmask 9216  }
   0x7   : > { %267 = vmatpush3.bf16.msra.mxu0 %v266_v7  ;;  %268 = vmatprep.subr.bf16.mxu1 %v292_v8  ;;  %v45_v12 = vld [vmem:[%s44_s4] sm:$0x3]  ;;  %s218_s15 = scalar_lea.vmem %s379_s6, %s240_s1  ;;  %p37_p0 = scmp.ge.s32.totalorder %s40_s9, 4  }
   0x8   : > { %v41_v10 = vld [vmem:[#allocation2] sm:$0x3]  ;;  %262 = vmatprep.mubr.msk.f32.mxu1 %vm293_vm1, %v294_v9  ;;  %270 = vmatpush3.bf16.msra.mxu1 %v269_v11  ;;  %v42_v16 = vld [vmem:[#allocation3] sm:$0x3] }
   0xa   : > { %256 = vmatmul.mubr.msk.f32.vlgmr.msra.gmra.mrb[0].mxu0 %vm46_vm2, %v41_v10 }
  0xdd   : > { %v116_v13 = vpop.f32.mrb[0].mxu0 }
  0xde   : > { %v120_v14 = vadd.f32 %v116_v13, %v45_v12  ;;  %v257_v15 = vpop.f32.mrb[1].mxu0 }
  0xe0   : > { %v127_v17 = vadd.f32 %v242_v3, %v120_v14 }
  0xe2   : > { %v128_v18 = vsub.f32 %v127_v17, %v42_v16 }
  0xe4   : > { %v129_v19 = vmax.f32 %v128_v18, 0.0 }
  0xe6   : > { %v130_v20 = vmul.f32 0.4, %v129_v19  ;;  %136 = vst.msk [vmem:[#allocation2] sm:$0x3] %vm26_vm0, %v129_v19  ;;  %138 = vst.msk [vmem:[%s137_s12] sm:$0x3] %vm26_vm0, %v129_v19  ;;  %263 = vmatmul.mubr.msk.f32.vlgmr.msra.gmra.mrb[0].mxu1 %vm46_vm2, %v129_v19 }
  0xe8   : > { %v131_v21 = vadd.f32 %v130_v20, %v42_v16 }
  0xea   : > { %v132_v22 = vmul.f32 0.1, %v131_v21 }
  0xec   : > { %v133_v23 = vsub.f32 %v131_v21, %v132_v22 }
  0xee   : > { %135 = vst.msk [vmem:[#allocation3] sm:$0x3] %vm26_vm0, %v133_v23 }
 0x1b6   :  { %39 = sbr.rel (!%p37_p0) target bundleno = 5 (0x5), region = 62 }
 0x1b9   : > { %v214_v24 = vpop.f32.mrb[0].mxu1 }
 0x1ba   : > { %v215_v25 = vadd.f32 %v243_v6, %v214_v24  ;;  %v264_v26 = vpop.f32.mrb[1].mxu1 }
 0x1bc   : > { %220 = vst.msk [vmem:[%s218_s15] sm:$0x3] %vm219_vm3, %v215_v25 }

</bundles_post_ra>
